<compile_context>
chip_gen: v5e
topology: v5e:2x2
jax: 0.10.0
libtpu: 0.0.40
codegen_flags: <defaults>
</compile_context>

<pallas_src>
import jax
import jax.numpy as jnp
from jax import lax
from jax.experimental import pallas as pl
from jax.experimental.pallas import tpu as pltpu

# ----------------------------- configuration --------------------------------
VOCAB_SIZE = 50
VOCAB_PAD = 128          # one-hot width (lane aligned); rows >= VOCAB_SIZE are zero
EMBED_SIZE = 32
HIDDEN_SIZE = 32         # must be a power of two <= 128 for the lane layout used
NUM_LAYERS = 2
NUM_DIRECTION = 2        # bidirectional
DEAL_BI = "linear"
BATCH = 2
BATCH_PAD = 8            # sublane-aligned padded batch
SRC_LEN = 8


# ----------------------------- fused Pallas kernel --------------------------
def _make_encoder_kernel(T, B, BP, H, L, VP):
    """Fused encoder kernel for static (T, B, BP, H, L)."""
    f32 = jnp.float32

    def kernel(*refs):
        # refs: len(SMEM), tok, h0, [wih, bih, whh, bhh_n] * L, wc, rnn_out, hidden
        len_ref = refs[0]                       # (B,) int32 scalar-prefetch (SMEM)
        tok_ref, h0_ref = refs[1], refs[2]      # (T*BP,1) int32 ; (L*2*B, H)
        layer_refs = refs[3:3 + 4 * L]
        wc_ref = refs[3 + 4 * L]
        rnn_out_ref = refs[4 + 4 * L]           # (BP, T*H)  lane-dense
        hidden_ref = refs[5 + 4 * L]            # (L*BP, H)

        # ---- packed-sequence validity masks, built in-kernel from lengths ----
        # mcomb[t, b, j]: j <  H -> fwd mask for time t
        #                 j >= H -> bwd mask for time T-1-t (time processed at step t)
        t3 = lax.broadcasted_iota(jnp.int32, (T, BP, 2 * H), 0)
        b3 = lax.broadcasted_iota(jnp.int32, (T, BP, 2 * H), 1)
        l3 = lax.broadcasted_iota(jnp.int32, (T, BP, 2 * H), 2)
        tq = jnp.where(l3 < H, t3, (T - 1) - t3)
        valid = (b3 == 0) & (tq < len_ref[0])
        for b in range(1, B):
            valid = valid | ((b3 == b) & (tq < len_ref[b]))
        mcomb = valid.astype(f32)               # (T, BP, 2H), hoisted broadcast
        minv = 1.0 - mcomb

        # fwd/bwd column-select masks for gate order [r_f r_b z_f z_b n_f n_b]
        lane_rz = lax.broadcasted_iota(jnp.int32, (BP, 4 * H), 1)
        cmask_rz = (lane_rz < H) | ((lane_rz >= 2 * H) & (lane_rz < 3 * H))
        lane_n = lax.broadcasted_iota(jnp.int32, (BP, 2 * H), 1)
        cmask_n = lane_n < H

        # ---- embedding (folded into layer-0 W_ih at init): one-hot matmul ----
        tok = tok_ref[...]                                              # (T*BP,1)
        onehot = (tok == lax.broadcasted_iota(jnp.int32, (T * BP, VP), 1)
                  ).astype(f32)                                         # (T*BP,VP)
        # dropout after embedding (eval mode) -> identity (folded exactly)

        x_val = onehot                       # layer-0 "input" feeds folded weights
        h_finals = []
        for l in range(L):
            wih_ref, bih_ref, whh_ref, bhhn_ref = layer_refs[4 * l:4 * l + 4]

            # Hoisted input projection: one MXU matmul for all T steps & dirs.
            gi = jnp.dot(x_val, wih_ref[...], preferred_element_type=f32)
            gi = gi + jnp.broadcast_to(bih_ref[...], gi.shape)          # (T*BP,6H)
            whh = whh_ref[...]                                          # (2H, 6H)
            bhh_n = jnp.broadcast_to(bhhn_ref[...], (BP, 2 * H))        # hoisted

            # initial hidden (runtime input), padded to BP sublanes, once per layer
            base = l * 2 * B
            h = jnp.concatenate(
                [jnp.concatenate([h0_ref[base:base + B, :],
                                  h0_ref[base + B:base + 2 * B, :]], axis=1),
                 jnp.zeros((BP - B, 2 * H), f32)], axis=0)              # (BP, 2H)

            of = [None] * T
            ob = [None] * T
            for t in range(T):                 # static unroll, T compile-time
                tb = T - 1 - t                 # backward direction's time index
                gf = gi[t * BP:(t + 1) * BP, :]        # aligned 8-row vreg slices
                gb = gi[tb * BP:(tb + 1) * BP, :]
                gh = jnp.dot(h, whh, preferred_element_type=f32)        # (BP,6H)

                # one sigmoid over 128 lanes (r_f r_b z_f z_b), one tanh over 64
                rz = jax.nn.sigmoid(
                    jnp.where(cmask_rz, gf[:, 0:4 * H], gb[:, 0:4 * H])
                    + gh[:, 0:4 * H])
                r = rz[:, 0:2 * H]
                z = rz[:, 2 * H:4 * H]
                gn = jnp.where(cmask_n, gf[:, 4 * H:6 * H], gb[:, 4 * H:6 * H])
                n = jnp.tanh(gn + r * (gh[:, 4 * H:6 * H] + bhh_n))

                h_new = n + z * (h - n)        # == (1-z)*n + z*h
                m = mcomb[t]                   # pre-broadcast mask, free slice
                hm = m * h_new
                h = hm + minv[t] * h           # hold hidden on padded steps

                of[t] = hm[:, 0:H]             # fwd output for time t  (0 if padded)
                ob[tb] = hm[:, H:2 * H]        # bwd output for time tb (0 if padded)

            h_finals.append(h)
            # assemble this layer's time-major output once (next layer's input)
            x_val = jnp.concatenate(
                [jnp.concatenate([of[t], ob[t]], axis=1) for t in range(T)],
                axis=0)                                                  # (T*BP,2H)
            # inter-layer dropout (eval mode) -> identity

        # ---- deal_bi == 'linear' compress + lane-dense final stores ----------
        wc = wc_ref[...]                                                 # (2H, H)
        comp = jnp.dot(x_val, wc, preferred_element_type=f32)            # (T*BP,H)
        rnn_out_ref[...] = jnp.concatenate(
            [comp[t * BP:(t + 1) * BP, :] for t in range(T)], axis=1)    # (BP,T*H)
        hidden_ref[...] = jnp.concatenate(
            [jnp.dot(hf, wc, preferred_element_type=f32) for hf in h_finals],
            axis=0)                                                      # (L*BP,H)

    return kernel


# ----------------------------- parameter init --------------------------------
def init_params(key):
    H, E, L, D = HIDDEN_SIZE, EMBED_SIZE, NUM_LAYERS, NUM_DIRECTION

    def uni(k, shape, scale=0.1):
        return jax.random.uniform(k, shape, jnp.float32, -scale, scale)

    keys = list(jax.random.split(key, 2 + 4 * L * D))
    ki = iter(keys)

    embedding = uni(next(ki), (VOCAB_SIZE, E))
    raw = []
    for layer in range(L):
        in_size = E if layer == 0 else D * H
        dirs = []
        for _d in range(D):
            dirs.append(dict(wih_t=uni(next(ki), (in_size, 3 * H)),   # cols [r|z|n]
                             whh_t=uni(next(ki), (H, 3 * H)),
                             bih=uni(next(ki), (1, 3 * H)),
                             bhh=uni(next(ki), (1, 3 * H))))
        raw.append(dirs)
    wc = uni(next(ki), (D * H, H))            # linear_compress weight (transposed)

    # ---- repack into the kernel layout (done once at init) -----------------
    def gcol(w, g):                           # gate column block g in {0:r,1:z,2:n}
        return w[:, g * H:(g + 1) * H]

    emb_pad = jnp.zeros((VOCAB_PAD, E), jnp.float32).at[:VOCAB_SIZE].set(embedding)

    layers = []
    for layer in range(L):
        f, b = raw[layer]
        # gate column order: [r_f | r_b | z_f | z_b | n_f | n_b], each H wide
        wih = jnp.concatenate([gcol(f["wih_t"], 0), gcol(b["wih_t"], 0),
                               gcol(f["wih_t"], 1), gcol(b["wih_t"], 1),
                               gcol(f["wih_t"], 2), gcol(b["wih_t"], 2)], axis=1)
        if layer == 0:
            # fold the embedding table into layer-0 input weights (dropout = id)
            wih = emb_pad @ wih                                   # (VOCAB_PAD, 6H)
        # fold bhh into bih for r/z columns; n-gate bhh stays separate
        bih = jnp.concatenate(
            [gcol(f["bih"], 0) + gcol(f["bhh"], 0), gcol(b["bih"], 0) + gcol(b["bhh"], 0),
             gcol(f["bih"], 1) + gcol(f["bhh"], 1), gcol(b["bih"], 1) + gcol(b["bhh"], 1),
             gcol(f["bih"], 2), gcol(b["bih"], 2)], axis=1)       # (1, 6H)
        whh = jnp.zeros((D * H, 6 * H), jnp.float32)              # block structure
        whh = whh.at[0:H, 0:H].set(gcol(f["whh_t"], 0))
        whh = whh.at[H:2 * H, H:2 * H].set(gcol(b["whh_t"], 0))
        whh = whh.at[0:H, 2 * H:3 * H].set(gcol(f["whh_t"], 1))
        whh = whh.at[H:2 * H, 3 * H:4 * H].set(gcol(b["whh_t"], 1))
        whh = whh.at[0:H, 4 * H:5 * H].set(gcol(f["whh_t"], 2))
        whh = whh.at[H:2 * H, 5 * H:6 * H].set(gcol(b["whh_t"], 2))
        bhh_n = jnp.concatenate([gcol(f["bhh"], 2), gcol(b["bhh"], 2)], axis=1)
        layers.append(dict(wih=wih, bih=bih, whh=whh, bhh_n=bhh_n))

    return dict(layers=layers, wc=wc)


# ----------------------------- forward pass ----------------------------------
@jax.jit
def encoder_forward(params, tokens, hidden0, lengths):
    """
    tokens:  (B, T) int32
    hidden0: (num_layers * num_direction, B, H)
    lengths: (B,) int32, sorted descending, lengths[0] == T, all >= 1
    returns: rnn_out (B, T, H), hidden (num_layers, B, H)
    """
    B, T = tokens.shape
    H, D, L, BP = HIDDEN_SIZE, NUM_DIRECTION, NUM_LAYERS, BATCH_PAD
    assert B <= BP

    # time-major, batch-padded tokens: row t*BP + b. Pad slots point at a zero
    # embedding row; padded rows are fully masked in-kernel anyway.
    tok_tm = jnp.full((T, BP), VOCAB_PAD - 1, jnp.int32)
    tok_tm = tok_tm.at[:, :B].set(jnp.transpose(tokens).astype(jnp.int32))
    tok_tm = tok_tm.reshape(T * BP, 1)

    h0 = hidden0.reshape(L * D * B, H)        # contiguous reshape only

    inputs = [tok_tm, h0]
    for l in range(L):
        lp = params["layers"][l]
        inputs += [lp["wih"], lp["bih"], lp["whh"], lp["bhh_n"]]
    inputs.append(params["wc"])

    grid_spec = pltpu.PrefetchScalarGridSpec(
        num_scalar_prefetch=1,                 # lengths -> SMEM, mask built in-kernel
        grid=(1,),                             # fully fused, single step
        in_specs=[pl.BlockSpec(x.shape, lambda i, *_: (0, 0)) for x in inputs],
        out_specs=[
            pl.BlockSpec((BP, T * H), lambda i, *_: (0, 0)),   # rnn_out, lane-dense
            pl.BlockSpec((L * BP, H), lambda i, *_: (0, 0)),   # hidden
        ],
    )

    rnn_flat, hid_flat = pl.pallas_call(
        _make_encoder_kernel(T, B, BP, H, L, VOCAB_PAD),
        out_shape=(jax.ShapeDtypeStruct((BP, T * H), jnp.float32),
                   jax.ShapeDtypeStruct((L * BP, H), jnp.float32)),
        grid_spec=grid_spec,
        compiler_params=pltpu.CompilerParams(dimension_semantics=("arbitrary",)),
    )(lengths.astype(jnp.int32), *inputs)

    rnn_out = rnn_flat[:B, :].reshape(B, T, H)          # no transpose needed
    hidden = hid_flat.reshape(L, BP, H)[:, :B, :]       # (L, B, H)
    return rnn_out, hidden


# --------------------------------- main ---------------------------------------
if __name__ == "__main__":
    key = jax.random.PRNGKey(0)
    pkey, tkey, hkey = jax.random.split(key, 3)

    params = init_params(pkey)
    tokens = jax.random.randint(tkey, (BATCH, SRC_LEN), 0, VOCAB_SIZE, jnp.int32)
    hidden0 = jax.random.normal(
        hkey, (NUM_DIRECTION * NUM_LAYERS, BATCH, HIDDEN_SIZE), jnp.float32)
    lengths = jnp.array([SRC_LEN, SRC_LEN - 3], dtype=jnp.int32)  # sorted desc

    rnn_out, hidden = encoder_forward(params, tokens, hidden0, lengths)
    jax.block_until_ready((rnn_out, hidden))

    assert rnn_out.shape == (BATCH, SRC_LEN, HIDDEN_SIZE)
    assert hidden.shape == (NUM_LAYERS, BATCH, HIDDEN_SIZE)
    print("KERNEL_OK")
</pallas_src>

<mosaic_0001>
module attributes {stable_mosaic.version = 11 : i64} {
  func.func @kernel(%arg0: i32, %arg1: memref<2xi32, #tpu.memory_space<smem>>, %arg2: memref<64x1xi32, #tpu.memory_space<vmem>>, %arg3: memref<8x32xf32, #tpu.memory_space<vmem>>, %arg4: memref<128x192xf32, #tpu.memory_space<vmem>>, %arg5: memref<1x192xf32, #tpu.memory_space<vmem>>, %arg6: memref<64x192xf32, #tpu.memory_space<vmem>>, %arg7: memref<1x64xf32, #tpu.memory_space<vmem>>, %arg8: memref<64x192xf32, #tpu.memory_space<vmem>>, %arg9: memref<1x192xf32, #tpu.memory_space<vmem>>, %arg10: memref<64x192xf32, #tpu.memory_space<vmem>>, %arg11: memref<1x64xf32, #tpu.memory_space<vmem>>, %arg12: memref<64x32xf32, #tpu.memory_space<vmem>>, %arg13: memref<8x256xf32, #tpu.memory_space<vmem>>, %arg14: memref<16x32xf32, #tpu.memory_space<vmem>>) attributes {dimension_semantics = [#tpu.dimension_semantics<arbitrary>], iteration_bounds = array<i64: 1>, scalar_prefetch = 1 : i64, scratch_operands = 0 : i64, tpu.core_type = #tpu.core_type<tc>, window_params = [{pipeline_mode = #tpu.pipeline_mode<synchronous>, transform_indices = @transform_0, window_bounds = array<i64: 64, 1>}, {pipeline_mode = #tpu.pipeline_mode<synchronous>, transform_indices = @transform_1, window_bounds = array<i64: 8, 32>}, {pipeline_mode = #tpu.pipeline_mode<synchronous>, transform_indices = @transform_2, window_bounds = array<i64: 128, 192>}, {pipeline_mode = #tpu.pipeline_mode<synchronous>, transform_indices = @transform_3, window_bounds = array<i64: 1, 192>}, {pipeline_mode = #tpu.pipeline_mode<synchronous>, transform_indices = @transform_4, window_bounds = array<i64: 64, 192>}, {pipeline_mode = #tpu.pipeline_mode<synchronous>, transform_indices = @transform_5, window_bounds = array<i64: 1, 64>}, {pipeline_mode = #tpu.pipeline_mode<synchronous>, transform_indices = @transform_6, window_bounds = array<i64: 64, 192>}, {pipeline_mode = #tpu.pipeline_mode<synchronous>, transform_indices = @transform_7, window_bounds = array<i64: 1, 192>}, {pipeline_mode = #tpu.pipeline_mode<synchronous>, transform_indices = @transform_8, window_bounds = array<i64: 64, 192>}, {pipeline_mode = #tpu.pipeline_mode<synchronous>, transform_indices = @transform_9, window_bounds = array<i64: 1, 64>}, {pipeline_mode = #tpu.pipeline_mode<synchronous>, transform_indices = @transform_10, window_bounds = array<i64: 64, 32>}, {pipeline_mode = #tpu.pipeline_mode<synchronous>, transform_indices = @transform_11, window_bounds = array<i64: 8, 256>}, {pipeline_mode = #tpu.pipeline_mode<synchronous>, transform_indices = @transform_12, window_bounds = array<i64: 16, 32>}]} {
    %0 = tpu.iota {dimensions = array<i32: 0>} : vector<8x8x64xi32>
    %1 = tpu.iota {dimensions = array<i32: 1>} : vector<8x8x64xi32>
    %2 = tpu.iota {dimensions = array<i32: 2>} : vector<8x8x64xi32>
    %c32_i32 = arith.constant 32 : i32
    %3 = vector.broadcast %c32_i32 : i32 to vector<8x8x64xi32>
    %4 = arith.cmpi slt, %2, %3 : vector<8x8x64xi32>
    %c7_i32 = arith.constant 7 : i32
    %5 = vector.broadcast %c7_i32 : i32 to vector<8x8x64xi32>
    %6 = arith.subi %5, %0 : vector<8x8x64xi32>
    %7 = arith.select %4, %0, %6 : vector<8x8x64xi1>, vector<8x8x64xi32>
    %c0_i32 = arith.constant 0 : i32
    %8 = vector.broadcast %c0_i32 : i32 to vector<8x8x64xi32>
    %9 = arith.cmpi eq, %1, %8 : vector<8x8x64xi32>
    %c0 = arith.constant 0 : index
    %10 = memref.load %arg1[%c0] : memref<2xi32, #tpu.memory_space<smem>>
    %11 = vector.broadcast %10 : i32 to vector<8x8x64xi32>
    %12 = arith.cmpi slt, %7, %11 : vector<8x8x64xi32>
    %13 = arith.andi %9, %12 : vector<8x8x64xi1>
    %c1_i32 = arith.constant 1 : i32
    %14 = vector.broadcast %c1_i32 : i32 to vector<8x8x64xi32>
    %15 = arith.cmpi eq, %1, %14 : vector<8x8x64xi32>
    %c1 = arith.constant 1 : index
    %16 = memref.load %arg1[%c1] : memref<2xi32, #tpu.memory_space<smem>>
    %17 = vector.broadcast %16 : i32 to vector<8x8x64xi32>
    %18 = arith.cmpi slt, %7, %17 : vector<8x8x64xi32>
    %19 = arith.andi %15, %18 : vector<8x8x64xi1>
    %20 = arith.ori %13, %19 : vector<8x8x64xi1>
    %21 = arith.extui %20 : vector<8x8x64xi1> to vector<8x8x64xi32>
    %22 = arith.sitofp %21 : vector<8x8x64xi32> to vector<8x8x64xf32>
    %cst = arith.constant 1.000000e+00 : f32
    %23 = vector.broadcast %cst : f32 to vector<8x8x64xf32>
    %24 = arith.subf %23, %22 : vector<8x8x64xf32>
    %25 = tpu.iota {dimensions = array<i32: 1>} : vector<8x128xi32>
    %c32_i32_0 = arith.constant 32 : i32
    %26 = vector.broadcast %c32_i32_0 : i32 to vector<8x128xi32>
    %27 = arith.cmpi slt, %25, %26 : vector<8x128xi32>
    %c64_i32 = arith.constant 64 : i32
    %28 = vector.broadcast %c64_i32 : i32 to vector<8x128xi32>
    %29 = arith.cmpi sge, %25, %28 : vector<8x128xi32>
    %c96_i32 = arith.constant 96 : i32
    %30 = vector.broadcast %c96_i32 : i32 to vector<8x128xi32>
    %31 = arith.cmpi slt, %25, %30 : vector<8x128xi32>
    %32 = arith.andi %29, %31 : vector<8x128xi1>
    %33 = arith.ori %27, %32 : vector<8x128xi1>
    %34 = tpu.iota {dimensions = array<i32: 1>} : vector<8x64xi32>
    %c32_i32_1 = arith.constant 32 : i32
    %35 = vector.broadcast %c32_i32_1 : i32 to vector<8x64xi32>
    %36 = arith.cmpi slt, %34, %35 : vector<8x64xi32>
    %c0_2 = arith.constant 0 : index
    %c0_3 = arith.constant 0 : index
    %37 = vector.load %arg2[%c0_2, %c0_3] : memref<64x1xi32, #tpu.memory_space<vmem>>, vector<64x1xi32>
    %38 = tpu.iota {dimensions = array<i32: 1>} : vector<64x128xi32>
    %39 = vector.broadcast %37 : vector<64x1xi32> to vector<64x128xi32>
    %40 = arith.cmpi eq, %39, %38 : vector<64x128xi32>
    %41 = arith.extui %40 : vector<64x128xi1> to vector<64x128xi32>
    %42 = arith.sitofp %41 : vector<64x128xi32> to vector<64x128xf32>
    %c0_4 = arith.constant 0 : index
    %c0_5 = arith.constant 0 : index
    %43 = vector.load %arg4[%c0_4, %c0_5] : memref<128x192xf32, #tpu.memory_space<vmem>>, vector<128x192xf32>
    %cst_6 = arith.constant dense<0.000000e+00> : vector<64x192xf32>
    %44 = tpu.matmul %42, %43, %cst_6 {dimension_numbers = #tpu.dot_dimension_numbers<[1], [0], [0], [1], [0, 0, 1, 1], [], []>} : vector<64x128xf32>, vector<128x192xf32>, vector<64x192xf32> -> vector<64x192xf32>
    %c0_7 = arith.constant 0 : index
    %c0_8 = arith.constant 0 : index
    %45 = vector.load %arg5[%c0_7, %c0_8] : memref<1x192xf32, #tpu.memory_space<vmem>>, vector<1x192xf32>
    %46 = vector.shape_cast %45 : vector<1x192xf32> to vector<1x192xf32>
    %47 = vector.broadcast %46 : vector<1x192xf32> to vector<64x192xf32>
    %48 = arith.addf %44, %47 : vector<64x192xf32>
    %c0_9 = arith.constant 0 : index
    %c0_10 = arith.constant 0 : index
    %49 = vector.load %arg6[%c0_9, %c0_10] : memref<64x192xf32, #tpu.memory_space<vmem>>, vector<64x192xf32>
    %c0_11 = arith.constant 0 : index
    %c0_12 = arith.constant 0 : index
    %50 = vector.load %arg7[%c0_11, %c0_12] : memref<1x64xf32, #tpu.memory_space<vmem>>, vector<1x64xf32>
    %51 = vector.shape_cast %50 : vector<1x64xf32> to vector<1x64xf32>
    %52 = vector.broadcast %51 : vector<1x64xf32> to vector<8x64xf32>
    %c0_13 = arith.constant 0 : index
    %c0_14 = arith.constant 0 : index
    %53 = vector.load %arg3[%c0_13, %c0_14] : memref<8x32xf32, #tpu.memory_space<vmem>>, vector<2x32xf32>
    %c2 = arith.constant 2 : index
    %c0_15 = arith.constant 0 : index
    %54 = vector.load %arg3[%c2, %c0_15] : memref<8x32xf32, #tpu.memory_space<vmem>>, vector<2x32xf32>
    %55 = tpu.concatenate %53, %54 in 1 : vector<2x32xf32>, vector<2x32xf32> -> vector<2x64xf32>
    %cst_16 = arith.constant 0.000000e+00 : f32
    %56 = vector.broadcast %cst_16 : f32 to vector<6x64xf32>
    %57 = tpu.concatenate %55, %56 in 0 : vector<2x64xf32>, vector<6x64xf32> -> vector<8x64xf32>
    %58 = vector.extract_strided_slice %48 {offsets = [0, 0], sizes = [8, 192], strides = [1, 1]} : vector<64x192xf32> to vector<8x192xf32>
    %59 = vector.extract_strided_slice %48 {offsets = [56, 0], sizes = [8, 192], strides = [1, 1]} : vector<64x192xf32> to vector<8x192xf32>
    %cst_17 = arith.constant dense<0.000000e+00> : vector<8x192xf32>
    %60 = tpu.matmul %57, %49, %cst_17 {dimension_numbers = #tpu.dot_dimension_numbers<[1], [0], [0], [1], [0, 0, 1, 1], [], []>} : vector<8x64xf32>, vector<64x192xf32>, vector<8x192xf32> -> vector<8x192xf32>
    %61 = vector.extract_strided_slice %58 {offsets = [0, 0], sizes = [8, 128], strides = [1, 1]} : vector<8x192xf32> to vector<8x128xf32>
    %62 = vector.extract_strided_slice %59 {offsets = [0, 0], sizes = [8, 128], strides = [1, 1]} : vector<8x192xf32> to vector<8x128xf32>
    %63 = arith.select %33, %61, %62 : vector<8x128xi1>, vector<8x128xf32>
    %64 = vector.extract_strided_slice %60 {offsets = [0, 0], sizes = [8, 128], strides = [1, 1]} : vector<8x192xf32> to vector<8x128xf32>
    %65 = arith.addf %63, %64 : vector<8x128xf32>
    %66 = arith.negf %65 : vector<8x128xf32>
    %67 = math.exp %66 : vector<8x128xf32>
    %cst_18 = arith.constant 1.000000e+00 : f32
    %68 = vector.broadcast %cst_18 : f32 to vector<8x128xf32>
    %69 = arith.addf %68, %67 : vector<8x128xf32>
    %70 = arith.divf %68, %69 : vector<8x128xf32>
    %71 = vector.extract_strided_slice %70 {offsets = [0, 0], sizes = [8, 64], strides = [1, 1]} : vector<8x128xf32> to vector<8x64xf32>
    %72 = vector.extract_strided_slice %70 {offsets = [0, 64], sizes = [8, 64], strides = [1, 1]} : vector<8x128xf32> to vector<8x64xf32>
    %73 = vector.extract_strided_slice %58 {offsets = [0, 128], sizes = [8, 64], strides = [1, 1]} : vector<8x192xf32> to vector<8x64xf32>
    %74 = vector.extract_strided_slice %59 {offsets = [0, 128], sizes = [8, 64], strides = [1, 1]} : vector<8x192xf32> to vector<8x64xf32>
    %75 = arith.select %36, %73, %74 : vector<8x64xi1>, vector<8x64xf32>
    %76 = vector.extract_strided_slice %60 {offsets = [0, 128], sizes = [8, 64], strides = [1, 1]} : vector<8x192xf32> to vector<8x64xf32>
    %77 = arith.addf %76, %52 : vector<8x64xf32>
    %78 = arith.mulf %71, %77 : vector<8x64xf32>
    %79 = arith.addf %75, %78 : vector<8x64xf32>
    %80 = math.tanh %79 : vector<8x64xf32>
    %81 = arith.subf %57, %80 : vector<8x64xf32>
    %82 = arith.mulf %72, %81 : vector<8x64xf32>
    %83 = arith.addf %80, %82 : vector<8x64xf32>
    %84 = vector.extract_strided_slice %22 {offsets = [0, 0, 0], sizes = [1, 8, 64], strides = [1, 1, 1]} : vector<8x8x64xf32> to vector<1x8x64xf32>
    %85 = vector.shape_cast %84 : vector<1x8x64xf32> to vector<8x64xf32>
    %86 = arith.mulf %85, %83 : vector<8x64xf32>
    %87 = vector.extract_strided_slice %24 {offsets = [0, 0, 0], sizes = [1, 8, 64], strides = [1, 1, 1]} : vector<8x8x64xf32> to vector<1x8x64xf32>
    %88 = vector.shape_cast %87 : vector<1x8x64xf32> to vector<8x64xf32>
    %89 = arith.mulf %88, %57 : vector<8x64xf32>
    %90 = arith.addf %86, %89 : vector<8x64xf32>
    %91 = vector.extract_strided_slice %86 {offsets = [0, 0], sizes = [8, 32], strides = [1, 1]} : vector<8x64xf32> to vector<8x32xf32>
    %92 = vector.extract_strided_slice %86 {offsets = [0, 32], sizes = [8, 32], strides = [1, 1]} : vector<8x64xf32> to vector<8x32xf32>
    %93 = vector.extract_strided_slice %48 {offsets = [8, 0], sizes = [8, 192], strides = [1, 1]} : vector<64x192xf32> to vector<8x192xf32>
    %94 = vector.extract_strided_slice %48 {offsets = [48, 0], sizes = [8, 192], strides = [1, 1]} : vector<64x192xf32> to vector<8x192xf32>
    %cst_19 = arith.constant dense<0.000000e+00> : vector<8x192xf32>
    %95 = tpu.matmul %90, %49, %cst_19 {dimension_numbers = #tpu.dot_dimension_numbers<[1], [0], [0], [1], [0, 0, 1, 1], [], []>} : vector<8x64xf32>, vector<64x192xf32>, vector<8x192xf32> -> vector<8x192xf32>
    %96 = vector.extract_strided_slice %93 {offsets = [0, 0], sizes = [8, 128], strides = [1, 1]} : vector<8x192xf32> to vector<8x128xf32>
    %97 = vector.extract_strided_slice %94 {offsets = [0, 0], sizes = [8, 128], strides = [1, 1]} : vector<8x192xf32> to vector<8x128xf32>
    %98 = arith.select %33, %96, %97 : vector<8x128xi1>, vector<8x128xf32>
    %99 = vector.extract_strided_slice %95 {offsets = [0, 0], sizes = [8, 128], strides = [1, 1]} : vector<8x192xf32> to vector<8x128xf32>
    %100 = arith.addf %98, %99 : vector<8x128xf32>
    %101 = arith.negf %100 : vector<8x128xf32>
    %102 = math.exp %101 : vector<8x128xf32>
    %cst_20 = arith.constant 1.000000e+00 : f32
    %103 = vector.broadcast %cst_20 : f32 to vector<8x128xf32>
    %104 = arith.addf %103, %102 : vector<8x128xf32>
    %105 = arith.divf %103, %104 : vector<8x128xf32>
    %106 = vector.extract_strided_slice %105 {offsets = [0, 0], sizes = [8, 64], strides = [1, 1]} : vector<8x128xf32> to vector<8x64xf32>
    %107 = vector.extract_strided_slice %105 {offsets = [0, 64], sizes = [8, 64], strides = [1, 1]} : vector<8x128xf32> to vector<8x64xf32>
    %108 = vector.extract_strided_slice %93 {offsets = [0, 128], sizes = [8, 64], strides = [1, 1]} : vector<8x192xf32> to vector<8x64xf32>
    %109 = vector.extract_strided_slice %94 {offsets = [0, 128], sizes = [8, 64], strides = [1, 1]} : vector<8x192xf32> to vector<8x64xf32>
    %110 = arith.select %36, %108, %109 : vector<8x64xi1>, vector<8x64xf32>
    %111 = vector.extract_strided_slice %95 {offsets = [0, 128], sizes = [8, 64], strides = [1, 1]} : vector<8x192xf32> to vector<8x64xf32>
    %112 = arith.addf %111, %52 : vector<8x64xf32>
    %113 = arith.mulf %106, %112 : vector<8x64xf32>
    %114 = arith.addf %110, %113 : vector<8x64xf32>
    %115 = math.tanh %114 : vector<8x64xf32>
    %116 = arith.subf %90, %115 : vector<8x64xf32>
    %117 = arith.mulf %107, %116 : vector<8x64xf32>
    %118 = arith.addf %115, %117 : vector<8x64xf32>
    %119 = vector.extract_strided_slice %22 {offsets = [1, 0, 0], sizes = [1, 8, 64], strides = [1, 1, 1]} : vector<8x8x64xf32> to vector<1x8x64xf32>
    %120 = vector.shape_cast %119 : vector<1x8x64xf32> to vector<8x64xf32>
    %121 = arith.mulf %120, %118 : vector<8x64xf32>
    %122 = vector.extract_strided_slice %24 {offsets = [1, 0, 0], sizes = [1, 8, 64], strides = [1, 1, 1]} : vector<8x8x64xf32> to vector<1x8x64xf32>
    %123 = vector.shape_cast %122 : vector<1x8x64xf32> to vector<8x64xf32>
    %124 = arith.mulf %123, %90 : vector<8x64xf32>
    %125 = arith.addf %121, %124 : vector<8x64xf32>
    %126 = vector.extract_strided_slice %121 {offsets = [0, 0], sizes = [8, 32], strides = [1, 1]} : vector<8x64xf32> to vector<8x32xf32>
    %127 = vector.extract_strided_slice %121 {offsets = [0, 32], sizes = [8, 32], strides = [1, 1]} : vector<8x64xf32> to vector<8x32xf32>
    %128 = vector.extract_strided_slice %48 {offsets = [16, 0], sizes = [8, 192], strides = [1, 1]} : vector<64x192xf32> to vector<8x192xf32>
    %129 = vector.extract_strided_slice %48 {offsets = [40, 0], sizes = [8, 192], strides = [1, 1]} : vector<64x192xf32> to vector<8x192xf32>
    %cst_21 = arith.constant dense<0.000000e+00> : vector<8x192xf32>
    %130 = tpu.matmul %125, %49, %cst_21 {dimension_numbers = #tpu.dot_dimension_numbers<[1], [0], [0], [1], [0, 0, 1, 1], [], []>} : vector<8x64xf32>, vector<64x192xf32>, vector<8x192xf32> -> vector<8x192xf32>
    %131 = vector.extract_strided_slice %128 {offsets = [0, 0], sizes = [8, 128], strides = [1, 1]} : vector<8x192xf32> to vector<8x128xf32>
    %132 = vector.extract_strided_slice %129 {offsets = [0, 0], sizes = [8, 128], strides = [1, 1]} : vector<8x192xf32> to vector<8x128xf32>
    %133 = arith.select %33, %131, %132 : vector<8x128xi1>, vector<8x128xf32>
    %134 = vector.extract_strided_slice %130 {offsets = [0, 0], sizes = [8, 128], strides = [1, 1]} : vector<8x192xf32> to vector<8x128xf32>
    %135 = arith.addf %133, %134 : vector<8x128xf32>
    %136 = arith.negf %135 : vector<8x128xf32>
    %137 = math.exp %136 : vector<8x128xf32>
    %cst_22 = arith.constant 1.000000e+00 : f32
    %138 = vector.broadcast %cst_22 : f32 to vector<8x128xf32>
    %139 = arith.addf %138, %137 : vector<8x128xf32>
    %140 = arith.divf %138, %139 : vector<8x128xf32>
    %141 = vector.extract_strided_slice %140 {offsets = [0, 0], sizes = [8, 64], strides = [1, 1]} : vector<8x128xf32> to vector<8x64xf32>
    %142 = vector.extract_strided_slice %140 {offsets = [0, 64], sizes = [8, 64], strides = [1, 1]} : vector<8x128xf32> to vector<8x64xf32>
    %143 = vector.extract_strided_slice %128 {offsets = [0, 128], sizes = [8, 64], strides = [1, 1]} : vector<8x192xf32> to vector<8x64xf32>
    %144 = vector.extract_strided_slice %129 {offsets = [0, 128], sizes = [8, 64], strides = [1, 1]} : vector<8x192xf32> to vector<8x64xf32>
    %145 = arith.select %36, %143, %144 : vector<8x64xi1>, vector<8x64xf32>
    %146 = vector.extract_strided_slice %130 {offsets = [0, 128], sizes = [8, 64], strides = [1, 1]} : vector<8x192xf32> to vector<8x64xf32>
    %147 = arith.addf %146, %52 : vector<8x64xf32>
    %148 = arith.mulf %141, %147 : vector<8x64xf32>
    %149 = arith.addf %145, %148 : vector<8x64xf32>
    %150 = math.tanh %149 : vector<8x64xf32>
    %151 = arith.subf %125, %150 : vector<8x64xf32>
    %152 = arith.mulf %142, %151 : vector<8x64xf32>
    %153 = arith.addf %150, %152 : vector<8x64xf32>
    %154 = vector.extract_strided_slice %22 {offsets = [2, 0, 0], sizes = [1, 8, 64], strides = [1, 1, 1]} : vector<8x8x64xf32> to vector<1x8x64xf32>
    %155 = vector.shape_cast %154 : vector<1x8x64xf32> to vector<8x64xf32>
    %156 = arith.mulf %155, %153 : vector<8x64xf32>
    %157 = vector.extract_strided_slice %24 {offsets = [2, 0, 0], sizes = [1, 8, 64], strides = [1, 1, 1]} : vector<8x8x64xf32> to vector<1x8x64xf32>
    %158 = vector.shape_cast %157 : vector<1x8x64xf32> to vector<8x64xf32>
    %159 = arith.mulf %158, %125 : vector<8x64xf32>
    %160 = arith.addf %156, %159 : vector<8x64xf32>
    %161 = vector.extract_strided_slice %156 {offsets = [0, 0], sizes = [8, 32], strides = [1, 1]} : vector<8x64xf32> to vector<8x32xf32>
    %162 = vector.extract_strided_slice %156 {offsets = [0, 32], sizes = [8, 32], strides = [1, 1]} : vector<8x64xf32> to vector<8x32xf32>
    %163 = vector.extract_strided_slice %48 {offsets = [24, 0], sizes = [8, 192], strides = [1, 1]} : vector<64x192xf32> to vector<8x192xf32>
    %164 = vector.extract_strided_slice %48 {offsets = [32, 0], sizes = [8, 192], strides = [1, 1]} : vector<64x192xf32> to vector<8x192xf32>
    %cst_23 = arith.constant dense<0.000000e+00> : vector<8x192xf32>
    %165 = tpu.matmul %160, %49, %cst_23 {dimension_numbers = #tpu.dot_dimension_numbers<[1], [0], [0], [1], [0, 0, 1, 1], [], []>} : vector<8x64xf32>, vector<64x192xf32>, vector<8x192xf32> -> vector<8x192xf32>
    %166 = vector.extract_strided_slice %163 {offsets = [0, 0], sizes = [8, 128], strides = [1, 1]} : vector<8x192xf32> to vector<8x128xf32>
    %167 = vector.extract_strided_slice %164 {offsets = [0, 0], sizes = [8, 128], strides = [1, 1]} : vector<8x192xf32> to vector<8x128xf32>
    %168 = arith.select %33, %166, %167 : vector<8x128xi1>, vector<8x128xf32>
    %169 = vector.extract_strided_slice %165 {offsets = [0, 0], sizes = [8, 128], strides = [1, 1]} : vector<8x192xf32> to vector<8x128xf32>
    %170 = arith.addf %168, %169 : vector<8x128xf32>
    %171 = arith.negf %170 : vector<8x128xf32>
    %172 = math.exp %171 : vector<8x128xf32>
    %cst_24 = arith.constant 1.000000e+00 : f32
    %173 = vector.broadcast %cst_24 : f32 to vector<8x128xf32>
    %174 = arith.addf %173, %172 : vector<8x128xf32>
    %175 = arith.divf %173, %174 : vector<8x128xf32>
    %176 = vector.extract_strided_slice %175 {offsets = [0, 0], sizes = [8, 64], strides = [1, 1]} : vector<8x128xf32> to vector<8x64xf32>
    %177 = vector.extract_strided_slice %175 {offsets = [0, 64], sizes = [8, 64], strides = [1, 1]} : vector<8x128xf32> to vector<8x64xf32>
    %178 = vector.extract_strided_slice %163 {offsets = [0, 128], sizes = [8, 64], strides = [1, 1]} : vector<8x192xf32> to vector<8x64xf32>
    %179 = vector.extract_strided_slice %164 {offsets = [0, 128], sizes = [8, 64], strides = [1, 1]} : vector<8x192xf32> to vector<8x64xf32>
    %180 = arith.select %36, %178, %179 : vector<8x64xi1>, vector<8x64xf32>
    %181 = vector.extract_strided_slice %165 {offsets = [0, 128], sizes = [8, 64], strides = [1, 1]} : vector<8x192xf32> to vector<8x64xf32>
    %182 = arith.addf %181, %52 : vector<8x64xf32>
    %183 = arith.mulf %176, %182 : vector<8x64xf32>
    %184 = arith.addf %180, %183 : vector<8x64xf32>
    %185 = math.tanh %184 : vector<8x64xf32>
    %186 = arith.subf %160, %185 : vector<8x64xf32>
    %187 = arith.mulf %177, %186 : vector<8x64xf32>
    %188 = arith.addf %185, %187 : vector<8x64xf32>
    %189 = vector.extract_strided_slice %22 {offsets = [3, 0, 0], sizes = [1, 8, 64], strides = [1, 1, 1]} : vector<8x8x64xf32> to vector<1x8x64xf32>
    %190 = vector.shape_cast %189 : vector<1x8x64xf32> to vector<8x64xf32>
    %191 = arith.mulf %190, %188 : vector<8x64xf32>
    %192 = vector.extract_strided_slice %24 {offsets = [3, 0, 0], sizes = [1, 8, 64], strides = [1, 1, 1]} : vector<8x8x64xf32> to vector<1x8x64xf32>
    %193 = vector.shape_cast %192 : vector<1x8x64xf32> to vector<8x64xf32>
    %194 = arith.mulf %193, %160 : vector<8x64xf32>
    %195 = arith.addf %191, %194 : vector<8x64xf32>
    %196 = vector.extract_strided_slice %191 {offsets = [0, 0], sizes = [8, 32], strides = [1, 1]} : vector<8x64xf32> to vector<8x32xf32>
    %197 = vector.extract_strided_slice %191 {offsets = [0, 32], sizes = [8, 32], strides = [1, 1]} : vector<8x64xf32> to vector<8x32xf32>
    %198 = vector.extract_strided_slice %48 {offsets = [32, 0], sizes = [8, 192], strides = [1, 1]} : vector<64x192xf32> to vector<8x192xf32>
    %199 = vector.extract_strided_slice %48 {offsets = [24, 0], sizes = [8, 192], strides = [1, 1]} : vector<64x192xf32> to vector<8x192xf32>
    %cst_25 = arith.constant dense<0.000000e+00> : vector<8x192xf32>
    %200 = tpu.matmul %195, %49, %cst_25 {dimension_numbers = #tpu.dot_dimension_numbers<[1], [0], [0], [1], [0, 0, 1, 1], [], []>} : vector<8x64xf32>, vector<64x192xf32>, vector<8x192xf32> -> vector<8x192xf32>
    %201 = vector.extract_strided_slice %198 {offsets = [0, 0], sizes = [8, 128], strides = [1, 1]} : vector<8x192xf32> to vector<8x128xf32>
    %202 = vector.extract_strided_slice %199 {offsets = [0, 0], sizes = [8, 128], strides = [1, 1]} : vector<8x192xf32> to vector<8x128xf32>
    %203 = arith.select %33, %201, %202 : vector<8x128xi1>, vector<8x128xf32>
    %204 = vector.extract_strided_slice %200 {offsets = [0, 0], sizes = [8, 128], strides = [1, 1]} : vector<8x192xf32> to vector<8x128xf32>
    %205 = arith.addf %203, %204 : vector<8x128xf32>
    %206 = arith.negf %205 : vector<8x128xf32>
    %207 = math.exp %206 : vector<8x128xf32>
    %cst_26 = arith.constant 1.000000e+00 : f32
    %208 = vector.broadcast %cst_26 : f32 to vector<8x128xf32>
    %209 = arith.addf %208, %207 : vector<8x128xf32>
    %210 = arith.divf %208, %209 : vector<8x128xf32>
    %211 = vector.extract_strided_slice %210 {offsets = [0, 0], sizes = [8, 64], strides = [1, 1]} : vector<8x128xf32> to vector<8x64xf32>
    %212 = vector.extract_strided_slice %210 {offsets = [0, 64], sizes = [8, 64], strides = [1, 1]} : vector<8x128xf32> to vector<8x64xf32>
    %213 = vector.extract_strided_slice %198 {offsets = [0, 128], sizes = [8, 64], strides = [1, 1]} : vector<8x192xf32> to vector<8x64xf32>
    %214 = vector.extract_strided_slice %199 {offsets = [0, 128], sizes = [8, 64], strides = [1, 1]} : vector<8x192xf32> to vector<8x64xf32>
    %215 = arith.select %36, %213, %214 : vector<8x64xi1>, vector<8x64xf32>
    %216 = vector.extract_strided_slice %200 {offsets = [0, 128], sizes = [8, 64], strides = [1, 1]} : vector<8x192xf32> to vector<8x64xf32>
    %217 = arith.addf %216, %52 : vector<8x64xf32>
    %218 = arith.mulf %211, %217 : vector<8x64xf32>
    %219 = arith.addf %215, %218 : vector<8x64xf32>
    %220 = math.tanh %219 : vector<8x64xf32>
    %221 = arith.subf %195, %220 : vector<8x64xf32>
    %222 = arith.mulf %212, %221 : vector<8x64xf32>
    %223 = arith.addf %220, %222 : vector<8x64xf32>
    %224 = vector.extract_strided_slice %22 {offsets = [4, 0, 0], sizes = [1, 8, 64], strides = [1, 1, 1]} : vector<8x8x64xf32> to vector<1x8x64xf32>
    %225 = vector.shape_cast %224 : vector<1x8x64xf32> to vector<8x64xf32>
    %226 = arith.mulf %225, %223 : vector<8x64xf32>
    %227 = vector.extract_strided_slice %24 {offsets = [4, 0, 0], sizes = [1, 8, 64], strides = [1, 1, 1]} : vector<8x8x64xf32> to vector<1x8x64xf32>
    %228 = vector.shape_cast %227 : vector<1x8x64xf32> to vector<8x64xf32>
    %229 = arith.mulf %228, %195 : vector<8x64xf32>
    %230 = arith.addf %226, %229 : vector<8x64xf32>
    %231 = vector.extract_strided_slice %226 {offsets = [0, 0], sizes = [8, 32], strides = [1, 1]} : vector<8x64xf32> to vector<8x32xf32>
    %232 = vector.extract_strided_slice %226 {offsets = [0, 32], sizes = [8, 32], strides = [1, 1]} : vector<8x64xf32> to vector<8x32xf32>
    %233 = vector.extract_strided_slice %48 {offsets = [40, 0], sizes = [8, 192], strides = [1, 1]} : vector<64x192xf32> to vector<8x192xf32>
    %234 = vector.extract_strided_slice %48 {offsets = [16, 0], sizes = [8, 192], strides = [1, 1]} : vector<64x192xf32> to vector<8x192xf32>
    %cst_27 = arith.constant dense<0.000000e+00> : vector<8x192xf32>
    %235 = tpu.matmul %230, %49, %cst_27 {dimension_numbers = #tpu.dot_dimension_numbers<[1], [0], [0], [1], [0, 0, 1, 1], [], []>} : vector<8x64xf32>, vector<64x192xf32>, vector<8x192xf32> -> vector<8x192xf32>
    %236 = vector.extract_strided_slice %233 {offsets = [0, 0], sizes = [8, 128], strides = [1, 1]} : vector<8x192xf32> to vector<8x128xf32>
    %237 = vector.extract_strided_slice %234 {offsets = [0, 0], sizes = [8, 128], strides = [1, 1]} : vector<8x192xf32> to vector<8x128xf32>
    %238 = arith.select %33, %236, %237 : vector<8x128xi1>, vector<8x128xf32>
    %239 = vector.extract_strided_slice %235 {offsets = [0, 0], sizes = [8, 128], strides = [1, 1]} : vector<8x192xf32> to vector<8x128xf32>
    %240 = arith.addf %238, %239 : vector<8x128xf32>
    %241 = arith.negf %240 : vector<8x128xf32>
    %242 = math.exp %241 : vector<8x128xf32>
    %cst_28 = arith.constant 1.000000e+00 : f32
    %243 = vector.broadcast %cst_28 : f32 to vector<8x128xf32>
    %244 = arith.addf %243, %242 : vector<8x128xf32>
    %245 = arith.divf %243, %244 : vector<8x128xf32>
    %246 = vector.extract_strided_slice %245 {offsets = [0, 0], sizes = [8, 64], strides = [1, 1]} : vector<8x128xf32> to vector<8x64xf32>
    %247 = vector.extract_strided_slice %245 {offsets = [0, 64], sizes = [8, 64], strides = [1, 1]} : vector<8x128xf32> to vector<8x64xf32>
    %248 = vector.extract_strided_slice %233 {offsets = [0, 128], sizes = [8, 64], strides = [1, 1]} : vector<8x192xf32> to vector<8x64xf32>
    %249 = vector.extract_strided_slice %234 {offsets = [0, 128], sizes = [8, 64], strides = [1, 1]} : vector<8x192xf32> to vector<8x64xf32>
    %250 = arith.select %36, %248, %249 : vector<8x64xi1>, vector<8x64xf32>
    %251 = vector.extract_strided_slice %235 {offsets = [0, 128], sizes = [8, 64], strides = [1, 1]} : vector<8x192xf32> to vector<8x64xf32>
    %252 = arith.addf %251, %52 : vector<8x64xf32>
    %253 = arith.mulf %246, %252 : vector<8x64xf32>
    %254 = arith.addf %250, %253 : vector<8x64xf32>
    %255 = math.tanh %254 : vector<8x64xf32>
    %256 = arith.subf %230, %255 : vector<8x64xf32>
    %257 = arith.mulf %247, %256 : vector<8x64xf32>
    %258 = arith.addf %255, %257 : vector<8x64xf32>
    %259 = vector.extract_strided_slice %22 {offsets = [5, 0, 0], sizes = [1, 8, 64], strides = [1, 1, 1]} : vector<8x8x64xf32> to vector<1x8x64xf32>
    %260 = vector.shape_cast %259 : vector<1x8x64xf32> to vector<8x64xf32>
    %261 = arith.mulf %260, %258 : vector<8x64xf32>
    %262 = vector.extract_strided_slice %24 {offsets = [5, 0, 0], sizes = [1, 8, 64], strides = [1, 1, 1]} : vector<8x8x64xf32> to vector<1x8x64xf32>
    %263 = vector.shape_cast %262 : vector<1x8x64xf32> to vector<8x64xf32>
    %264 = arith.mulf %263, %230 : vector<8x64xf32>
    %265 = arith.addf %261, %264 : vector<8x64xf32>
    %266 = vector.extract_strided_slice %261 {offsets = [0, 0], sizes = [8, 32], strides = [1, 1]} : vector<8x64xf32> to vector<8x32xf32>
    %267 = vector.extract_strided_slice %261 {offsets = [0, 32], sizes = [8, 32], strides = [1, 1]} : vector<8x64xf32> to vector<8x32xf32>
    %268 = vector.extract_strided_slice %48 {offsets = [48, 0], sizes = [8, 192], strides = [1, 1]} : vector<64x192xf32> to vector<8x192xf32>
    %269 = vector.extract_strided_slice %48 {offsets = [8, 0], sizes = [8, 192], strides = [1, 1]} : vector<64x192xf32> to vector<8x192xf32>
    %cst_29 = arith.constant dense<0.000000e+00> : vector<8x192xf32>
    %270 = tpu.matmul %265, %49, %cst_29 {dimension_numbers = #tpu.dot_dimension_numbers<[1], [0], [0], [1], [0, 0, 1, 1], [], []>} : vector<8x64xf32>, vector<64x192xf32>, vector<8x192xf32> -> vector<8x192xf32>
    %271 = vector.extract_strided_slice %268 {offsets = [0, 0], sizes = [8, 128], strides = [1, 1]} : vector<8x192xf32> to vector<8x128xf32>
    %272 = vector.extract_strided_slice %269 {offsets = [0, 0], sizes = [8, 128], strides = [1, 1]} : vector<8x192xf32> to vector<8x128xf32>
    %273 = arith.select %33, %271, %272 : vector<8x128xi1>, vector<8x128xf32>
    %274 = vector.extract_strided_slice %270 {offsets = [0, 0], sizes = [8, 128], strides = [1, 1]} : vector<8x192xf32> to vector<8x128xf32>
    %275 = arith.addf %273, %274 : vector<8x128xf32>
    %276 = arith.negf %275 : vector<8x128xf32>
    %277 = math.exp %276 : vector<8x128xf32>
    %cst_30 = arith.constant 1.000000e+00 : f32
    %278 = vector.broadcast %cst_30 : f32 to vector<8x128xf32>
    %279 = arith.addf %278, %277 : vector<8x128xf32>
    %280 = arith.divf %278, %279 : vector<8x128xf32>
    %281 = vector.extract_strided_slice %280 {offsets = [0, 0], sizes = [8, 64], strides = [1, 1]} : vector<8x128xf32> to vector<8x64xf32>
    %282 = vector.extract_strided_slice %280 {offsets = [0, 64], sizes = [8, 64], strides = [1, 1]} : vector<8x128xf32> to vector<8x64xf32>
    %283 = vector.extract_strided_slice %268 {offsets = [0, 128], sizes = [8, 64], strides = [1, 1]} : vector<8x192xf32> to vector<8x64xf32>
    %284 = vector.extract_strided_slice %269 {offsets = [0, 128], sizes = [8, 64], strides = [1, 1]} : vector<8x192xf32> to vector<8x64xf32>
    %285 = arith.select %36, %283, %284 : vector<8x64xi1>, vector<8x64xf32>
    %286 = vector.extract_strided_slice %270 {offsets = [0, 128], sizes = [8, 64], strides = [1, 1]} : vector<8x192xf32> to vector<8x64xf32>
    %287 = arith.addf %286, %52 : vector<8x64xf32>
    %288 = arith.mulf %281, %287 : vector<8x64xf32>
    %289 = arith.addf %285, %288 : vector<8x64xf32>
    %290 = math.tanh %289 : vector<8x64xf32>
    %291 = arith.subf %265, %290 : vector<8x64xf32>
    %292 = arith.mulf %282, %291 : vector<8x64xf32>
    %293 = arith.addf %290, %292 : vector<8x64xf32>
    %294 = vector.extract_strided_slice %22 {offsets = [6, 0, 0], sizes = [1, 8, 64], strides = [1, 1, 1]} : vector<8x8x64xf32> to vector<1x8x64xf32>
    %295 = vector.shape_cast %294 : vector<1x8x64xf32> to vector<8x64xf32>
    %296 = arith.mulf %295, %293 : vector<8x64xf32>
    %297 = vector.extract_strided_slice %24 {offsets = [6, 0, 0], sizes = [1, 8, 64], strides = [1, 1, 1]} : vector<8x8x64xf32> to vector<1x8x64xf32>
    %298 = vector.shape_cast %297 : vector<1x8x64xf32> to vector<8x64xf32>
    %299 = arith.mulf %298, %265 : vector<8x64xf32>
    %300 = arith.addf %296, %299 : vector<8x64xf32>
    %301 = vector.extract_strided_slice %296 {offsets = [0, 0], sizes = [8, 32], strides = [1, 1]} : vector<8x64xf32> to vector<8x32xf32>
    %302 = vector.extract_strided_slice %296 {offsets = [0, 32], sizes = [8, 32], strides = [1, 1]} : vector<8x64xf32> to vector<8x32xf32>
    %303 = vector.extract_strided_slice %48 {offsets = [56, 0], sizes = [8, 192], strides = [1, 1]} : vector<64x192xf32> to vector<8x192xf32>
    %304 = vector.extract_strided_slice %48 {offsets = [0, 0], sizes = [8, 192], strides = [1, 1]} : vector<64x192xf32> to vector<8x192xf32>
    %cst_31 = arith.constant dense<0.000000e+00> : vector<8x192xf32>
    %305 = tpu.matmul %300, %49, %cst_31 {dimension_numbers = #tpu.dot_dimension_numbers<[1], [0], [0], [1], [0, 0, 1, 1], [], []>} : vector<8x64xf32>, vector<64x192xf32>, vector<8x192xf32> -> vector<8x192xf32>
    %306 = vector.extract_strided_slice %303 {offsets = [0, 0], sizes = [8, 128], strides = [1, 1]} : vector<8x192xf32> to vector<8x128xf32>
    %307 = vector.extract_strided_slice %304 {offsets = [0, 0], sizes = [8, 128], strides = [1, 1]} : vector<8x192xf32> to vector<8x128xf32>
    %308 = arith.select %33, %306, %307 : vector<8x128xi1>, vector<8x128xf32>
    %309 = vector.extract_strided_slice %305 {offsets = [0, 0], sizes = [8, 128], strides = [1, 1]} : vector<8x192xf32> to vector<8x128xf32>
    %310 = arith.addf %308, %309 : vector<8x128xf32>
    %311 = arith.negf %310 : vector<8x128xf32>
    %312 = math.exp %311 : vector<8x128xf32>
    %cst_32 = arith.constant 1.000000e+00 : f32
    %313 = vector.broadcast %cst_32 : f32 to vector<8x128xf32>
    %314 = arith.addf %313, %312 : vector<8x128xf32>
    %315 = arith.divf %313, %314 : vector<8x128xf32>
    %316 = vector.extract_strided_slice %315 {offsets = [0, 0], sizes = [8, 64], strides = [1, 1]} : vector<8x128xf32> to vector<8x64xf32>
    %317 = vector.extract_strided_slice %315 {offsets = [0, 64], sizes = [8, 64], strides = [1, 1]} : vector<8x128xf32> to vector<8x64xf32>
    %318 = vector.extract_strided_slice %303 {offsets = [0, 128], sizes = [8, 64], strides = [1, 1]} : vector<8x192xf32> to vector<8x64xf32>
    %319 = vector.extract_strided_slice %304 {offsets = [0, 128], sizes = [8, 64], strides = [1, 1]} : vector<8x192xf32> to vector<8x64xf32>
    %320 = arith.select %36, %318, %319 : vector<8x64xi1>, vector<8x64xf32>
    %321 = vector.extract_strided_slice %305 {offsets = [0, 128], sizes = [8, 64], strides = [1, 1]} : vector<8x192xf32> to vector<8x64xf32>
    %322 = arith.addf %321, %52 : vector<8x64xf32>
    %323 = arith.mulf %316, %322 : vector<8x64xf32>
    %324 = arith.addf %320, %323 : vector<8x64xf32>
    %325 = math.tanh %324 : vector<8x64xf32>
    %326 = arith.subf %300, %325 : vector<8x64xf32>
    %327 = arith.mulf %317, %326 : vector<8x64xf32>
    %328 = arith.addf %325, %327 : vector<8x64xf32>
    %329 = vector.extract_strided_slice %22 {offsets = [7, 0, 0], sizes = [1, 8, 64], strides = [1, 1, 1]} : vector<8x8x64xf32> to vector<1x8x64xf32>
    %330 = vector.shape_cast %329 : vector<1x8x64xf32> to vector<8x64xf32>
    %331 = arith.mulf %330, %328 : vector<8x64xf32>
    %332 = vector.extract_strided_slice %24 {offsets = [7, 0, 0], sizes = [1, 8, 64], strides = [1, 1, 1]} : vector<8x8x64xf32> to vector<1x8x64xf32>
    %333 = vector.shape_cast %332 : vector<1x8x64xf32> to vector<8x64xf32>
    %334 = arith.mulf %333, %300 : vector<8x64xf32>
    %335 = arith.addf %331, %334 : vector<8x64xf32>
    %336 = vector.extract_strided_slice %331 {offsets = [0, 0], sizes = [8, 32], strides = [1, 1]} : vector<8x64xf32> to vector<8x32xf32>
    %337 = vector.extract_strided_slice %331 {offsets = [0, 32], sizes = [8, 32], strides = [1, 1]} : vector<8x64xf32> to vector<8x32xf32>
    %338 = tpu.concatenate %91, %337 in 1 : vector<8x32xf32>, vector<8x32xf32> -> vector<8x64xf32>
    %339 = tpu.concatenate %126, %302 in 1 : vector<8x32xf32>, vector<8x32xf32> -> vector<8x64xf32>
    %340 = tpu.concatenate %161, %267 in 1 : vector<8x32xf32>, vector<8x32xf32> -> vector<8x64xf32>
    %341 = tpu.concatenate %196, %232 in 1 : vector<8x32xf32>, vector<8x32xf32> -> vector<8x64xf32>
    %342 = tpu.concatenate %231, %197 in 1 : vector<8x32xf32>, vector<8x32xf32> -> vector<8x64xf32>
    %343 = tpu.concatenate %266, %162 in 1 : vector<8x32xf32>, vector<8x32xf32> -> vector<8x64xf32>
    %344 = tpu.concatenate %301, %127 in 1 : vector<8x32xf32>, vector<8x32xf32> -> vector<8x64xf32>
    %345 = tpu.concatenate %336, %92 in 1 : vector<8x32xf32>, vector<8x32xf32> -> vector<8x64xf32>
    %346 = tpu.concatenate %338, %339, %340, %341, %342, %343, %344, %345 in 0 : vector<8x64xf32>, vector<8x64xf32>, vector<8x64xf32>, vector<8x64xf32>, vector<8x64xf32>, vector<8x64xf32>, vector<8x64xf32>, vector<8x64xf32> -> vector<64x64xf32>
    %c0_33 = arith.constant 0 : index
    %c0_34 = arith.constant 0 : index
    %347 = vector.load %arg8[%c0_33, %c0_34] : memref<64x192xf32, #tpu.memory_space<vmem>>, vector<64x192xf32>
    %cst_35 = arith.constant dense<0.000000e+00> : vector<64x192xf32>
    %348 = tpu.matmul %346, %347, %cst_35 {dimension_numbers = #tpu.dot_dimension_numbers<[1], [0], [0], [1], [0, 0, 1, 1], [], []>} : vector<64x64xf32>, vector<64x192xf32>, vector<64x192xf32> -> vector<64x192xf32>
    %c0_36 = arith.constant 0 : index
    %c0_37 = arith.constant 0 : index
    %349 = vector.load %arg9[%c0_36, %c0_37] : memref<1x192xf32, #tpu.memory_space<vmem>>, vector<1x192xf32>
    %350 = vector.shape_cast %349 : vector<1x192xf32> to vector<1x192xf32>
    %351 = vector.broadcast %350 : vector<1x192xf32> to vector<64x192xf32>
    %352 = arith.addf %348, %351 : vector<64x192xf32>
    %c0_38 = arith.constant 0 : index
    %c0_39 = arith.constant 0 : index
    %353 = vector.load %arg10[%c0_38, %c0_39] : memref<64x192xf32, #tpu.memory_space<vmem>>, vector<64x192xf32>
    %c0_40 = arith.constant 0 : index
    %c0_41 = arith.constant 0 : index
    %354 = vector.load %arg11[%c0_40, %c0_41] : memref<1x64xf32, #tpu.memory_space<vmem>>, vector<1x64xf32>
    %355 = vector.shape_cast %354 : vector<1x64xf32> to vector<1x64xf32>
    %356 = vector.broadcast %355 : vector<1x64xf32> to vector<8x64xf32>
    %c4 = arith.constant 4 : index
    %c0_42 = arith.constant 0 : index
    %357 = vector.load %arg3[%c4, %c0_42] : memref<8x32xf32, #tpu.memory_space<vmem>>, vector<2x32xf32>
    %c6 = arith.constant 6 : index
    %c0_43 = arith.constant 0 : index
    %358 = vector.load %arg3[%c6, %c0_43] : memref<8x32xf32, #tpu.memory_space<vmem>>, vector<2x32xf32>
    %359 = tpu.concatenate %357, %358 in 1 : vector<2x32xf32>, vector<2x32xf32> -> vector<2x64xf32>
    %cst_44 = arith.constant 0.000000e+00 : f32
    %360 = vector.broadcast %cst_44 : f32 to vector<6x64xf32>
    %361 = tpu.concatenate %359, %360 in 0 : vector<2x64xf32>, vector<6x64xf32> -> vector<8x64xf32>
    %362 = vector.extract_strided_slice %352 {offsets = [0, 0], sizes = [8, 192], strides = [1, 1]} : vector<64x192xf32> to vector<8x192xf32>
    %363 = vector.extract_strided_slice %352 {offsets = [56, 0], sizes = [8, 192], strides = [1, 1]} : vector<64x192xf32> to vector<8x192xf32>
    %cst_45 = arith.constant dense<0.000000e+00> : vector<8x192xf32>
    %364 = tpu.matmul %361, %353, %cst_45 {dimension_numbers = #tpu.dot_dimension_numbers<[1], [0], [0], [1], [0, 0, 1, 1], [], []>} : vector<8x64xf32>, vector<64x192xf32>, vector<8x192xf32> -> vector<8x192xf32>
    %365 = vector.extract_strided_slice %362 {offsets = [0, 0], sizes = [8, 128], strides = [1, 1]} : vector<8x192xf32> to vector<8x128xf32>
    %366 = vector.extract_strided_slice %363 {offsets = [0, 0], sizes = [8, 128], strides = [1, 1]} : vector<8x192xf32> to vector<8x128xf32>
    %367 = arith.select %33, %365, %366 : vector<8x128xi1>, vector<8x128xf32>
    %368 = vector.extract_strided_slice %364 {offsets = [0, 0], sizes = [8, 128], strides = [1, 1]} : vector<8x192xf32> to vector<8x128xf32>
    %369 = arith.addf %367, %368 : vector<8x128xf32>
    %370 = arith.negf %369 : vector<8x128xf32>
    %371 = math.exp %370 : vector<8x128xf32>
    %cst_46 = arith.constant 1.000000e+00 : f32
    %372 = vector.broadcast %cst_46 : f32 to vector<8x128xf32>
    %373 = arith.addf %372, %371 : vector<8x128xf32>
    %374 = arith.divf %372, %373 : vector<8x128xf32>
    %375 = vector.extract_strided_slice %374 {offsets = [0, 0], sizes = [8, 64], strides = [1, 1]} : vector<8x128xf32> to vector<8x64xf32>
    %376 = vector.extract_strided_slice %374 {offsets = [0, 64], sizes = [8, 64], strides = [1, 1]} : vector<8x128xf32> to vector<8x64xf32>
    %377 = vector.extract_strided_slice %362 {offsets = [0, 128], sizes = [8, 64], strides = [1, 1]} : vector<8x192xf32> to vector<8x64xf32>
    %378 = vector.extract_strided_slice %363 {offsets = [0, 128], sizes = [8, 64], strides = [1, 1]} : vector<8x192xf32> to vector<8x64xf32>
    %379 = arith.select %36, %377, %378 : vector<8x64xi1>, vector<8x64xf32>
    %380 = vector.extract_strided_slice %364 {offsets = [0, 128], sizes = [8, 64], strides = [1, 1]} : vector<8x192xf32> to vector<8x64xf32>
    %381 = arith.addf %380, %356 : vector<8x64xf32>
    %382 = arith.mulf %375, %381 : vector<8x64xf32>
    %383 = arith.addf %379, %382 : vector<8x64xf32>
    %384 = math.tanh %383 : vector<8x64xf32>
    %385 = arith.subf %361, %384 : vector<8x64xf32>
    %386 = arith.mulf %376, %385 : vector<8x64xf32>
    %387 = arith.addf %384, %386 : vector<8x64xf32>
    %388 = vector.extract_strided_slice %22 {offsets = [0, 0, 0], sizes = [1, 8, 64], strides = [1, 1, 1]} : vector<8x8x64xf32> to vector<1x8x64xf32>
    %389 = vector.shape_cast %388 : vector<1x8x64xf32> to vector<8x64xf32>
    %390 = arith.mulf %389, %387 : vector<8x64xf32>
    %391 = vector.extract_strided_slice %24 {offsets = [0, 0, 0], sizes = [1, 8, 64], strides = [1, 1, 1]} : vector<8x8x64xf32> to vector<1x8x64xf32>
    %392 = vector.shape_cast %391 : vector<1x8x64xf32> to vector<8x64xf32>
    %393 = arith.mulf %392, %361 : vector<8x64xf32>
    %394 = arith.addf %390, %393 : vector<8x64xf32>
    %395 = vector.extract_strided_slice %390 {offsets = [0, 0], sizes = [8, 32], strides = [1, 1]} : vector<8x64xf32> to vector<8x32xf32>
    %396 = vector.extract_strided_slice %390 {offsets = [0, 32], sizes = [8, 32], strides = [1, 1]} : vector<8x64xf32> to vector<8x32xf32>
    %397 = vector.extract_strided_slice %352 {offsets = [8, 0], sizes = [8, 192], strides = [1, 1]} : vector<64x192xf32> to vector<8x192xf32>
    %398 = vector.extract_strided_slice %352 {offsets = [48, 0], sizes = [8, 192], strides = [1, 1]} : vector<64x192xf32> to vector<8x192xf32>
    %cst_47 = arith.constant dense<0.000000e+00> : vector<8x192xf32>
    %399 = tpu.matmul %394, %353, %cst_47 {dimension_numbers = #tpu.dot_dimension_numbers<[1], [0], [0], [1], [0, 0, 1, 1], [], []>} : vector<8x64xf32>, vector<64x192xf32>, vector<8x192xf32> -> vector<8x192xf32>
    %400 = vector.extract_strided_slice %397 {offsets = [0, 0], sizes = [8, 128], strides = [1, 1]} : vector<8x192xf32> to vector<8x128xf32>
    %401 = vector.extract_strided_slice %398 {offsets = [0, 0], sizes = [8, 128], strides = [1, 1]} : vector<8x192xf32> to vector<8x128xf32>
    %402 = arith.select %33, %400, %401 : vector<8x128xi1>, vector<8x128xf32>
    %403 = vector.extract_strided_slice %399 {offsets = [0, 0], sizes = [8, 128], strides = [1, 1]} : vector<8x192xf32> to vector<8x128xf32>
    %404 = arith.addf %402, %403 : vector<8x128xf32>
    %405 = arith.negf %404 : vector<8x128xf32>
    %406 = math.exp %405 : vector<8x128xf32>
    %cst_48 = arith.constant 1.000000e+00 : f32
    %407 = vector.broadcast %cst_48 : f32 to vector<8x128xf32>
    %408 = arith.addf %407, %406 : vector<8x128xf32>
    %409 = arith.divf %407, %408 : vector<8x128xf32>
    %410 = vector.extract_strided_slice %409 {offsets = [0, 0], sizes = [8, 64], strides = [1, 1]} : vector<8x128xf32> to vector<8x64xf32>
    %411 = vector.extract_strided_slice %409 {offsets = [0, 64], sizes = [8, 64], strides = [1, 1]} : vector<8x128xf32> to vector<8x64xf32>
    %412 = vector.extract_strided_slice %397 {offsets = [0, 128], sizes = [8, 64], strides = [1, 1]} : vector<8x192xf32> to vector<8x64xf32>
    %413 = vector.extract_strided_slice %398 {offsets = [0, 128], sizes = [8, 64], strides = [1, 1]} : vector<8x192xf32> to vector<8x64xf32>
    %414 = arith.select %36, %412, %413 : vector<8x64xi1>, vector<8x64xf32>
    %415 = vector.extract_strided_slice %399 {offsets = [0, 128], sizes = [8, 64], strides = [1, 1]} : vector<8x192xf32> to vector<8x64xf32>
    %416 = arith.addf %415, %356 : vector<8x64xf32>
    %417 = arith.mulf %410, %416 : vector<8x64xf32>
    %418 = arith.addf %414, %417 : vector<8x64xf32>
    %419 = math.tanh %418 : vector<8x64xf32>
    %420 = arith.subf %394, %419 : vector<8x64xf32>
    %421 = arith.mulf %411, %420 : vector<8x64xf32>
    %422 = arith.addf %419, %421 : vector<8x64xf32>
    %423 = vector.extract_strided_slice %22 {offsets = [1, 0, 0], sizes = [1, 8, 64], strides = [1, 1, 1]} : vector<8x8x64xf32> to vector<1x8x64xf32>
    %424 = vector.shape_cast %423 : vector<1x8x64xf32> to vector<8x64xf32>
    %425 = arith.mulf %424, %422 : vector<8x64xf32>
    %426 = vector.extract_strided_slice %24 {offsets = [1, 0, 0], sizes = [1, 8, 64], strides = [1, 1, 1]} : vector<8x8x64xf32> to vector<1x8x64xf32>
    %427 = vector.shape_cast %426 : vector<1x8x64xf32> to vector<8x64xf32>
    %428 = arith.mulf %427, %394 : vector<8x64xf32>
    %429 = arith.addf %425, %428 : vector<8x64xf32>
    %430 = vector.extract_strided_slice %425 {offsets = [0, 0], sizes = [8, 32], strides = [1, 1]} : vector<8x64xf32> to vector<8x32xf32>
    %431 = vector.extract_strided_slice %425 {offsets = [0, 32], sizes = [8, 32], strides = [1, 1]} : vector<8x64xf32> to vector<8x32xf32>
    %432 = vector.extract_strided_slice %352 {offsets = [16, 0], sizes = [8, 192], strides = [1, 1]} : vector<64x192xf32> to vector<8x192xf32>
    %433 = vector.extract_strided_slice %352 {offsets = [40, 0], sizes = [8, 192], strides = [1, 1]} : vector<64x192xf32> to vector<8x192xf32>
    %cst_49 = arith.constant dense<0.000000e+00> : vector<8x192xf32>
    %434 = tpu.matmul %429, %353, %cst_49 {dimension_numbers = #tpu.dot_dimension_numbers<[1], [0], [0], [1], [0, 0, 1, 1], [], []>} : vector<8x64xf32>, vector<64x192xf32>, vector<8x192xf32> -> vector<8x192xf32>
    %435 = vector.extract_strided_slice %432 {offsets = [0, 0], sizes = [8, 128], strides = [1, 1]} : vector<8x192xf32> to vector<8x128xf32>
    %436 = vector.extract_strided_slice %433 {offsets = [0, 0], sizes = [8, 128], strides = [1, 1]} : vector<8x192xf32> to vector<8x128xf32>
    %437 = arith.select %33, %435, %436 : vector<8x128xi1>, vector<8x128xf32>
    %438 = vector.extract_strided_slice %434 {offsets = [0, 0], sizes = [8, 128], strides = [1, 1]} : vector<8x192xf32> to vector<8x128xf32>
    %439 = arith.addf %437, %438 : vector<8x128xf32>
    %440 = arith.negf %439 : vector<8x128xf32>
    %441 = math.exp %440 : vector<8x128xf32>
    %cst_50 = arith.constant 1.000000e+00 : f32
    %442 = vector.broadcast %cst_50 : f32 to vector<8x128xf32>
    %443 = arith.addf %442, %441 : vector<8x128xf32>
    %444 = arith.divf %442, %443 : vector<8x128xf32>
    %445 = vector.extract_strided_slice %444 {offsets = [0, 0], sizes = [8, 64], strides = [1, 1]} : vector<8x128xf32> to vector<8x64xf32>
    %446 = vector.extract_strided_slice %444 {offsets = [0, 64], sizes = [8, 64], strides = [1, 1]} : vector<8x128xf32> to vector<8x64xf32>
    %447 = vector.extract_strided_slice %432 {offsets = [0, 128], sizes = [8, 64], strides = [1, 1]} : vector<8x192xf32> to vector<8x64xf32>
    %448 = vector.extract_strided_slice %433 {offsets = [0, 128], sizes = [8, 64], strides = [1, 1]} : vector<8x192xf32> to vector<8x64xf32>
    %449 = arith.select %36, %447, %448 : vector<8x64xi1>, vector<8x64xf32>
    %450 = vector.extract_strided_slice %434 {offsets = [0, 128], sizes = [8, 64], strides = [1, 1]} : vector<8x192xf32> to vector<8x64xf32>
    %451 = arith.addf %450, %356 : vector<8x64xf32>
    %452 = arith.mulf %445, %451 : vector<8x64xf32>
    %453 = arith.addf %449, %452 : vector<8x64xf32>
    %454 = math.tanh %453 : vector<8x64xf32>
    %455 = arith.subf %429, %454 : vector<8x64xf32>
    %456 = arith.mulf %446, %455 : vector<8x64xf32>
    %457 = arith.addf %454, %456 : vector<8x64xf32>
    %458 = vector.extract_strided_slice %22 {offsets = [2, 0, 0], sizes = [1, 8, 64], strides = [1, 1, 1]} : vector<8x8x64xf32> to vector<1x8x64xf32>
    %459 = vector.shape_cast %458 : vector<1x8x64xf32> to vector<8x64xf32>
    %460 = arith.mulf %459, %457 : vector<8x64xf32>
    %461 = vector.extract_strided_slice %24 {offsets = [2, 0, 0], sizes = [1, 8, 64], strides = [1, 1, 1]} : vector<8x8x64xf32> to vector<1x8x64xf32>
    %462 = vector.shape_cast %461 : vector<1x8x64xf32> to vector<8x64xf32>
    %463 = arith.mulf %462, %429 : vector<8x64xf32>
    %464 = arith.addf %460, %463 : vector<8x64xf32>
    %465 = vector.extract_strided_slice %460 {offsets = [0, 0], sizes = [8, 32], strides = [1, 1]} : vector<8x64xf32> to vector<8x32xf32>
    %466 = vector.extract_strided_slice %460 {offsets = [0, 32], sizes = [8, 32], strides = [1, 1]} : vector<8x64xf32> to vector<8x32xf32>
    %467 = vector.extract_strided_slice %352 {offsets = [24, 0], sizes = [8, 192], strides = [1, 1]} : vector<64x192xf32> to vector<8x192xf32>
    %468 = vector.extract_strided_slice %352 {offsets = [32, 0], sizes = [8, 192], strides = [1, 1]} : vector<64x192xf32> to vector<8x192xf32>
    %cst_51 = arith.constant dense<0.000000e+00> : vector<8x192xf32>
    %469 = tpu.matmul %464, %353, %cst_51 {dimension_numbers = #tpu.dot_dimension_numbers<[1], [0], [0], [1], [0, 0, 1, 1], [], []>} : vector<8x64xf32>, vector<64x192xf32>, vector<8x192xf32> -> vector<8x192xf32>
    %470 = vector.extract_strided_slice %467 {offsets = [0, 0], sizes = [8, 128], strides = [1, 1]} : vector<8x192xf32> to vector<8x128xf32>
    %471 = vector.extract_strided_slice %468 {offsets = [0, 0], sizes = [8, 128], strides = [1, 1]} : vector<8x192xf32> to vector<8x128xf32>
    %472 = arith.select %33, %470, %471 : vector<8x128xi1>, vector<8x128xf32>
    %473 = vector.extract_strided_slice %469 {offsets = [0, 0], sizes = [8, 128], strides = [1, 1]} : vector<8x192xf32> to vector<8x128xf32>
    %474 = arith.addf %472, %473 : vector<8x128xf32>
    %475 = arith.negf %474 : vector<8x128xf32>
    %476 = math.exp %475 : vector<8x128xf32>
    %cst_52 = arith.constant 1.000000e+00 : f32
    %477 = vector.broadcast %cst_52 : f32 to vector<8x128xf32>
    %478 = arith.addf %477, %476 : vector<8x128xf32>
    %479 = arith.divf %477, %478 : vector<8x128xf32>
    %480 = vector.extract_strided_slice %479 {offsets = [0, 0], sizes = [8, 64], strides = [1, 1]} : vector<8x128xf32> to vector<8x64xf32>
    %481 = vector.extract_strided_slice %479 {offsets = [0, 64], sizes = [8, 64], strides = [1, 1]} : vector<8x128xf32> to vector<8x64xf32>
    %482 = vector.extract_strided_slice %467 {offsets = [0, 128], sizes = [8, 64], strides = [1, 1]} : vector<8x192xf32> to vector<8x64xf32>
    %483 = vector.extract_strided_slice %468 {offsets = [0, 128], sizes = [8, 64], strides = [1, 1]} : vector<8x192xf32> to vector<8x64xf32>
    %484 = arith.select %36, %482, %483 : vector<8x64xi1>, vector<8x64xf32>
    %485 = vector.extract_strided_slice %469 {offsets = [0, 128], sizes = [8, 64], strides = [1, 1]} : vector<8x192xf32> to vector<8x64xf32>
    %486 = arith.addf %485, %356 : vector<8x64xf32>
    %487 = arith.mulf %480, %486 : vector<8x64xf32>
    %488 = arith.addf %484, %487 : vector<8x64xf32>
    %489 = math.tanh %488 : vector<8x64xf32>
    %490 = arith.subf %464, %489 : vector<8x64xf32>
    %491 = arith.mulf %481, %490 : vector<8x64xf32>
    %492 = arith.addf %489, %491 : vector<8x64xf32>
    %493 = vector.extract_strided_slice %22 {offsets = [3, 0, 0], sizes = [1, 8, 64], strides = [1, 1, 1]} : vector<8x8x64xf32> to vector<1x8x64xf32>
    %494 = vector.shape_cast %493 : vector<1x8x64xf32> to vector<8x64xf32>
    %495 = arith.mulf %494, %492 : vector<8x64xf32>
    %496 = vector.extract_strided_slice %24 {offsets = [3, 0, 0], sizes = [1, 8, 64], strides = [1, 1, 1]} : vector<8x8x64xf32> to vector<1x8x64xf32>
    %497 = vector.shape_cast %496 : vector<1x8x64xf32> to vector<8x64xf32>
    %498 = arith.mulf %497, %464 : vector<8x64xf32>
    %499 = arith.addf %495, %498 : vector<8x64xf32>
    %500 = vector.extract_strided_slice %495 {offsets = [0, 0], sizes = [8, 32], strides = [1, 1]} : vector<8x64xf32> to vector<8x32xf32>
    %501 = vector.extract_strided_slice %495 {offsets = [0, 32], sizes = [8, 32], strides = [1, 1]} : vector<8x64xf32> to vector<8x32xf32>
    %502 = vector.extract_strided_slice %352 {offsets = [32, 0], sizes = [8, 192], strides = [1, 1]} : vector<64x192xf32> to vector<8x192xf32>
    %503 = vector.extract_strided_slice %352 {offsets = [24, 0], sizes = [8, 192], strides = [1, 1]} : vector<64x192xf32> to vector<8x192xf32>
    %cst_53 = arith.constant dense<0.000000e+00> : vector<8x192xf32>
    %504 = tpu.matmul %499, %353, %cst_53 {dimension_numbers = #tpu.dot_dimension_numbers<[1], [0], [0], [1], [0, 0, 1, 1], [], []>} : vector<8x64xf32>, vector<64x192xf32>, vector<8x192xf32> -> vector<8x192xf32>
    %505 = vector.extract_strided_slice %502 {offsets = [0, 0], sizes = [8, 128], strides = [1, 1]} : vector<8x192xf32> to vector<8x128xf32>
    %506 = vector.extract_strided_slice %503 {offsets = [0, 0], sizes = [8, 128], strides = [1, 1]} : vector<8x192xf32> to vector<8x128xf32>
    %507 = arith.select %33, %505, %506 : vector<8x128xi1>, vector<8x128xf32>
    %508 = vector.extract_strided_slice %504 {offsets = [0, 0], sizes = [8, 128], strides = [1, 1]} : vector<8x192xf32> to vector<8x128xf32>
    %509 = arith.addf %507, %508 : vector<8x128xf32>
    %510 = arith.negf %509 : vector<8x128xf32>
    %511 = math.exp %510 : vector<8x128xf32>
    %cst_54 = arith.constant 1.000000e+00 : f32
    %512 = vector.broadcast %cst_54 : f32 to vector<8x128xf32>
    %513 = arith.addf %512, %511 : vector<8x128xf32>
    %514 = arith.divf %512, %513 : vector<8x128xf32>
    %515 = vector.extract_strided_slice %514 {offsets = [0, 0], sizes = [8, 64], strides = [1, 1]} : vector<8x128xf32> to vector<8x64xf32>
    %516 = vector.extract_strided_slice %514 {offsets = [0, 64], sizes = [8, 64], strides = [1, 1]} : vector<8x128xf32> to vector<8x64xf32>
    %517 = vector.extract_strided_slice %502 {offsets = [0, 128], sizes = [8, 64], strides = [1, 1]} : vector<8x192xf32> to vector<8x64xf32>
    %518 = vector.extract_strided_slice %503 {offsets = [0, 128], sizes = [8, 64], strides = [1, 1]} : vector<8x192xf32> to vector<8x64xf32>
    %519 = arith.select %36, %517, %518 : vector<8x64xi1>, vector<8x64xf32>
    %520 = vector.extract_strided_slice %504 {offsets = [0, 128], sizes = [8, 64], strides = [1, 1]} : vector<8x192xf32> to vector<8x64xf32>
    %521 = arith.addf %520, %356 : vector<8x64xf32>
    %522 = arith.mulf %515, %521 : vector<8x64xf32>
    %523 = arith.addf %519, %522 : vector<8x64xf32>
    %524 = math.tanh %523 : vector<8x64xf32>
    %525 = arith.subf %499, %524 : vector<8x64xf32>
    %526 = arith.mulf %516, %525 : vector<8x64xf32>
    %527 = arith.addf %524, %526 : vector<8x64xf32>
    %528 = vector.extract_strided_slice %22 {offsets = [4, 0, 0], sizes = [1, 8, 64], strides = [1, 1, 1]} : vector<8x8x64xf32> to vector<1x8x64xf32>
    %529 = vector.shape_cast %528 : vector<1x8x64xf32> to vector<8x64xf32>
    %530 = arith.mulf %529, %527 : vector<8x64xf32>
    %531 = vector.extract_strided_slice %24 {offsets = [4, 0, 0], sizes = [1, 8, 64], strides = [1, 1, 1]} : vector<8x8x64xf32> to vector<1x8x64xf32>
    %532 = vector.shape_cast %531 : vector<1x8x64xf32> to vector<8x64xf32>
    %533 = arith.mulf %532, %499 : vector<8x64xf32>
    %534 = arith.addf %530, %533 : vector<8x64xf32>
    %535 = vector.extract_strided_slice %530 {offsets = [0, 0], sizes = [8, 32], strides = [1, 1]} : vector<8x64xf32> to vector<8x32xf32>
    %536 = vector.extract_strided_slice %530 {offsets = [0, 32], sizes = [8, 32], strides = [1, 1]} : vector<8x64xf32> to vector<8x32xf32>
    %537 = vector.extract_strided_slice %352 {offsets = [40, 0], sizes = [8, 192], strides = [1, 1]} : vector<64x192xf32> to vector<8x192xf32>
    %538 = vector.extract_strided_slice %352 {offsets = [16, 0], sizes = [8, 192], strides = [1, 1]} : vector<64x192xf32> to vector<8x192xf32>
    %cst_55 = arith.constant dense<0.000000e+00> : vector<8x192xf32>
    %539 = tpu.matmul %534, %353, %cst_55 {dimension_numbers = #tpu.dot_dimension_numbers<[1], [0], [0], [1], [0, 0, 1, 1], [], []>} : vector<8x64xf32>, vector<64x192xf32>, vector<8x192xf32> -> vector<8x192xf32>
    %540 = vector.extract_strided_slice %537 {offsets = [0, 0], sizes = [8, 128], strides = [1, 1]} : vector<8x192xf32> to vector<8x128xf32>
    %541 = vector.extract_strided_slice %538 {offsets = [0, 0], sizes = [8, 128], strides = [1, 1]} : vector<8x192xf32> to vector<8x128xf32>
    %542 = arith.select %33, %540, %541 : vector<8x128xi1>, vector<8x128xf32>
    %543 = vector.extract_strided_slice %539 {offsets = [0, 0], sizes = [8, 128], strides = [1, 1]} : vector<8x192xf32> to vector<8x128xf32>
    %544 = arith.addf %542, %543 : vector<8x128xf32>
    %545 = arith.negf %544 : vector<8x128xf32>
    %546 = math.exp %545 : vector<8x128xf32>
    %cst_56 = arith.constant 1.000000e+00 : f32
    %547 = vector.broadcast %cst_56 : f32 to vector<8x128xf32>
    %548 = arith.addf %547, %546 : vector<8x128xf32>
    %549 = arith.divf %547, %548 : vector<8x128xf32>
    %550 = vector.extract_strided_slice %549 {offsets = [0, 0], sizes = [8, 64], strides = [1, 1]} : vector<8x128xf32> to vector<8x64xf32>
    %551 = vector.extract_strided_slice %549 {offsets = [0, 64], sizes = [8, 64], strides = [1, 1]} : vector<8x128xf32> to vector<8x64xf32>
    %552 = vector.extract_strided_slice %537 {offsets = [0, 128], sizes = [8, 64], strides = [1, 1]} : vector<8x192xf32> to vector<8x64xf32>
    %553 = vector.extract_strided_slice %538 {offsets = [0, 128], sizes = [8, 64], strides = [1, 1]} : vector<8x192xf32> to vector<8x64xf32>
    %554 = arith.select %36, %552, %553 : vector<8x64xi1>, vector<8x64xf32>
    %555 = vector.extract_strided_slice %539 {offsets = [0, 128], sizes = [8, 64], strides = [1, 1]} : vector<8x192xf32> to vector<8x64xf32>
    %556 = arith.addf %555, %356 : vector<8x64xf32>
    %557 = arith.mulf %550, %556 : vector<8x64xf32>
    %558 = arith.addf %554, %557 : vector<8x64xf32>
    %559 = math.tanh %558 : vector<8x64xf32>
    %560 = arith.subf %534, %559 : vector<8x64xf32>
    %561 = arith.mulf %551, %560 : vector<8x64xf32>
    %562 = arith.addf %559, %561 : vector<8x64xf32>
    %563 = vector.extract_strided_slice %22 {offsets = [5, 0, 0], sizes = [1, 8, 64], strides = [1, 1, 1]} : vector<8x8x64xf32> to vector<1x8x64xf32>
    %564 = vector.shape_cast %563 : vector<1x8x64xf32> to vector<8x64xf32>
    %565 = arith.mulf %564, %562 : vector<8x64xf32>
    %566 = vector.extract_strided_slice %24 {offsets = [5, 0, 0], sizes = [1, 8, 64], strides = [1, 1, 1]} : vector<8x8x64xf32> to vector<1x8x64xf32>
    %567 = vector.shape_cast %566 : vector<1x8x64xf32> to vector<8x64xf32>
    %568 = arith.mulf %567, %534 : vector<8x64xf32>
    %569 = arith.addf %565, %568 : vector<8x64xf32>
    %570 = vector.extract_strided_slice %565 {offsets = [0, 0], sizes = [8, 32], strides = [1, 1]} : vector<8x64xf32> to vector<8x32xf32>
    %571 = vector.extract_strided_slice %565 {offsets = [0, 32], sizes = [8, 32], strides = [1, 1]} : vector<8x64xf32> to vector<8x32xf32>
    %572 = vector.extract_strided_slice %352 {offsets = [48, 0], sizes = [8, 192], strides = [1, 1]} : vector<64x192xf32> to vector<8x192xf32>
    %573 = vector.extract_strided_slice %352 {offsets = [8, 0], sizes = [8, 192], strides = [1, 1]} : vector<64x192xf32> to vector<8x192xf32>
    %cst_57 = arith.constant dense<0.000000e+00> : vector<8x192xf32>
    %574 = tpu.matmul %569, %353, %cst_57 {dimension_numbers = #tpu.dot_dimension_numbers<[1], [0], [0], [1], [0, 0, 1, 1], [], []>} : vector<8x64xf32>, vector<64x192xf32>, vector<8x192xf32> -> vector<8x192xf32>
    %575 = vector.extract_strided_slice %572 {offsets = [0, 0], sizes = [8, 128], strides = [1, 1]} : vector<8x192xf32> to vector<8x128xf32>
    %576 = vector.extract_strided_slice %573 {offsets = [0, 0], sizes = [8, 128], strides = [1, 1]} : vector<8x192xf32> to vector<8x128xf32>
    %577 = arith.select %33, %575, %576 : vector<8x128xi1>, vector<8x128xf32>
    %578 = vector.extract_strided_slice %574 {offsets = [0, 0], sizes = [8, 128], strides = [1, 1]} : vector<8x192xf32> to vector<8x128xf32>
    %579 = arith.addf %577, %578 : vector<8x128xf32>
    %580 = arith.negf %579 : vector<8x128xf32>
    %581 = math.exp %580 : vector<8x128xf32>
    %cst_58 = arith.constant 1.000000e+00 : f32
    %582 = vector.broadcast %cst_58 : f32 to vector<8x128xf32>
    %583 = arith.addf %582, %581 : vector<8x128xf32>
    %584 = arith.divf %582, %583 : vector<8x128xf32>
    %585 = vector.extract_strided_slice %584 {offsets = [0, 0], sizes = [8, 64], strides = [1, 1]} : vector<8x128xf32> to vector<8x64xf32>
    %586 = vector.extract_strided_slice %584 {offsets = [0, 64], sizes = [8, 64], strides = [1, 1]} : vector<8x128xf32> to vector<8x64xf32>
    %587 = vector.extract_strided_slice %572 {offsets = [0, 128], sizes = [8, 64], strides = [1, 1]} : vector<8x192xf32> to vector<8x64xf32>
    %588 = vector.extract_strided_slice %573 {offsets = [0, 128], sizes = [8, 64], strides = [1, 1]} : vector<8x192xf32> to vector<8x64xf32>
    %589 = arith.select %36, %587, %588 : vector<8x64xi1>, vector<8x64xf32>
    %590 = vector.extract_strided_slice %574 {offsets = [0, 128], sizes = [8, 64], strides = [1, 1]} : vector<8x192xf32> to vector<8x64xf32>
    %591 = arith.addf %590, %356 : vector<8x64xf32>
    %592 = arith.mulf %585, %591 : vector<8x64xf32>
    %593 = arith.addf %589, %592 : vector<8x64xf32>
    %594 = math.tanh %593 : vector<8x64xf32>
    %595 = arith.subf %569, %594 : vector<8x64xf32>
    %596 = arith.mulf %586, %595 : vector<8x64xf32>
    %597 = arith.addf %594, %596 : vector<8x64xf32>
    %598 = vector.extract_strided_slice %22 {offsets = [6, 0, 0], sizes = [1, 8, 64], strides = [1, 1, 1]} : vector<8x8x64xf32> to vector<1x8x64xf32>
    %599 = vector.shape_cast %598 : vector<1x8x64xf32> to vector<8x64xf32>
    %600 = arith.mulf %599, %597 : vector<8x64xf32>
    %601 = vector.extract_strided_slice %24 {offsets = [6, 0, 0], sizes = [1, 8, 64], strides = [1, 1, 1]} : vector<8x8x64xf32> to vector<1x8x64xf32>
    %602 = vector.shape_cast %601 : vector<1x8x64xf32> to vector<8x64xf32>
    %603 = arith.mulf %602, %569 : vector<8x64xf32>
    %604 = arith.addf %600, %603 : vector<8x64xf32>
    %605 = vector.extract_strided_slice %600 {offsets = [0, 0], sizes = [8, 32], strides = [1, 1]} : vector<8x64xf32> to vector<8x32xf32>
    %606 = vector.extract_strided_slice %600 {offsets = [0, 32], sizes = [8, 32], strides = [1, 1]} : vector<8x64xf32> to vector<8x32xf32>
    %607 = vector.extract_strided_slice %352 {offsets = [56, 0], sizes = [8, 192], strides = [1, 1]} : vector<64x192xf32> to vector<8x192xf32>
    %608 = vector.extract_strided_slice %352 {offsets = [0, 0], sizes = [8, 192], strides = [1, 1]} : vector<64x192xf32> to vector<8x192xf32>
    %cst_59 = arith.constant dense<0.000000e+00> : vector<8x192xf32>
    %609 = tpu.matmul %604, %353, %cst_59 {dimension_numbers = #tpu.dot_dimension_numbers<[1], [0], [0], [1], [0, 0, 1, 1], [], []>} : vector<8x64xf32>, vector<64x192xf32>, vector<8x192xf32> -> vector<8x192xf32>
    %610 = vector.extract_strided_slice %607 {offsets = [0, 0], sizes = [8, 128], strides = [1, 1]} : vector<8x192xf32> to vector<8x128xf32>
    %611 = vector.extract_strided_slice %608 {offsets = [0, 0], sizes = [8, 128], strides = [1, 1]} : vector<8x192xf32> to vector<8x128xf32>
    %612 = arith.select %33, %610, %611 : vector<8x128xi1>, vector<8x128xf32>
    %613 = vector.extract_strided_slice %609 {offsets = [0, 0], sizes = [8, 128], strides = [1, 1]} : vector<8x192xf32> to vector<8x128xf32>
    %614 = arith.addf %612, %613 : vector<8x128xf32>
    %615 = arith.negf %614 : vector<8x128xf32>
    %616 = math.exp %615 : vector<8x128xf32>
    %cst_60 = arith.constant 1.000000e+00 : f32
    %617 = vector.broadcast %cst_60 : f32 to vector<8x128xf32>
    %618 = arith.addf %617, %616 : vector<8x128xf32>
    %619 = arith.divf %617, %618 : vector<8x128xf32>
    %620 = vector.extract_strided_slice %619 {offsets = [0, 0], sizes = [8, 64], strides = [1, 1]} : vector<8x128xf32> to vector<8x64xf32>
    %621 = vector.extract_strided_slice %619 {offsets = [0, 64], sizes = [8, 64], strides = [1, 1]} : vector<8x128xf32> to vector<8x64xf32>
    %622 = vector.extract_strided_slice %607 {offsets = [0, 128], sizes = [8, 64], strides = [1, 1]} : vector<8x192xf32> to vector<8x64xf32>
    %623 = vector.extract_strided_slice %608 {offsets = [0, 128], sizes = [8, 64], strides = [1, 1]} : vector<8x192xf32> to vector<8x64xf32>
    %624 = arith.select %36, %622, %623 : vector<8x64xi1>, vector<8x64xf32>
    %625 = vector.extract_strided_slice %609 {offsets = [0, 128], sizes = [8, 64], strides = [1, 1]} : vector<8x192xf32> to vector<8x64xf32>
    %626 = arith.addf %625, %356 : vector<8x64xf32>
    %627 = arith.mulf %620, %626 : vector<8x64xf32>
    %628 = arith.addf %624, %627 : vector<8x64xf32>
    %629 = math.tanh %628 : vector<8x64xf32>
    %630 = arith.subf %604, %629 : vector<8x64xf32>
    %631 = arith.mulf %621, %630 : vector<8x64xf32>
    %632 = arith.addf %629, %631 : vector<8x64xf32>
    %633 = vector.extract_strided_slice %22 {offsets = [7, 0, 0], sizes = [1, 8, 64], strides = [1, 1, 1]} : vector<8x8x64xf32> to vector<1x8x64xf32>
    %634 = vector.shape_cast %633 : vector<1x8x64xf32> to vector<8x64xf32>
    %635 = arith.mulf %634, %632 : vector<8x64xf32>
    %636 = vector.extract_strided_slice %24 {offsets = [7, 0, 0], sizes = [1, 8, 64], strides = [1, 1, 1]} : vector<8x8x64xf32> to vector<1x8x64xf32>
    %637 = vector.shape_cast %636 : vector<1x8x64xf32> to vector<8x64xf32>
    %638 = arith.mulf %637, %604 : vector<8x64xf32>
    %639 = arith.addf %635, %638 : vector<8x64xf32>
    %640 = vector.extract_strided_slice %635 {offsets = [0, 0], sizes = [8, 32], strides = [1, 1]} : vector<8x64xf32> to vector<8x32xf32>
    %641 = vector.extract_strided_slice %635 {offsets = [0, 32], sizes = [8, 32], strides = [1, 1]} : vector<8x64xf32> to vector<8x32xf32>
    %642 = tpu.concatenate %395, %641 in 1 : vector<8x32xf32>, vector<8x32xf32> -> vector<8x64xf32>
    %643 = tpu.concatenate %430, %606 in 1 : vector<8x32xf32>, vector<8x32xf32> -> vector<8x64xf32>
    %644 = tpu.concatenate %465, %571 in 1 : vector<8x32xf32>, vector<8x32xf32> -> vector<8x64xf32>
    %645 = tpu.concatenate %500, %536 in 1 : vector<8x32xf32>, vector<8x32xf32> -> vector<8x64xf32>
    %646 = tpu.concatenate %535, %501 in 1 : vector<8x32xf32>, vector<8x32xf32> -> vector<8x64xf32>
    %647 = tpu.concatenate %570, %466 in 1 : vector<8x32xf32>, vector<8x32xf32> -> vector<8x64xf32>
    %648 = tpu.concatenate %605, %431 in 1 : vector<8x32xf32>, vector<8x32xf32> -> vector<8x64xf32>
    %649 = tpu.concatenate %640, %396 in 1 : vector<8x32xf32>, vector<8x32xf32> -> vector<8x64xf32>
    %650 = tpu.concatenate %642, %643, %644, %645, %646, %647, %648, %649 in 0 : vector<8x64xf32>, vector<8x64xf32>, vector<8x64xf32>, vector<8x64xf32>, vector<8x64xf32>, vector<8x64xf32>, vector<8x64xf32>, vector<8x64xf32> -> vector<64x64xf32>
    %c0_61 = arith.constant 0 : index
    %c0_62 = arith.constant 0 : index
    %651 = vector.load %arg12[%c0_61, %c0_62] : memref<64x32xf32, #tpu.memory_space<vmem>>, vector<64x32xf32>
    %cst_63 = arith.constant dense<0.000000e+00> : vector<64x32xf32>
    %652 = tpu.matmul %650, %651, %cst_63 {dimension_numbers = #tpu.dot_dimension_numbers<[1], [0], [0], [1], [0, 0, 1, 1], [], []>} : vector<64x64xf32>, vector<64x32xf32>, vector<64x32xf32> -> vector<64x32xf32>
    %653 = vector.extract_strided_slice %652 {offsets = [0, 0], sizes = [8, 32], strides = [1, 1]} : vector<64x32xf32> to vector<8x32xf32>
    %654 = vector.extract_strided_slice %652 {offsets = [8, 0], sizes = [8, 32], strides = [1, 1]} : vector<64x32xf32> to vector<8x32xf32>
    %655 = vector.extract_strided_slice %652 {offsets = [16, 0], sizes = [8, 32], strides = [1, 1]} : vector<64x32xf32> to vector<8x32xf32>
    %656 = vector.extract_strided_slice %652 {offsets = [24, 0], sizes = [8, 32], strides = [1, 1]} : vector<64x32xf32> to vector<8x32xf32>
    %657 = vector.extract_strided_slice %652 {offsets = [32, 0], sizes = [8, 32], strides = [1, 1]} : vector<64x32xf32> to vector<8x32xf32>
    %658 = vector.extract_strided_slice %652 {offsets = [40, 0], sizes = [8, 32], strides = [1, 1]} : vector<64x32xf32> to vector<8x32xf32>
    %659 = vector.extract_strided_slice %652 {offsets = [48, 0], sizes = [8, 32], strides = [1, 1]} : vector<64x32xf32> to vector<8x32xf32>
    %660 = vector.extract_strided_slice %652 {offsets = [56, 0], sizes = [8, 32], strides = [1, 1]} : vector<64x32xf32> to vector<8x32xf32>
    %661 = tpu.concatenate %653, %654, %655, %656, %657, %658, %659, %660 in 1 : vector<8x32xf32>, vector<8x32xf32>, vector<8x32xf32>, vector<8x32xf32>, vector<8x32xf32>, vector<8x32xf32>, vector<8x32xf32>, vector<8x32xf32> -> vector<8x256xf32>
    %c0_64 = arith.constant 0 : index
    %c0_65 = arith.constant 0 : index
    %662 = vector.load %arg13[%c0_64, %c0_65] : memref<8x256xf32, #tpu.memory_space<vmem>>, vector<8x256xf32>
    tpu.vector_store %arg13[%c0_64, %c0_65], %661 {strides = array<i32>} : memref<8x256xf32, #tpu.memory_space<vmem>>, vector<8x256xf32>,
    %cst_66 = arith.constant dense<0.000000e+00> : vector<8x32xf32>
    %663 = tpu.matmul %335, %651, %cst_66 {dimension_numbers = #tpu.dot_dimension_numbers<[1], [0], [0], [1], [0, 0, 1, 1], [], []>} : vector<8x64xf32>, vector<64x32xf32>, vector<8x32xf32> -> vector<8x32xf32>
    %cst_67 = arith.constant dense<0.000000e+00> : vector<8x32xf32>
    %664 = tpu.matmul %639, %651, %cst_67 {dimension_numbers = #tpu.dot_dimension_numbers<[1], [0], [0], [1], [0, 0, 1, 1], [], []>} : vector<8x64xf32>, vector<64x32xf32>, vector<8x32xf32> -> vector<8x32xf32>
    %665 = tpu.concatenate %663, %664 in 0 : vector<8x32xf32>, vector<8x32xf32> -> vector<16x32xf32>
    %c0_68 = arith.constant 0 : index
    %c0_69 = arith.constant 0 : index
    %666 = vector.load %arg14[%c0_68, %c0_69] : memref<16x32xf32, #tpu.memory_space<vmem>>, vector<16x32xf32>
    tpu.vector_store %arg14[%c0_68, %c0_69], %665 {strides = array<i32>} : memref<16x32xf32, #tpu.memory_space<vmem>>, vector<16x32xf32>,
    return
  }
  func.func @transform_0(%arg0: i32, %arg1: memref<2xi32, #tpu.memory_space<smem>>) -> (i32, i32) {
    %c0_i32 = arith.constant 0 : i32
    %c0_i32_0 = arith.constant 0 : i32
    %c0_i32_1 = arith.constant 0 : i32
    return %c0_i32, %c0_i32_0 : i32, i32
  }
  func.func @transform_1(%arg0: i32, %arg1: memref<2xi32, #tpu.memory_space<smem>>) -> (i32, i32) {
    %c0_i32 = arith.constant 0 : i32
    %c0_i32_0 = arith.constant 0 : i32
    %c0_i32_1 = arith.constant 0 : i32
    return %c0_i32, %c0_i32_0 : i32, i32
  }
  func.func @transform_2(%arg0: i32, %arg1: memref<2xi32, #tpu.memory_space<smem>>) -> (i32, i32) {
    %c0_i32 = arith.constant 0 : i32
    %c0_i32_0 = arith.constant 0 : i32
    %c0_i32_1 = arith.constant 0 : i32
    return %c0_i32, %c0_i32_0 : i32, i32
  }
  func.func @transform_3(%arg0: i32, %arg1: memref<2xi32, #tpu.memory_space<smem>>) -> (i32, i32) {
    %c0_i32 = arith.constant 0 : i32
    %c0_i32_0 = arith.constant 0 : i32
    %c0_i32_1 = arith.constant 0 : i32
    return %c0_i32, %c0_i32_0 : i32, i32
  }
  func.func @transform_4(%arg0: i32, %arg1: memref<2xi32, #tpu.memory_space<smem>>) -> (i32, i32) {
    %c0_i32 = arith.constant 0 : i32
    %c0_i32_0 = arith.constant 0 : i32
    %c0_i32_1 = arith.constant 0 : i32
    return %c0_i32, %c0_i32_0 : i32, i32
  }
  func.func @transform_5(%arg0: i32, %arg1: memref<2xi32, #tpu.memory_space<smem>>) -> (i32, i32) {
    %c0_i32 = arith.constant 0 : i32
    %c0_i32_0 = arith.constant 0 : i32
    %c0_i32_1 = arith.constant 0 : i32
    return %c0_i32, %c0_i32_0 : i32, i32
  }
  func.func @transform_6(%arg0: i32, %arg1: memref<2xi32, #tpu.memory_space<smem>>) -> (i32, i32) {
    %c0_i32 = arith.constant 0 : i32
    %c0_i32_0 = arith.constant 0 : i32
    %c0_i32_1 = arith.constant 0 : i32
    return %c0_i32, %c0_i32_0 : i32, i32
  }
  func.func @transform_7(%arg0: i32, %arg1: memref<2xi32, #tpu.memory_space<smem>>) -> (i32, i32) {
    %c0_i32 = arith.constant 0 : i32
    %c0_i32_0 = arith.constant 0 : i32
    %c0_i32_1 = arith.constant 0 : i32
    return %c0_i32, %c0_i32_0 : i32, i32
  }
  func.func @transform_8(%arg0: i32, %arg1: memref<2xi32, #tpu.memory_space<smem>>) -> (i32, i32) {
    %c0_i32 = arith.constant 0 : i32
    %c0_i32_0 = arith.constant 0 : i32
    %c0_i32_1 = arith.constant 0 : i32
    return %c0_i32, %c0_i32_0 : i32, i32
  }
  func.func @transform_9(%arg0: i32, %arg1: memref<2xi32, #tpu.memory_space<smem>>) -> (i32, i32) {
    %c0_i32 = arith.constant 0 : i32
    %c0_i32_0 = arith.constant 0 : i32
    %c0_i32_1 = arith.constant 0 : i32
    return %c0_i32, %c0_i32_0 : i32, i32
  }
  func.func @transform_10(%arg0: i32, %arg1: memref<2xi32, #tpu.memory_space<smem>>) -> (i32, i32) {
    %c0_i32 = arith.constant 0 : i32
    %c0_i32_0 = arith.constant 0 : i32
    %c0_i32_1 = arith.constant 0 : i32
    return %c0_i32, %c0_i32_0 : i32, i32
  }
  func.func @transform_11(%arg0: i32, %arg1: memref<2xi32, #tpu.memory_space<smem>>) -> (i32, i32) {
    %c0_i32 = arith.constant 0 : i32
    %c0_i32_0 = arith.constant 0 : i32
    %c0_i32_1 = arith.constant 0 : i32
    return %c0_i32, %c0_i32_0 : i32, i32
  }
  func.func @transform_12(%arg0: i32, %arg1: memref<2xi32, #tpu.memory_space<smem>>) -> (i32, i32) {
    %c0_i32 = arith.constant 0 : i32
    %c0_i32_0 = arith.constant 0 : i32
    %c0_i32_1 = arith.constant 0 : i32
    return %c0_i32, %c0_i32_0 : i32, i32
  }
}

</mosaic_0001>

<bundles_post_ra>
// kernel: encoder_forward.1
= control target key start
LH: loop header
LB: loop body
LE: loop exit
PB: predicated region body
PF: predicated region fallthrough
CT: control target
= control target key end

     0   :  { %s2249_s28 = smov [#allocation3]   ;;  %s3673_s0 = inlined_call_operand.vmem [shape: s32[2], index: 0, kind: input, shape index: {}]   ;;  %s3674_s1 = inlined_call_operand.vmem [shape: s32[64,1], index: 1, kind: input, shape index: {}]   ;;  %s3675_s2 = inlined_call_operand.vmem [shape: f32[8,32], index: 2, kind: input, shape index: {}]   ;;  %s3676_s3 = inlined_call_operand.vmem [shape: f32[128,192], index: 3, kind: input, shape index: {}]   ;;  %s3677_s4 = inlined_call_operand.vmem [shape: f32[1,192], index: 4, kind: input, shape index: {}]   ;;  %s3678_s5 = inlined_call_operand.vmem [shape: f32[64,192], index: 5, kind: input, shape index: {}]   ;;  %s3679_s6 = inlined_call_operand.vmem [shape: f32[1,64], index: 6, kind: input, shape index: {}]   ;;  %s3680_s7 = inlined_call_operand.vmem [shape: f32[64,192], index: 7, kind: input, shape index: {}]   ;;  %s3681_s8 = inlined_call_operand.vmem [shape: f32[1,192], index: 8, kind: input, shape index: {}]   ;;  %s3682_s9 = inlined_call_operand.vmem [shape: f32[64,192], index: 9, kind: input, shape index: {}]   ;;  %s3683_s10 = inlined_call_operand.vmem [shape: f32[1,64], index: 10, kind: input, shape index: {}]   ;;  %s3684_s11 = inlined_call_operand.vmem [shape: f32[64,32], index: 11, kind: input, shape index: {}]   ;;  %s3685_s12 = inlined_call_operand.vmem [shape: f32[8,256], index: 12, kind: output, shape index: {0}]   ;;  %s3686_s13 = inlined_call_operand.vmem [shape: f32[16,32], index: 13, kind: output, shape index: {1}]  }
   0x1   :  { %s20_s27 = sshll.u32 %s3673_s0, 4  ;;  %s21_s27 = int_to_ptr.vmem [resolvable:$true] %s20_s27 }
   0x2   :  { %23 = dma.vmem_to_smem %s21_s27, 16, %s2249_s28, [#allocation2] }
   0x3   :  { %2247 = dma.done.wait [#allocation2], 16 }
   0x4   :  { %2248 = vsyncadd [#allocation2], 4294967280 }
   0x5   :  { %26 = sfence }
   0x6   :  { %v136_v0 = vld [vmem:[%s3674_s1] sm:$0xff]  ;;  %v138_v1 = vld [vmem:[%s3674_s1 + $0x10] sm:$0xff]  ;;  %v3688_v2 = vmov 0   ;;  %v223_v5 = vld [vmem:[%s3676_s3 + $0xf8] sm:$0xff]  ;;  %s2251_s25 = smov 32   ;;  %v49_v42 = vlaneseq  ;;  %v2252_v46 = vmov 1.0  }
   0x7   :  { %2134 = vset.pattern.permute.xlu0 %v3688_v2  ;;  %2135 = vset.pattern.permute.xlu1 %v3688_v2  ;;  %v140_v3 = vld [vmem:[%s3674_s1 + $0x20] sm:$0xff]  ;;  %v222_v4 = vld [vmem:[%s3676_s3 + $0xf0] sm:$0xff]  ;;  %v221_v7 = vld [vmem:[%s3676_s3 + $0xe8] sm:$0xff]  ;;  %vm338_vm3 = vcmask 261120   ;;  %vm340_vm4 = vcmask 1041408   ;;  %vm342_vm5 = vcmask 523264  }
   0x8   :  { %145 = vperm.xlu0 %2134, %v136_v0   ;;  %151 = vperm.xlu1 %2135, %v138_v1   ;;  %v220_v6 = vld [vmem:[%s3676_s3 + $0xe0] sm:$0xff]  ;;  %v218_v8 = vld [vmem:[%s3676_s3 + $0xd0] sm:$0xff]  ;;  %v219_v9 = vld [vmem:[%s3676_s3 + $0xd8] sm:$0xff]  ;;  %v2464_v43 = vand.u32 127, %v49_v42  ;;  %s63_s19 = sld [smem:[#allocation3]]  ;;  %s2262_s21 = smov 96  }
   0x9   :  { %2136 = vset.pattern.permute.xlu2 %v3688_v2  ;;  %230 = vmatpush.msra.mxu0 %v222_v4  ;;  %v137_v10 = vld [vmem:[%s3674_s1 + $0x8] sm:$0xff]  ;;  %v139_v11 = vld [vmem:[%s3674_s1 + $0x18] sm:$0xff]  ;;  %v216_v12 = vld [vmem:[%s3676_s3 + $0xc0] sm:$0xff]  ;;  %s2005_s20 = sld [smem:[#allocation3 + $0x1]] }
   0xa   :  { %157 = vperm.xlu2 %2136, %v140_v3   ;;  %271 = vmatpush.msra.mxu1 %v223_v5  ;;  %v217_v13 = vld [vmem:[%s3676_s3 + $0xc8] sm:$0xff]  ;;  %v214_v15 = vld [vmem:[%s3676_s3 + $0xb0] sm:$0xff]  ;;  %v215_v16 = vld [vmem:[%s3676_s3 + $0xb8] sm:$0xff]  ;;  %vm132_vm11 = vcmp.ge.s32.totalorder %v2464_v43, 64  ;;  %vm133_vm12 = vcmp.lt.s32.totalorder %v2464_v43, 96  ;;  %vm53_vm14 = vcmp.lt.s32.totalorder %v2464_v43, 32 }
   0xb   :  { %231 = vmatpush.msra.mxu0 %v220_v6  ;;  %v141_v14 = vld [vmem:[%s3674_s1 + $0x28] sm:$0xff]  ;;  %v212_v17 = vld [vmem:[%s3676_s3 + $0xa0] sm:$0xff]  ;;  %v210_v19 = vld [vmem:[%s3676_s3 + $0x90] sm:$0xff] }
   0xc   :  { %272 = vmatpush.msra.mxu1 %v221_v7  ;;  %v213_v18 = vld [vmem:[%s3676_s3 + $0xa8] sm:$0xff]  ;;  %v211_v20 = vld [vmem:[%s3676_s3 + $0x98] sm:$0xff]  ;;  %v142_v21 = vld [vmem:[%s3674_s1 + $0x30] sm:$0xff] }
   0xd   :  { %232 = vmatpush.msra.mxu0 %v218_v8  ;;  %v333_v22 = vld [vmem:[%s3675_s2 + $0x2] sm:$0x3]  ;;  %v209_v24 = vld [vmem:[%s3676_s3 + $0x88] sm:$0xff]  ;;  %v143_v25 = vld [vmem:[%s3674_s1 + $0x38] sm:$0xff] }
   0xe   :  { %273 = vmatpush.msra.mxu1 %v219_v9  ;;  %v208_v23 = vld [vmem:[%s3676_s3 + $0x80] sm:$0xff]  ;;  %v206_v26 = vld [vmem:[%s3676_s3 + $0x70] sm:$0xff]  ;;  %v207_v27 = vld [vmem:[%s3676_s3 + $0x78] sm:$0xff] }
   0xf   :  { %233 = vmatpush.msra.mxu0 %v216_v12  ;;  %v204_v28 = vld [vmem:[%s3676_s3 + $0x60] sm:$0xff]  ;;  %v205_v29 = vld [vmem:[%s3676_s3 + $0x68] sm:$0xff]  ;;  %v202_v30 = vld [vmem:[%s3676_s3 + $0x50] sm:$0xff] }
  0x10   :  { %148 = vperm.xlu0 %2134, %v137_v10   ;;  %154 = vperm.xlu1 %2135, %v139_v11   ;;  %v203_v31 = vld [vmem:[%s3676_s3 + $0x58] sm:$0xff]  ;;  %v200_v32 = vld [vmem:[%s3676_s3 + $0x40] sm:$0xff]  ;;  %v201_v33 = vld [vmem:[%s3676_s3 + $0x48] sm:$0xff] }
  0x11   :  { %274 = vmatpush.msra.mxu1 %v217_v13  ;;  %234 = vmatpush.msra.mxu0 %v214_v15  ;;  %v198_v34 = vld [vmem:[%s3676_s3 + $0x30] sm:$0xff]  ;;  %v199_v35 = vld [vmem:[%s3676_s3 + $0x38] sm:$0xff]  ;;  %v196_v36 = vld [vmem:[%s3676_s3 + $0x20] sm:$0xff] }
  0x12   :  { %160 = vperm.xlu2 %2136, %v141_v14   ;;  %v197_v37 = vld [vmem:[%s3676_s3 + $0x28] sm:$0xff]  ;;  %v194_v38 = vld [vmem:[%s3676_s3 + $0x10] sm:$0xff]  ;;  %v195_v39 = vld [vmem:[%s3676_s3 + $0x18] sm:$0xff] }
  0x13   :  { %275 = vmatpush.msra.mxu1 %v215_v16  ;;  %235 = vmatpush.msra.mxu0 %v212_v17  ;;  %v192_v40 = vld [vmem:[%s3676_s3] sm:$0xff]  ;;  %v193_v41 = vld [vmem:[%s3676_s3 + $0x8] sm:$0xff]  ;;  %v2472_v47 = vld [vmem:[%s3678_s5 + $0x70] sm:$0xff] }
  0x14   :  { %v2477_v48 = vld [vmem:[%s3678_s5 + $0x78] sm:$0xff]  ;;  %354 = vmatpush.msra.mxu2 %v2472_v47  ;;  %v2487_v50 = vld [vmem:[%s3678_s5 + $0x60] sm:$0xff]  ;;  %v2492_v51 = vld [vmem:[%s3678_s5 + $0x68] sm:$0xff] }
  0x15   :  { %276 = vmatpush.msra.mxu1 %v213_v18  ;;  %236 = vmatpush.msra.mxu0 %v210_v19  ;;  %v2499_v53 = vld [vmem:[%s3678_s5 + $0x50] sm:$0xff]  ;;  %v2504_v54 = vld [vmem:[%s3678_s5 + $0x58] sm:$0xff]  ;;  %v2511_v55 = vld [vmem:[%s3678_s5 + $0x40] sm:$0xff] }
  0x16   :  { %374 = vmatpush.msra.mxu3 %v2477_v48  ;;  %355 = vmatpush.msra.mxu2 %v2487_v50  ;;  %v2516_v56 = vld [vmem:[%s3678_s5 + $0x48] sm:$0xff]  ;;  %v2525_v57 = vld [vmem:[%s3678_s5 + $0x30] sm:$0xff]  ;;  %v2530_v58 = vld [vmem:[%s3678_s5 + $0x38] sm:$0xff] }
  0x17   :  { %277 = vmatpush.msra.mxu1 %v211_v20  ;;  %237 = vmatpush.msra.mxu0 %v208_v23  ;;  %v2544_v59 = vld [vmem:[%s3678_s5 + $0x20] sm:$0xff]  ;;  %v2549_v60 = vld [vmem:[%s3678_s5 + $0x28] sm:$0xff]  ;;  %v2556_v61 = vld [vmem:[%s3678_s5 + $0x10] sm:$0xff] }
  0x18   :  { %163 = vperm.xlu0 %2134, %v142_v21   ;;  %335 = vrot.lane.b32.xlu1 %v333_v22, %s2251_s25  ;;  %v2561_v62 = vld [vmem:[%s3678_s5 + $0x18] sm:$0xff]  ;;  %v332_v63 = vld [vmem:[%s3675_s2] sm:$0x3]  ;;  %v2577_v4 = vld [vmem:[%s3678_s5 + $0x8] sm:$0xff] }
  0x19   :  { %278 = vmatpush.msra.mxu1 %v209_v24  ;;  %238 = vmatpush.msra.mxu0 %v206_v26  ;;  %v2572_v3 = vld [vmem:[%s3678_s5] sm:$0xff]  ;;  %vm134_vm13 = vmand %vm132_vm11, %vm133_vm12 }
  0x1a   :  { %166 = vperm.xlu2 %2136, %v143_v25   ;;  %375 = vmatpush.msra.mxu3 %v2492_v51  ;;  %v224_v12 = vld [vmem:[%s3677_s4] sm:$0x3]  ;;  %vm2667_vm15 = vmor %vm53_vm14, %vm134_vm13 }
  0x1b   :  { %279 = vmatpush.msra.mxu1 %v207_v27  ;;  %239 = vmatpush.msra.mxu0 %v204_v28  ;;  %v226_v13 = vperm.slane %v224_v12, 0  ;;  %v227_v14 = vperm.slane %v224_v12, 1 }
  0x1c   :  { %356 = vmatpush.msra.mxu2 %v2499_v53  ;;  %376 = vmatpush.msra.mxu3 %v2504_v54 }
  0x1d   :  { %280 = vmatpush.msra.mxu1 %v205_v29  ;;  %240 = vmatpush.msra.mxu0 %v202_v30 }
  0x1e   :  { %357 = vmatpush.msra.mxu2 %v2511_v55  ;;  %377 = vmatpush.msra.mxu3 %v2516_v56 }
  0x1f   :  { %281 = vmatpush.msra.mxu1 %v203_v31  ;;  %241 = vmatpush.msra.mxu0 %v200_v32 }
  0x20   :  { %358 = vmatpush.msra.mxu2 %v2525_v57  ;;  %378 = vmatpush.msra.mxu3 %v2530_v58 }
  0x21   :  { %282 = vmatpush.msra.mxu1 %v201_v33  ;;  %242 = vmatpush.msra.mxu0 %v198_v34 }
  0x22   :  { %359 = vmatpush.msra.mxu2 %v2544_v59  ;;  %379 = vmatpush.msra.mxu3 %v2549_v60 }
  0x23   :  { %283 = vmatpush.msra.mxu1 %v199_v35  ;;  %243 = vmatpush.msra.mxu0 %v196_v36 }
  0x24   :  { %360 = vmatpush.msra.mxu2 %v2556_v61  ;;  %380 = vmatpush.msra.mxu3 %v2561_v62 }
  0x25   :  { %284 = vmatpush.msra.mxu1 %v197_v37  ;;  %244 = vmatpush.msra.mxu0 %v194_v38 }
  0x26   :  { %361 = vmatpush.msra.mxu2 %v2572_v3  ;;  %381 = vmatpush.msra.mxu3 %v2577_v4 }
  0x27   :  { %285 = vmatpush.msra.mxu1 %v195_v39  ;;  %245 = vmatpush.msra.mxu0 %v192_v40 }
  0x28   :  { %437 = vmatpush.msrb.mxu2 %v2472_v47  ;;  %457 = vmatpush.msrb.mxu3 %v2477_v48 }
  0x29   :  { %286 = vmatpush.msra.mxu1 %v193_v41  ;;  %769 = vmatpush.msrb.mxu0 %v2472_v47 }
  0x2a   :  { %438 = vmatpush.msrb.mxu2 %v2487_v50  ;;  %458 = vmatpush.msrb.mxu3 %v2492_v51 }
  0x2b   :  { %955 = vmatpush.msrb.mxu1 %v2477_v48  ;;  %770 = vmatpush.msrb.mxu0 %v2487_v50 }
  0x2c   :  { %439 = vmatpush.msrb.mxu2 %v2499_v53  ;;  %459 = vmatpush.msrb.mxu3 %v2504_v54 }
  0x2d   :  { %956 = vmatpush.msrb.mxu1 %v2492_v51  ;;  %771 = vmatpush.msrb.mxu0 %v2499_v53 }
  0x2e   :  { %440 = vmatpush.msrb.mxu2 %v2511_v55  ;;  %460 = vmatpush.msrb.mxu3 %v2516_v56 }
  0x2f   :  { %957 = vmatpush.msrb.mxu1 %v2504_v54  ;;  %772 = vmatpush.msrb.mxu0 %v2511_v55 }
  0x30   :  { %441 = vmatpush.msrb.mxu2 %v2525_v57  ;;  %461 = vmatpush.msrb.mxu3 %v2530_v58 }
  0x31   :  { %958 = vmatpush.msrb.mxu1 %v2516_v56  ;;  %773 = vmatpush.msrb.mxu0 %v2525_v57 }
  0x32   :  { %442 = vmatpush.msrb.mxu2 %v2544_v59  ;;  %462 = vmatpush.msrb.mxu3 %v2549_v60 }
  0x33   :  { %959 = vmatpush.msrb.mxu1 %v2530_v58  ;;  %774 = vmatpush.msrb.mxu0 %v2544_v59 }
  0x34   :  { %443 = vmatpush.msrb.mxu2 %v2556_v61  ;;  %463 = vmatpush.msrb.mxu3 %v2561_v62 }
  0x35   :  { %960 = vmatpush.msrb.mxu1 %v2549_v60  ;;  %775 = vmatpush.msrb.mxu0 %v2556_v61 }
  0x36   :  { %444 = vmatpush.msrb.mxu2 %v2572_v3  ;;  %464 = vmatpush.msrb.mxu3 %v2577_v4 }
  0x37   :  { %961 = vmatpush.msrb.mxu1 %v2561_v62  ;;  %776 = vmatpush.msrb.mxu0 %v2572_v3 }
  0x39   :  { %962 = vmatpush.msrb.mxu1 %v2577_v4 }
  0x64   :  { %v158_v6 = vpop.permute.xlu2 %157 }
  0x65   :  { %vm172_vm7 = vcmp.eq.s32.totalorder %v158_v6, %v2464_v43 }
  0x6c   :  { %v161_v7 = vpop.permute.xlu2 %160 }
  0x6d   :  { %vm173_vm8 = vcmp.eq.s32.totalorder %v161_v7, %v2464_v43 }
  0x74   :  { %v167_v9 = vpop.permute.xlu2 %166 }
  0x75   :  { %vm175_vm10 = vcmp.eq.s32.totalorder %v167_v9, %v2464_v43 }
  0x7a   :  { %v146_v44 = vpop.permute.xlu0 %145  ;;  %v152_v45 = vpop.permute.xlu1 %151 }
  0x7b   :  { %vm168_vm0 = vcmp.eq.s32.totalorder %v146_v44, %v2464_v43  ;;  %vm170_vm2 = vcmp.eq.s32.totalorder %v152_v45, %v2464_v43 }
  0x7c   :  { %2022 = vmatmul.msk.f32.vlgmr.msra.gmra.mxu0 %vm168_vm0, %v2252_v46  ;;  %2030 = vmatmul.msk.f32.vlgmr.msra.gmra.mxu1 %vm168_vm0, %v2252_v46 }
  0x7d   :  { %935 = vmatpush.msra.mxu0 %v2472_v47 }
  0x7f   :  { %936 = vmatpush.msra.mxu0 %v2487_v50 }
  0x81   :  { %937 = vmatpush.msra.mxu0 %v2499_v53 }
  0x82   :  { %v149_v49 = vpop.permute.xlu0 %148  ;;  %v155_v52 = vpop.permute.xlu1 %154 }
  0x83   :  { %vm169_vm1 = vcmp.eq.s32.totalorder %v149_v49, %v2464_v43  ;;  %vm171_vm6 = vcmp.eq.s32.totalorder %v155_v52, %v2464_v43  ;;  %938 = vmatpush.msra.mxu0 %v2511_v55 }
  0x84   :  { %2023 = vmatmul.msk.f32.gmra.mxu0 %vm169_vm1, %v2252_v46  ;;  %2031 = vmatmul.msk.f32.gmra.mxu1 %vm169_vm1, %v2252_v46 }
  0x85   :  { %939 = vmatpush.msra.mxu0 %v2525_v57 }
  0x87   :  { %940 = vmatpush.msra.mxu0 %v2544_v59 }
  0x89   :  { %941 = vmatpush.msra.mxu0 %v2556_v61 }
  0x8a   :  { %v336_v0 = vpop.permute.xlu1 %335  ;;  %v164_v8 = vpop.permute.xlu0 %163 }
  0x8b   :  { %v339_v1 = vsel %vm338_vm3, %v332_v63, %v336_v0  ;;  %vm174_vm9 = vcmp.eq.s32.totalorder %v164_v8, %v2464_v43  ;;  %942 = vmatpush.msra.mxu0 %v2572_v3 }
  0x8c   :  { %2024 = vmatmul.msk.f32.gmra.mxu0 %vm170_vm2, %v2252_v46  ;;  %2032 = vmatmul.msk.f32.gmra.mxu1 %vm170_vm2, %v2252_v46  ;;  %v2584_v5 = vsel %vm340_vm4, %v339_v1, 0.0 }
  0x8d   :  { %2038 = vmatmul.msk.f32.vlgmr.msra.gmra.mxu2 %vm342_vm5, %v2584_v5  ;;  %2039 = vmatmul.msk.f32.vlgmr.msra.gmra.mxu3 %vm342_vm5, %v2584_v5 }
  0x8e   :  { %520 = vmatpush.msra.mxu2 %v2472_v47  ;;  %540 = vmatpush.msra.mxu3 %v2477_v48 }
  0x90   :  { %521 = vmatpush.msra.mxu2 %v2487_v50  ;;  %541 = vmatpush.msra.mxu3 %v2492_v51 }
  0x92   :  { %522 = vmatpush.msra.mxu2 %v2499_v53  ;;  %542 = vmatpush.msra.mxu3 %v2504_v54 }
  0x94   :  { %2025 = vmatmul.msk.f32.gmra.mxu0 %vm171_vm6, %v2252_v46  ;;  %2033 = vmatmul.msk.f32.gmra.mxu1 %vm171_vm6, %v2252_v46 }
  0x95   :  { %523 = vmatpush.msra.mxu2 %v2511_v55  ;;  %543 = vmatpush.msra.mxu3 %v2516_v56 }
  0x97   :  { %524 = vmatpush.msra.mxu2 %v2525_v57  ;;  %544 = vmatpush.msra.mxu3 %v2530_v58 }
  0x99   :  { %525 = vmatpush.msra.mxu2 %v2544_v59  ;;  %545 = vmatpush.msra.mxu3 %v2549_v60 }
  0x9b   :  { %526 = vmatpush.msra.mxu2 %v2556_v61  ;;  %546 = vmatpush.msra.mxu3 %v2561_v62 }
  0x9c   :  { %2026 = vmatmul.msk.f32.gmra.mxu0 %vm172_vm7, %v2252_v46  ;;  %2034 = vmatmul.msk.f32.gmra.mxu1 %vm172_vm7, %v2252_v46 }
  0x9d   :  { %527 = vmatpush.msra.mxu2 %v2572_v3  ;;  %547 = vmatpush.msra.mxu3 %v2577_v4 }
  0xa4   :  { %2027 = vmatmul.msk.f32.gmra.mxu0 %vm173_vm8, %v2252_v46  ;;  %2035 = vmatmul.msk.f32.gmra.mxu1 %vm173_vm8, %v2252_v46 }
  0xac   :  { %2028 = vmatmul.msk.f32.gmra.mxu0 %vm174_vm9, %v2252_v46  ;;  %2036 = vmatmul.msk.f32.gmra.mxu1 %vm174_vm9, %v2252_v46 }
  0xb4   :  { %2029 = vmatmul.msk.f32.gmra.mxu0 %vm175_vm10, %v2252_v46  ;;  %2037 = vmatmul.msk.f32.gmra.mxu1 %vm175_vm10, %v2252_v46 }
  0xf9   :  { %v247_v10 = vpop.f32.mrf.mxu0  ;;  %v288_v11 = vpop.f32.mrf.mxu1 }
  0xfa   :  { %v2725_v12 = vadd.f32 %v247_v10, %v226_v13 }
 0x101   :  { %v250_v15 = vpop.f32.mrf.mxu0  ;;  %v291_v16 = vpop.f32.mrf.mxu1 }
 0x102   :  { %v2656_v17 = vadd.f32 %v250_v15, %v226_v13  ;;  %v292_v18 = vadd.f32 %v291_v16, %v227_v14  ;;  %v289_v15 = vadd.f32 %v288_v11, %v227_v14 }
 0x109   :  { %v253_v19 = vpop.f32.mrf.mxu0  ;;  %v294_v20 = vpop.f32.mrf.mxu1 }
 0x10a   :  { %v2658_v21 = vadd.f32 %v253_v19, %v226_v13  ;;  %v295_v22 = vadd.f32 %v294_v20, %v227_v14 }
 0x111   :  { %v256_v23 = vpop.f32.mrf.mxu0  ;;  %v297_v24 = vpop.f32.mrf.mxu1 }
 0x112   :  { %v2660_v25 = vadd.f32 %v256_v23, %v226_v13  ;;  %v298_v26 = vadd.f32 %v297_v24, %v227_v14 }
 0x119   :  { %v259_v27 = vpop.f32.mrf.mxu0  ;;  %v300_v28 = vpop.f32.mrf.mxu1 }
 0x11a   :  { %v2671_v30 = vadd.f32 %v259_v27, %v226_v13  ;;  %v301_v31 = vadd.f32 %v300_v28, %v227_v14 }
 0x11c   :  { %v2675_v32 = vsel %vm53_vm14, %v298_v26, %v301_v31  ;;  %v2679_v33 = vsel %vm53_vm14, %v301_v31, %v298_v26  ;;  %v635_v34 = vsel %vm2667_vm15, %v2660_v25, %v2671_v30  ;;  %v718_v35 = vsel %vm2667_vm15, %v2671_v30, %v2660_v25  ;;  %v2744_v31 = vld [vmem:[%s3679_s6] ss:$0 sm:$0xff]  ;;  %s2253_s6 = smov 64  }
 0x121   :  { %v262_v36 = vpop.f32.mrf.mxu0  ;;  %v303_v37 = vpop.f32.mrf.mxu1 }
 0x122   :  { %v2689_v38 = vadd.f32 %v262_v36, %v226_v13  ;;  %v304_v39 = vadd.f32 %v303_v37, %v227_v14 }
 0x124   :  { %v2693_v40 = vsel %vm53_vm14, %v295_v22, %v304_v39  ;;  %v2697_v41 = vsel %vm53_vm14, %v304_v39, %v295_v22  ;;  %v552_v44 = vsel %vm2667_vm15, %v2658_v21, %v2689_v38  ;;  %v801_v45 = vsel %vm2667_vm15, %v2689_v38, %v2658_v21  ;;  %v383_v39 = vpop.f32.mrf.mxu3 }
 0x129   :  { %v265_v46 = vpop.f32.mrf.mxu0  ;;  %v306_v49 = vpop.f32.mrf.mxu1 }
 0x12a   :  { %v2707_v52 = vadd.f32 %v265_v46, %v226_v13  ;;  %v307_v63 = vadd.f32 %v306_v49, %v227_v14 }
 0x12c   :  { %v2711_v0 = vsel %vm53_vm14, %v292_v18, %v307_v63  ;;  %v2715_v1 = vsel %vm53_vm14, %v307_v63, %v292_v18  ;;  %v469_v6 = vsel %vm2667_vm15, %v2656_v17, %v2707_v52  ;;  %v884_v7 = vsel %vm2667_vm15, %v2707_v52, %v2656_v17  ;;  %v363_v18 = vpop.f32.mrf.mxu2 }
 0x131   :  { %v268_v8 = vpop.f32.mrf.mxu0  ;;  %v309_v9 = vpop.f32.mrf.mxu1 }
 0x132   :  { %v2727_v16 = vadd.f32 %v268_v8, %v226_v13  ;;  %v310_v19 = vadd.f32 %v309_v9, %v227_v14  ;;  %v408_v8 = vadd.f32 %v2744_v31, %v383_v39 }
 0x134   :  { %v2731_v20 = vsel %vm53_vm14, %v310_v19, %v289_v15  ;;  %v386_v22 = vsel %vm2667_vm15, %v2725_v12, %v2727_v16  ;;  %v967_v10 = vsel %vm2667_vm15, %v2727_v16, %v2725_v12 }
 0x135   :  { %v387_v23 = vadd.f32 %v386_v22, %v363_v18  ;;  %v407_v22 = vsel %vm53_vm14, %v289_v15, %v310_v19  ;;  %v2254_v15 = vmov 7  }
 0x136   :  { %v54_v19 = vsel %vm53_vm14, 0, %v2254_v15 }
 0x137   :  { %v2040_v11 = vmul.f32 -1.442695, %v387_v23 }
 0x139   :  { %2139 = vpow2.f32 %v2040_v11 }
 0x13f   :  { %v2140_v13 = vpop.eup %2139 }
 0x140   :  { %v391_v14 = vadd.f32 1.0, %v2140_v13 }
 0x142   :  { %2141 = vrcp.f32 %v391_v14  ;;  %v403_v28 = vand.u32 2147483648, %v391_v14  ;;  %v401_v37 = vand.u32 2147483647, %v391_v14  ;;  %vm397_vm1 = vweird.f32 %v391_v14 }
 0x144   :  { %v404_v49 = vor.u32 1.1754944e-38, %v403_v28  ;;  %vm402_vm6 = vcmp.eq.f32.partialorder %v401_v37, 8.507059e+37  ;;  %v2759_v28 = vstv %s2005_s20 }
 0x145   :  { %vm84_vm10 = vcmp.lt.s32.totalorder %v54_v19, %v2759_v28 }
 0x148   :  { %v2142_v24 = vpop.eup %2141 }
 0x149   :  { %v393_v26 = vmul.f32 %v2142_v24, %v391_v14  ;;  %vm398_vm0 = vweird.f32 %v2142_v24 }
 0x14a   :  { %vm399_vm2 = vmor %vm397_vm1, %vm398_vm0 }
 0x14b   :  { %v394_v27 = vsub.f32 1.0, %v393_v26 }
 0x14d   :  { %v395_v36 = vmul.f32 %v2142_v24, %v394_v27  ;;  %v2755_v27 = vstv %s63_s19 }
 0x14e   :  { %vm65_vm8 = vcmp.lt.s32.totalorder %v54_v19, %v2755_v27 }
 0x14f   :  { %v396_v46 = vadd.f32 %v2142_v24, %v395_v36 }
 0x151   :  { %v400_v63 = vsel %vm399_vm2, %v2142_v24, %v396_v46  ;;  %v2753_v24 = vshrl.u32 %v49_v42, 7  ;;  %v2255_v42 = vmov 0.0  }
 0x152   :  { %v405_v9 = vsel %vm402_vm6, %v404_v49, %v400_v63 }
 0x153   :  { %v409_v18 = vmul.f32 %v408_v8, %v405_v9  ;;  %vm62_vm7 = vcmp.eq.s32.totalorder %v2753_v24, 0  ;;  %vm81_vm9 = vcmp.eq.s32.totalorder %v2753_v24, 1  ;;  %v3238_v24 = vld [vmem:[%s3682_s9 + $0x38] sm:$0xff] }
 0x154   :  { %vm73_vm11 = vmand %vm62_vm7, %vm65_vm8 }
 0x155   :  { %v410_v23 = vadd.f32 %v409_v18, %v407_v22  ;;  %vm92_vm12 = vmand %vm81_vm9, %vm84_vm10 }
 0x156   :  { %vm100_vm13 = vmor %vm73_vm11, %vm92_vm12 }
 0x157   :  { %2143 = vtanh.f32 %v410_v23  ;;  %v2770_v36 = vsel %vm100_vm13, 1.0, %v2255_v42 }
 0x158   :  { %v3687_v37 = vsub.f32 1.0, %v2770_v36 }
 0x15a   :  { %v424_v63 = vmul.f32 %v2584_v5, %v3687_v37 }
 0x15d   :  { %v2144_v11 = vpop.eup %2143 }
 0x15e   :  { %v412_v13 = vsub.f32 %v2584_v5, %v2144_v11 }
 0x160   :  { %414 = vrot.lane.b32.xlu0 %v412_v13, %s2253_s6 }
 0x1d2   :  { %v415_v14 = vpop.permute.xlu0 %414 }
 0x1d3   :  { %v417_v26 = vmul.f32 %v415_v14, %v405_v9 }
 0x1d5   :  { %419 = vrot.lane.b32.xlu1 %v417_v26, %s2253_s6 }
 0x247   :  { %v420_v39 = vpop.permute.xlu1 %419 }
 0x248   :  { %v422_v46 = vadd.f32 %v2144_v11, %v420_v39 }
 0x24a   :  { %v2774_v49 = vmul.f32 %v2770_v36, %v422_v46 }
 0x24c   :  { %v425_v8 = vadd.f32 %v424_v63, %v2774_v49 }
 0x24e   :  { %2041 = vmatmul.msk.f32.vlgmr.msrb.gmra.mxu2 %vm342_vm5, %v425_v8  ;;  %2042 = vmatmul.msk.f32.vlgmr.msrb.gmra.mxu3 %vm342_vm5, %v425_v8 }
 0x24f   :  { %603 = vmatpush.msrb.mxu2 %v2472_v47  ;;  %623 = vmatpush.msrb.mxu3 %v2477_v48 }
 0x251   :  { %604 = vmatpush.msrb.mxu2 %v2487_v50  ;;  %624 = vmatpush.msrb.mxu3 %v2492_v51 }
 0x253   :  { %605 = vmatpush.msrb.mxu2 %v2499_v53  ;;  %625 = vmatpush.msrb.mxu3 %v2504_v54 }
 0x255   :  { %606 = vmatpush.msrb.mxu2 %v2511_v55  ;;  %626 = vmatpush.msrb.mxu3 %v2516_v56 }
 0x257   :  { %607 = vmatpush.msrb.mxu2 %v2525_v57  ;;  %627 = vmatpush.msrb.mxu3 %v2530_v58 }
 0x259   :  { %608 = vmatpush.msrb.mxu2 %v2544_v59  ;;  %628 = vmatpush.msrb.mxu3 %v2549_v60 }
 0x25b   :  { %609 = vmatpush.msrb.mxu2 %v2556_v61  ;;  %629 = vmatpush.msrb.mxu3 %v2561_v62 }
 0x25d   :  { %610 = vmatpush.msrb.mxu2 %v2572_v3  ;;  %630 = vmatpush.msrb.mxu3 %v2577_v4 }
 0x2d1   :  { %v446_v5 = vpop.f32.mrf.mxu2  ;;  %v466_v39 = vpop.f32.mrf.mxu3 }
 0x2d2   :  { %v470_v9 = vadd.f32 %v469_v6, %v446_v5  ;;  %v491_v6 = vadd.f32 %v2744_v31, %v466_v39 }
 0x2d4   :  { %v2043_v18 = vmul.f32 -1.442695, %v470_v9 }
 0x2d6   :  { %2145 = vpow2.f32 %v2043_v18 }
 0x2dc   :  { %v2146_v22 = vpop.eup %2145 }
 0x2dd   :  { %v474_v23 = vadd.f32 1.0, %v2146_v22 }
 0x2df   :  { %2147 = vrcp.f32 %v474_v23  ;;  %v486_v26 = vand.u32 2147483648, %v474_v23  ;;  %v484_v19 = vand.u32 2147483647, %v474_v23  ;;  %vm480_vm1 = vweird.f32 %v474_v23 }
 0x2e1   :  { %v487_v63 = vor.u32 1.1754944e-38, %v486_v26  ;;  %vm485_vm6 = vcmp.eq.f32.partialorder %v484_v19, 8.507059e+37 }
 0x2e5   :  { %v2148_v11 = vpop.eup %2147 }
 0x2e6   :  { %v476_v13 = vmul.f32 %v2148_v11, %v474_v23  ;;  %vm481_vm0 = vweird.f32 %v2148_v11  ;;  %v2256_v23 = vmov 6  }
 0x2e7   :  { %vm482_vm2 = vmor %vm480_vm1, %vm481_vm0 }
 0x2e8   :  { %v477_v14 = vsub.f32 1.0, %v476_v13 }
 0x2ea   :  { %v478_v15 = vmul.f32 %v2148_v11, %v477_v14 }
 0x2ec   :  { %v479_v46 = vadd.f32 %v2148_v11, %v478_v15 }
 0x2ee   :  { %v483_v37 = vsel %vm482_vm2, %v2148_v11, %v479_v46  ;;  %v55_v11 = vsel %vm53_vm14, 1, %v2256_v23 }
 0x2ef   :  { %v488_v5 = vsel %vm485_vm6, %v487_v63, %v483_v37  ;;  %vm66_vm8 = vcmp.lt.s32.totalorder %v55_v11, %v2755_v27  ;;  %vm85_vm10 = vcmp.lt.s32.totalorder %v55_v11, %v2759_v28 }
 0x2f0   :  { %v492_v9 = vmul.f32 %v491_v6, %v488_v5  ;;  %vm74_vm11 = vmand %vm62_vm7, %vm66_vm8 }
 0x2f1   :  { %vm93_vm12 = vmand %vm81_vm9, %vm85_vm10 }
 0x2f2   :  { %v493_v18 = vadd.f32 %v492_v9, %v2711_v0  ;;  %vm101_vm13 = vmor %vm74_vm11, %vm93_vm12 }
 0x2f3   :  { %v2816_v0 = vsel %vm101_vm13, 1.0, %v2255_v42 }
 0x2f4   :  { %2149 = vtanh.f32 %v493_v18 }
 0x2fa   :  { %v2150_v22 = vpop.eup %2149 }
 0x2fb   :  { %v495_v13 = vsub.f32 %v425_v8, %v2150_v22 }
 0x2fd   :  { %497 = vrot.lane.b32.xlu2 %v495_v13, %s2253_s6 }
 0x357   :  { %v498_v14 = vpop.permute.xlu2 %497 }
 0x358   :  { %v500_v2 = vmul.f32 %v498_v14, %v488_v5 }
 0x35a   :  { %502 = vrot.lane.b32.xlu0 %v500_v2, %s2253_s6  ;;  %v3689_v2 = vsub.f32 1.0, %v2816_v0 }
 0x35c   :  { %v507_v15 = vmul.f32 %v425_v8, %v3689_v2 }
 0x3cc   :  { %v503_v37 = vpop.permute.xlu0 %502 }
 0x3cd   :  { %v505_v26 = vadd.f32 %v2150_v22, %v503_v37 }
 0x3cf   :  { %v2822_v19 = vmul.f32 %v2816_v0, %v505_v26 }
 0x3d1   :  { %v508_v39 = vadd.f32 %v507_v15, %v2822_v19 }
 0x3d3   :  { %2044 = vmatmul.msk.f32.vlgmr.msra.gmra.mxu2 %vm342_vm5, %v508_v39  ;;  %2045 = vmatmul.msk.f32.vlgmr.msra.gmra.mxu3 %vm342_vm5, %v508_v39 }
 0x3d4   :  { %686 = vmatpush.msra.mxu2 %v2472_v47  ;;  %706 = vmatpush.msra.mxu3 %v2477_v48 }
 0x3d6   :  { %687 = vmatpush.msra.mxu2 %v2487_v50  ;;  %707 = vmatpush.msra.mxu3 %v2492_v51 }
 0x3d8   :  { %688 = vmatpush.msra.mxu2 %v2499_v53  ;;  %708 = vmatpush.msra.mxu3 %v2504_v54 }
 0x3da   :  { %689 = vmatpush.msra.mxu2 %v2511_v55  ;;  %709 = vmatpush.msra.mxu3 %v2516_v56 }
 0x3dc   :  { %690 = vmatpush.msra.mxu2 %v2525_v57  ;;  %710 = vmatpush.msra.mxu3 %v2530_v58 }
 0x3de   :  { %691 = vmatpush.msra.mxu2 %v2544_v59  ;;  %711 = vmatpush.msra.mxu3 %v2549_v60 }
 0x3e0   :  { %692 = vmatpush.msra.mxu2 %v2556_v61  ;;  %712 = vmatpush.msra.mxu3 %v2561_v62 }
 0x3e2   :  { %693 = vmatpush.msra.mxu2 %v2572_v3  ;;  %713 = vmatpush.msra.mxu3 %v2577_v4 }
 0x456   :  { %v529_v8 = vpop.f32.mrf.mxu2  ;;  %v549_v11 = vpop.f32.mrf.mxu3 }
 0x457   :  { %v553_v46 = vadd.f32 %v552_v44, %v529_v8  ;;  %v574_v44 = vadd.f32 %v2744_v31, %v549_v11 }
 0x459   :  { %v2046_v63 = vmul.f32 -1.442695, %v553_v46 }
 0x45b   :  { %2151 = vpow2.f32 %v2046_v63 }
 0x461   :  { %v2152_v6 = vpop.eup %2151 }
 0x462   :  { %v557_v5 = vadd.f32 1.0, %v2152_v6 }
 0x464   :  { %2153 = vrcp.f32 %v557_v5  ;;  %v569_v13 = vand.u32 2147483648, %v557_v5  ;;  %v567_v23 = vand.u32 2147483647, %v557_v5  ;;  %vm563_vm1 = vweird.f32 %v557_v5 }
 0x466   :  { %v570_v26 = vor.u32 1.1754944e-38, %v569_v13  ;;  %vm568_vm6 = vcmp.eq.f32.partialorder %v567_v23, 8.507059e+37 }
 0x46a   :  { %v2154_v9 = vpop.eup %2153 }
 0x46b   :  { %v559_v18 = vmul.f32 %v2154_v9, %v557_v5  ;;  %vm564_vm0 = vweird.f32 %v2154_v9  ;;  %v2257_v5 = vmov 5  }
 0x46c   :  { %vm565_vm2 = vmor %vm563_vm1, %vm564_vm0 }
 0x46d   :  { %v560_v22 = vsub.f32 1.0, %v559_v18 }
 0x46f   :  { %v561_v14 = vmul.f32 %v2154_v9, %v560_v22 }
 0x471   :  { %v562_v37 = vadd.f32 %v2154_v9, %v561_v14 }
 0x473   :  { %v566_v15 = vsel %vm565_vm2, %v2154_v9, %v562_v37  ;;  %v56_v9 = vsel %vm53_vm14, 2, %v2257_v5 }
 0x474   :  { %v571_v8 = vsel %vm568_vm6, %v570_v26, %v566_v15  ;;  %vm67_vm8 = vcmp.lt.s32.totalorder %v56_v9, %v2755_v27  ;;  %vm86_vm10 = vcmp.lt.s32.totalorder %v56_v9, %v2759_v28 }
 0x475   :  { %v575_v46 = vmul.f32 %v574_v44, %v571_v8  ;;  %vm75_vm11 = vmand %vm62_vm7, %vm67_vm8 }
 0x476   :  { %vm94_vm12 = vmand %vm81_vm9, %vm86_vm10 }
 0x477   :  { %v576_v63 = vadd.f32 %v575_v46, %v2693_v40  ;;  %vm102_vm13 = vmor %vm75_vm11, %vm94_vm12 }
 0x478   :  { %v2861_v40 = vsel %vm102_vm13, 1.0, %v2255_v42 }
 0x479   :  { %2155 = vtanh.f32 %v576_v63 }
 0x47f   :  { %v2156_v6 = vpop.eup %2155 }
 0x480   :  { %v578_v18 = vsub.f32 %v508_v39, %v2156_v6 }
 0x482   :  { %580 = vrot.lane.b32.xlu1 %v578_v18, %s2253_s6 }
 0x4f4   :  { %v581_v22 = vpop.permute.xlu1 %580 }
 0x4f5   :  { %v583_v2 = vmul.f32 %v581_v22, %v571_v8 }
 0x4f7   :  { %585 = vrot.lane.b32.xlu2 %v583_v2, %s2253_s6  ;;  %v126_v2 = vsub.f32 1.0, %v2861_v40 }
 0x4f9   :  { %v590_v23 = vmul.f32 %v508_v39, %v126_v2 }
 0x551   :  { %v586_v13 = vpop.permute.xlu2 %585 }
 0x552   :  { %v588_v14 = vadd.f32 %v2156_v6, %v586_v13 }
 0x554   :  { %v2867_v11 = vmul.f32 %v2861_v40, %v588_v14 }
 0x556   :  { %v591_v37 = vadd.f32 %v590_v23, %v2867_v11  ;;  %v2258_v23 = vmov 4  }
 0x558   :  { %2047 = vmatmul.msk.f32.vlgmr.msrb.gmra.mxu2 %vm342_vm5, %v591_v37  ;;  %2048 = vmatmul.msk.f32.vlgmr.msrb.gmra.mxu3 %vm342_vm5, %v591_v37 }
 0x559   :  { %789 = vmatpush.msrb.mxu3 %v2477_v48  ;;  %852 = vmatpush.msrb.mxu2 %v2472_v47 }
 0x55b   :  { %790 = vmatpush.msrb.mxu3 %v2492_v51  ;;  %853 = vmatpush.msrb.mxu2 %v2487_v50 }
 0x55d   :  { %791 = vmatpush.msrb.mxu3 %v2504_v54  ;;  %854 = vmatpush.msrb.mxu2 %v2499_v53 }
 0x55f   :  { %792 = vmatpush.msrb.mxu3 %v2516_v56  ;;  %855 = vmatpush.msrb.mxu2 %v2511_v55 }
 0x561   :  { %793 = vmatpush.msrb.mxu3 %v2530_v58  ;;  %856 = vmatpush.msrb.mxu2 %v2525_v57 }
 0x563   :  { %794 = vmatpush.msrb.mxu3 %v2549_v60  ;;  %857 = vmatpush.msrb.mxu2 %v2544_v59 }
 0x565   :  { %795 = vmatpush.msrb.mxu3 %v2561_v62  ;;  %858 = vmatpush.msrb.mxu2 %v2556_v61 }
 0x567   :  { %796 = vmatpush.msrb.mxu3 %v2577_v4  ;;  %859 = vmatpush.msrb.mxu2 %v2572_v3 }
 0x5db   :  { %v612_v47 = vpop.f32.mrf.mxu2  ;;  %v632_v3 = vpop.f32.mrf.mxu3 }
 0x5dc   :  { %v636_v50 = vadd.f32 %v635_v34, %v612_v47  ;;  %v657_v34 = vadd.f32 %v2744_v31, %v632_v3  ;;  %v57_v47 = vsel %vm53_vm14, 3, %v2258_v23 }
 0x5dd   :  { %vm68_vm8 = vcmp.lt.s32.totalorder %v57_v47, %v2755_v27  ;;  %vm87_vm10 = vcmp.lt.s32.totalorder %v57_v47, %v2759_v28 }
 0x5de   :  { %v2049_v53 = vmul.f32 -1.442695, %v636_v50  ;;  %vm76_vm11 = vmand %vm62_vm7, %vm68_vm8 }
 0x5df   :  { %vm95_vm12 = vmand %vm81_vm9, %vm87_vm10 }
 0x5e0   :  { %2157 = vpow2.f32 %v2049_v53  ;;  %vm103_vm13 = vmor %vm76_vm11, %vm95_vm12 }
 0x5e6   :  { %v2158_v55 = vpop.eup %2157 }
 0x5e7   :  { %v640_v57 = vadd.f32 1.0, %v2158_v55 }
 0x5e9   :  { %2159 = vrcp.f32 %v640_v57  ;;  %v652_v61 = vand.u32 2147483648, %v640_v57  ;;  %v650_v44 = vand.u32 2147483647, %v640_v57  ;;  %vm646_vm1 = vweird.f32 %v640_v57 }
 0x5eb   :  { %v653_v46 = vor.u32 1.1754944e-38, %v652_v61  ;;  %vm651_vm6 = vcmp.eq.f32.partialorder %v650_v44, 8.507059e+37 }
 0x5ef   :  { %v2160_v59 = vpop.eup %2159 }
 0x5f0   :  { %v642_v39 = vmul.f32 %v2160_v59, %v640_v57  ;;  %vm647_vm0 = vweird.f32 %v2160_v59 }
 0x5f1   :  { %vm648_vm2 = vmor %vm646_vm1, %vm647_vm0 }
 0x5f2   :  { %v643_v26 = vsub.f32 1.0, %v642_v39 }
 0x5f4   :  { %v644_v15 = vmul.f32 %v2160_v59, %v643_v26 }
 0x5f6   :  { %v645_v8 = vadd.f32 %v2160_v59, %v644_v15 }
 0x5f8   :  { %v649_v63 = vsel %vm648_vm2, %v2160_v59, %v645_v8 }
 0x5f9   :  { %v654_v6 = vsel %vm651_vm6, %v653_v46, %v649_v63 }
 0x5fa   :  { %v658_v18 = vmul.f32 %v657_v34, %v654_v6 }
 0x5fc   :  { %v659_v22 = vadd.f32 %v658_v18, %v2675_v32  ;;  %v2906_v32 = vsel %vm103_vm13, 1.0, %v2255_v42 }
 0x5fd   :  { %v3693_v50 = vsub.f32 1.0, %v2906_v32 }
 0x5fe   :  { %2161 = vtanh.f32 %v659_v22  ;;  %v2259_v22 = vmov 3  }
 0x5ff   :  { %v673_v57 = vmul.f32 %v591_v37, %v3693_v50 }
 0x604   :  { %v2162_v5 = vpop.eup %2161 }
 0x605   :  { %v661_v9 = vsub.f32 %v591_v37, %v2162_v5 }
 0x607   :  { %663 = vrot.lane.b32.xlu0 %v661_v9, %s2253_s6 }
 0x679   :  { %v664_v13 = vpop.permute.xlu0 %663 }
 0x67a   :  { %v666_v14 = vmul.f32 %v664_v13, %v654_v6 }
 0x67c   :  { %668 = vrot.lane.b32.xlu1 %v666_v14, %s2253_s6 }
 0x6ee   :  { %v669_v53 = vpop.permute.xlu1 %668 }
 0x6ef   :  { %v671_v55 = vadd.f32 %v2162_v5, %v669_v53  ;;  %v58_v5 = vsel %vm53_vm14, 4, %v2259_v22  ;;  %v1015_v22 = vld [vmem:[%s3680_s7] sm:$0xff] }
 0x6f0   :  { %vm69_vm8 = vcmp.lt.s32.totalorder %v58_v5, %v2755_v27  ;;  %vm88_vm10 = vcmp.lt.s32.totalorder %v58_v5, %v2759_v28  ;;  %v2260_v5 = vmov 2  }
 0x6f1   :  { %v2912_v59 = vmul.f32 %v2906_v32, %v671_v55  ;;  %vm77_vm11 = vmand %vm62_vm7, %vm69_vm8 }
 0x6f2   :  { %vm96_vm12 = vmand %vm81_vm9, %vm88_vm10 }
 0x6f3   :  { %v674_v39 = vadd.f32 %v673_v57, %v2912_v59  ;;  %vm104_vm13 = vmor %vm77_vm11, %vm96_vm12 }
 0x6f5   :  { %2050 = vmatmul.msk.f32.vlgmr.msra.gmra.mxu2 %vm342_vm5, %v674_v39  ;;  %2051 = vmatmul.msk.f32.vlgmr.msra.gmra.mxu3 %vm342_vm5, %v674_v39 }
 0x6f6   :  { %872 = vmatpush.msra.mxu3 %v2477_v48 }
 0x6f8   :  { %873 = vmatpush.msra.mxu3 %v2492_v51 }
 0x6fa   :  { %874 = vmatpush.msra.mxu3 %v2504_v54 }
 0x6fc   :  { %875 = vmatpush.msra.mxu3 %v2516_v56 }
 0x6fe   :  { %876 = vmatpush.msra.mxu3 %v2530_v58 }
 0x700   :  { %877 = vmatpush.msra.mxu3 %v2549_v60 }
 0x702   :  { %878 = vmatpush.msra.mxu3 %v2561_v62 }
 0x704   :  { %879 = vmatpush.msra.mxu3 %v2577_v4 }
 0x778   :  { %v695_v37 = vpop.f32.mrf.mxu2  ;;  %v715_v4 = vpop.f32.mrf.mxu3 }
 0x779   :  { %v719_v48 = vadd.f32 %v718_v35, %v695_v37  ;;  %v740_v25 = vadd.f32 %v2744_v31, %v715_v4 }
 0x77b   :  { %v2052_v51 = vmul.f32 -1.442695, %v719_v48 }
 0x77d   :  { %2163 = vpow2.f32 %v2052_v51 }
 0x783   :  { %v2164_v54 = vpop.eup %2163 }
 0x784   :  { %v723_v26 = vadd.f32 1.0, %v2164_v54 }
 0x786   :  { %2165 = vrcp.f32 %v723_v26  ;;  %v735_v60 = vand.u32 2147483648, %v723_v26  ;;  %v733_v62 = vand.u32 2147483647, %v723_v26  ;;  %vm729_vm1 = vweird.f32 %v723_v26 }
 0x788   :  { %v736_v3 = vor.u32 1.1754944e-38, %v735_v60  ;;  %vm734_vm6 = vcmp.eq.f32.partialorder %v733_v62, 8.507059e+37 }
 0x78c   :  { %v2166_v56 = vpop.eup %2165 }
 0x78d   :  { %v725_v58 = vmul.f32 %v2166_v56, %v723_v26  ;;  %vm730_vm0 = vweird.f32 %v2166_v56 }
 0x78e   :  { %vm731_vm2 = vmor %vm729_vm1, %vm730_vm0 }
 0x78f   :  { %v726_v61 = vsub.f32 1.0, %v725_v58 }
 0x791   :  { %v727_v15 = vmul.f32 %v2166_v56, %v726_v61 }
 0x793   :  { %v728_v44 = vadd.f32 %v2166_v56, %v727_v15 }
 0x795   :  { %v732_v8 = vsel %vm731_vm2, %v2166_v56, %v728_v44 }
 0x796   :  { %v737_v30 = vsel %vm734_vm6, %v736_v3, %v732_v8 }
 0x797   :  { %v741_v35 = vmul.f32 %v740_v25, %v737_v30  ;;  %v1029_v25 = vld [vmem:[%s3680_s7 + $0x70] sm:$0xff] }
 0x798   :  { %2112 = vmatpush.msra.mxu2 %v1029_v25  ;;  %1069 = vmatpush.msra.mxu1 %v1029_v25 }
 0x799   :  { %v742_v46 = vadd.f32 %v741_v35, %v2679_v33  ;;  %v2943_v33 = vsel %vm104_vm13, 1.0, %v2255_v42 }
 0x79a   :  { %v3692_v9 = vsub.f32 1.0, %v2943_v33 }
 0x79b   :  { %2167 = vtanh.f32 %v742_v46  ;;  %v1025_v46 = vld [vmem:[%s3680_s7 + $0x50] sm:$0xff] }
 0x79c   :  { %v756_v23 = vmul.f32 %v674_v39, %v3692_v9 }
 0x7a1   :  { %v2168_v63 = vpop.eup %2167 }
 0x7a2   :  { %v744_v34 = vsub.f32 %v674_v39, %v2168_v63 }
 0x7a4   :  { %746 = vrot.lane.b32.xlu2 %v744_v34, %s2253_s6  ;;  %v1021_v34 = vld [vmem:[%s3680_s7 + $0x30] sm:$0xff] }
 0x7fe   :  { %v747_v6 = vpop.permute.xlu2 %746 }
 0x7ff   :  { %v749_v18 = vmul.f32 %v747_v6, %v737_v30  ;;  %v1019_v6 = vld [vmem:[%s3680_s7 + $0x20] sm:$0xff] }
 0x801   :  { %751 = vrot.lane.b32.xlu0 %v749_v18, %s2253_s6  ;;  %v1017_v18 = vld [vmem:[%s3680_s7 + $0x10] sm:$0xff] }
 0x873   :  { %v752_v13 = vpop.permute.xlu0 %751 }
 0x874   :  { %v754_v14 = vadd.f32 %v2168_v63, %v752_v13  ;;  %v1023_v63 = vld [vmem:[%s3680_s7 + $0x40] sm:$0xff]  ;;  %v59_v13 = vsel %vm53_vm14, 5, %v2260_v5 }
 0x875   :  { %vm70_vm8 = vcmp.lt.s32.totalorder %v59_v13, %v2755_v27  ;;  %vm89_vm10 = vcmp.lt.s32.totalorder %v59_v13, %v2759_v28 }
 0x876   :  { %v2949_v47 = vmul.f32 %v2943_v33, %v754_v14  ;;  %vm78_vm11 = vmand %vm62_vm7, %vm70_vm8 }
 0x877   :  { %vm97_vm12 = vmand %vm81_vm9, %vm89_vm10 }
 0x878   :  { %v2952_v53 = vadd.f32 %v756_v23, %v2949_v47  ;;  %vm105_vm13 = vmor %vm78_vm11, %vm97_vm12 }
 0x879   :  { %v3001_v14 = vsel %vm105_vm13, 1.0, %v2255_v42 }
 0x87a   :  { %2053 = vmatmul.msk.f32.vlgmr.msrb.gmra.mxu0 %vm342_vm5, %v2952_v53  ;;  %2054 = vmatmul.msk.f32.vlgmr.msrb.gmra.mxu3 %vm342_vm5, %v2952_v53  ;;  %v3691_v23 = vsub.f32 1.0, %v3001_v14 }
 0x8f7   :  { %v778_v55 = vpop.f32.mrf.mxu0 }
 0x8f8   :  { %v802_v57 = vadd.f32 %v801_v45, %v778_v55 }
 0x8fa   :  { %v2055_v39 = vmul.f32 -1.442695, %v802_v57 }
 0x8fc   :  { %2169 = vpow2.f32 %v2055_v39  ;;  %v839_v39 = vmul.f32 %v2952_v53, %v3691_v23 }
 0x8fd   :  { %v798_v60 = vpop.f32.mrf.mxu3 }
 0x8fe   :  { %v823_v21 = vadd.f32 %v2744_v31, %v798_v60 }
 0x902   :  { %v2170_v37 = vpop.eup %2169 }
 0x903   :  { %v806_v48 = vadd.f32 1.0, %v2170_v37 }
 0x905   :  { %2171 = vrcp.f32 %v806_v48  ;;  %v818_v56 = vand.u32 2147483648, %v806_v48  ;;  %v816_v61 = vand.u32 2147483647, %v806_v48  ;;  %vm812_vm1 = vweird.f32 %v806_v48 }
 0x907   :  { %v819_v62 = vor.u32 1.1754944e-38, %v818_v56  ;;  %vm817_vm6 = vcmp.eq.f32.partialorder %v816_v61, 8.507059e+37 }
 0x90b   :  { %v2172_v51 = vpop.eup %2171 }
 0x90c   :  { %v808_v54 = vmul.f32 %v2172_v51, %v806_v48  ;;  %vm813_vm0 = vweird.f32 %v2172_v51 }
 0x90d   :  { %vm814_vm2 = vmor %vm812_vm1, %vm813_vm0 }
 0x90e   :  { %v809_v26 = vsub.f32 1.0, %v808_v54 }
 0x910   :  { %v810_v58 = vmul.f32 %v2172_v51, %v809_v26 }
 0x912   :  { %v811_v15 = vadd.f32 %v2172_v51, %v810_v58 }
 0x914   :  { %v815_v4 = vsel %vm814_vm2, %v2172_v51, %v811_v15  ;;  %v3016_v51 = vsel %vm338_vm3, %v2949_v47, %v2912_v59 }
 0x915   :  { %v820_v38 = vsel %vm817_vm6, %v819_v62, %v815_v4 }
 0x916   :  { %v824_v45 = vmul.f32 %v823_v21, %v820_v38 }
 0x918   :  { %v825_v44 = vadd.f32 %v824_v45, %v2697_v41  ;;  %v1027_v41 = vld [vmem:[%s3680_s7 + $0x60] sm:$0xff] }
 0x919   :  { %2113 = vmatpush.msra.mxu2 %v1027_v41  ;;  %1070 = vmatpush.msra.mxu1 %v1027_v41 }
 0x91a   :  { %2173 = vtanh.f32 %v825_v44 }
 0x91b   :  { %2114 = vmatpush.msra.mxu2 %v1025_v46  ;;  %1071 = vmatpush.msra.mxu1 %v1025_v46 }
 0x91d   :  { %2115 = vmatpush.msra.mxu2 %v1023_v63  ;;  %1072 = vmatpush.msra.mxu1 %v1023_v63  ;;  %v2261_v63 = vmov 1  }
 0x91f   :  { %2116 = vmatpush.msra.mxu2 %v1021_v34  ;;  %1073 = vmatpush.msra.mxu1 %v1021_v34  ;;  %v60_v34 = vsel %vm53_vm14, 6, %v2261_v63  ;;  %v1020_v63 = vld [vmem:[%s3680_s7 + $0x28] sm:$0xff] }
 0x920   :  { %v2174_v3 = vpop.eup %2173  ;;  %vm71_vm8 = vcmp.lt.s32.totalorder %v60_v34, %v2755_v27  ;;  %vm90_vm10 = vcmp.lt.s32.totalorder %v60_v34, %v2759_v28  ;;  %v3112_v34 = vld [vmem:[%s3682_s9 + $0x60] sm:$0xff] }
 0x921   :  { %v827_v8 = vsub.f32 %v2952_v53, %v2174_v3  ;;  %2117 = vmatpush.msra.mxu2 %v1019_v6  ;;  %1074 = vmatpush.msra.mxu1 %v1019_v6  ;;  %vm79_vm11 = vmand %vm62_vm7, %vm71_vm8 }
 0x922   :  { %vm98_vm12 = vmand %vm81_vm9, %vm90_vm10 }
 0x923   :  { %829 = vrot.lane.b32.xlu1 %v827_v8, %s2253_s6  ;;  %2118 = vmatpush.msra.mxu2 %v1017_v18  ;;  %vm106_vm13 = vmor %vm79_vm11, %vm98_vm12 }
 0x924   :  { %1075 = vmatpush.msra.mxu1 %v1017_v18 }
 0x925   :  { %2119 = vmatpush.msra.mxu2 %v1015_v22 }
 0x926   :  { %1076 = vmatpush.msra.mxu1 %v1015_v22 }
 0x995   :  { %v830_v30 = vpop.permute.xlu1 %829 }
 0x996   :  { %v832_v35 = vmul.f32 %v830_v30, %v820_v38 }
 0x998   :  { %834 = vrot.lane.b32.xlu2 %v832_v35, %s2253_s6 }
 0x9f2   :  { %v835_v55 = vpop.permute.xlu2 %834 }
 0x9f3   :  { %v837_v57 = vadd.f32 %v2174_v3, %v835_v55 }
 0x9f5   :  { %v3008_v37 = vmul.f32 %v3001_v14, %v837_v57 }
 0x9f7   :  { %v840_v48 = vadd.f32 %v839_v39, %v3008_v37  ;;  %v3023_v53 = vsel %vm338_vm3, %v3008_v37, %v2867_v11 }
 0x9f9   :  { %2056 = vmatmul.msk.f32.vlgmr.msrb.gmra.mxu2 %vm342_vm5, %v840_v48  ;;  %2057 = vmatmul.msk.f32.vlgmr.msra.gmra.mxu3 %vm342_vm5, %v840_v48 }
 0xa01   :  { %2066 = vmatmul.msk.f32.vlgmr.msra.gmra.mxu2 %vm342_vm5, %v3016_v51 }
 0xa09   :  { %2067 = vmatmul.msk.f32.gmra.mxu2 %vm342_vm5, %v3023_v53 }
 0xa7c   :  { %v861_v54 = vpop.f32.mrf.mxu2  ;;  %v881_v45 = vpop.f32.mrf.mxu3 }
 0xa7d   :  { %v885_v26 = vadd.f32 %v884_v7, %v861_v54  ;;  %v906_v17 = vadd.f32 %v2744_v31, %v881_v45 }
 0xa7f   :  { %v2058_v56 = vmul.f32 -1.442695, %v885_v26 }
 0xa81   :  { %2175 = vpow2.f32 %v2058_v56 }
 0xa87   :  { %v2176_v58 = vpop.eup %2175 }
 0xa88   :  { %v889_v61 = vadd.f32 1.0, %v2176_v58 }
 0xa8a   :  { %2177 = vrcp.f32 %v889_v61  ;;  %v901_v4 = vand.u32 2147483648, %v889_v61  ;;  %v899_v38 = vand.u32 2147483647, %v889_v61  ;;  %vm895_vm1 = vweird.f32 %v889_v61 }
 0xa8c   :  { %v902_v3 = vor.u32 1.1754944e-38, %v901_v4  ;;  %vm900_vm6 = vcmp.eq.f32.partialorder %v899_v38, 8.507059e+37 }
 0xa90   :  { %v2178_v60 = vpop.eup %2177 }
 0xa91   :  { %v891_v15 = vmul.f32 %v2178_v60, %v889_v61  ;;  %vm896_vm0 = vweird.f32 %v2178_v60 }
 0xa92   :  { %vm897_vm2 = vmor %vm895_vm1, %vm896_vm0 }
 0xa93   :  { %v892_v62 = vsub.f32 1.0, %v891_v15 }
 0xa95   :  { %v893_v21 = vmul.f32 %v2178_v60, %v892_v62 }
 0xa97   :  { %v894_v44 = vadd.f32 %v2178_v60, %v893_v21 }
 0xa99   :  { %v898_v8 = vsel %vm897_vm2, %v2178_v60, %v894_v44 }
 0xa9a   :  { %v903_v52 = vsel %vm900_vm6, %v902_v3, %v898_v8 }
 0xa9b   :  { %v907_v7 = vmul.f32 %v906_v17, %v903_v52 }
 0xa9d   :  { %v908_v25 = vadd.f32 %v907_v7, %v2715_v1  ;;  %v3045_v1 = vsel %vm106_vm13, 1.0, %v2255_v42  ;;  %v1026_v7 = vld [vmem:[%s3680_s7 + $0x58] sm:$0xff] }
 0xa9e   :  { %v3690_v6 = vsub.f32 1.0, %v3045_v1 }
 0xa9f   :  { %2179 = vtanh.f32 %v908_v25  ;;  %v3095_v25 = vld [vmem:[%s3682_s9 + $0x70] sm:$0xff] }
 0xaa0   :  { %v922_v5 = vmul.f32 %v840_v48, %v3690_v6  ;;  %1182 = vmatpush.msrb.mxu0 %v3095_v25  ;;  %1514 = vmatpush.msrb.mxu2 %v3095_v25 }
 0xaa2   :  { %1183 = vmatpush.msrb.mxu0 %v3112_v34  ;;  %1515 = vmatpush.msrb.mxu2 %v3112_v34 }
 0xaa5   :  { %v2180_v30 = vpop.eup %2179 }
 0xaa6   :  { %v910_v35 = vsub.f32 %v840_v48, %v2180_v30 }
 0xaa8   :  { %912 = vrot.lane.b32.xlu0 %v910_v35, %s2253_s6  ;;  %v1022_v35 = vld [vmem:[%s3680_s7 + $0x38] sm:$0xff] }
 0xb1a   :  { %v913_v41 = vpop.permute.xlu0 %912 }
 0xb1b   :  { %v915_v46 = vmul.f32 %v913_v41, %v903_v52  ;;  %v1164_v52 = vld [vmem:[%s3675_s2 + $0x6] sm:$0x3] }
 0xb1d   :  { %917 = vrot.lane.b32.xlu1 %v915_v46, %s2253_s6 }
 0xb25   :  { %1166 = vrot.lane.b32.xlu1 %v1164_v52, %s2251_s25 }
 0xb8f   :  { %v918_v18 = vpop.permute.xlu1 %917 }
 0xb90   :  { %v920_v22 = vadd.f32 %v2180_v30, %v918_v18  ;;  %v1024_v30 = vld [vmem:[%s3680_s7 + $0x48] sm:$0xff]  ;;  %v1018_v18 = vld [vmem:[%s3680_s7 + $0x18] sm:$0xff] }
 0xb92   :  { %v3051_v13 = vmul.f32 %v3045_v1, %v920_v22  ;;  %v3122_v22 = vld [vmem:[%s3682_s9 + $0x50] sm:$0xff] }
 0xb93   :  { %1184 = vmatpush.msrb.mxu0 %v3122_v22  ;;  %1516 = vmatpush.msrb.mxu2 %v3122_v22 }
 0xb94   :  { %v3054_v55 = vadd.f32 %v922_v5, %v3051_v13  ;;  %v3059_v57 = vsel %vm338_vm3, %v3051_v13, %v2822_v19  ;;  %v1016_v5 = vld [vmem:[%s3680_s7 + $0x8] sm:$0xff] }
 0xb95   :  { %2068 = vmatmul.msk.f32.gmra.mxu2 %vm342_vm5, %v3059_v57 }
 0xb96   :  { %2059 = vmatmul.msk.f32.vlgmr.msra.gmra.mxu0 %vm342_vm5, %v3054_v55  ;;  %2060 = vmatmul.msk.f32.vlgmr.msrb.gmra.mxu1 %vm342_vm5, %v3054_v55 }
 0xc13   :  { %v944_v39 = vpop.f32.mrf.mxu0  ;;  %v964_v21 = vpop.f32.mrf.mxu1 }
 0xc14   :  { %v968_v48 = vadd.f32 %v967_v10, %v944_v39  ;;  %v989_v12 = vadd.f32 %v2744_v31, %v964_v21  ;;  %v1030_v31 = vld [vmem:[%s3680_s7 + $0x78] sm:$0xff]  ;;  %v3132_v39 = vld [vmem:[%s3682_s9 + $0x40] sm:$0xff] }
 0xc15   :  { %1110 = vmatpush.msrb.mxu3 %v1030_v31  ;;  %1185 = vmatpush.msrb.mxu0 %v3132_v39  ;;  %v3186_v21 = vld [vmem:[%s3682_s9 + $0x78] sm:$0xff]  ;;  %v3279_v31 = vld [vmem:[%s3682_s9 + $0x8] sm:$0xff] }
 0xc16   :  { %v2061_v54 = vmul.f32 -1.442695, %v968_v48  ;;  %v3138_v48 = vld [vmem:[%s3682_s9 + $0x30] sm:$0xff]  ;;  %1517 = vmatpush.msrb.mxu2 %v3132_v39  ;;  %1202 = vmatpush.msrb.mxu1 %v3186_v21 }
 0xc17   :  { %1186 = vmatpush.msrb.mxu0 %v3138_v48 }
 0xc18   :  { %2181 = vpow2.f32 %v2061_v54  ;;  %v1167_v54 = vpop.permute.xlu1 %1166  ;;  %1518 = vmatpush.msrb.mxu2 %v3138_v48 }
 0xc1e   :  { %v2182_v26 = vpop.eup %2181 }
 0xc1f   :  { %v972_v56 = vadd.f32 1.0, %v2182_v26  ;;  %v3144_v26 = vld [vmem:[%s3682_s9 + $0x20] sm:$0xff] }
 0xc20   :  { %1187 = vmatpush.msrb.mxu0 %v3144_v26  ;;  %1519 = vmatpush.msrb.mxu2 %v3144_v26 }
 0xc21   :  { %2183 = vrcp.f32 %v972_v56  ;;  %v984_v15 = vand.u32 2147483648, %v972_v56  ;;  %v982_v4 = vand.u32 2147483647, %v972_v56  ;;  %vm978_vm1 = vweird.f32 %v972_v56 }
 0xc23   :  { %v985_v45 = vor.u32 1.1754944e-38, %v984_v15  ;;  %vm983_vm6 = vcmp.eq.f32.partialorder %v982_v4, 8.507059e+37  ;;  %v3167_v15 = vld [vmem:[%s3682_s9] sm:$0xff] }
 0xc27   :  { %v2184_v58 = vpop.eup %2183 }
 0xc28   :  { %v974_v61 = vmul.f32 %v2184_v58, %v972_v56  ;;  %vm979_vm0 = vweird.f32 %v2184_v58  ;;  %v1163_v56 = vld [vmem:[%s3675_s2 + $0x4] sm:$0x3] }
 0xc29   :  { %vm980_vm2 = vmor %vm978_vm1, %vm979_vm0 }
 0xc2a   :  { %v975_v60 = vsub.f32 1.0, %v974_v61  ;;  %v1169_v61 = vsel %vm338_vm3, %v1163_v56, %v1167_v54 }
 0xc2c   :  { %v976_v62 = vmul.f32 %v2184_v58, %v975_v60  ;;  %v3161_v60 = vsel %vm340_vm4, %v1169_v61, 0.0 }
 0xc2e   :  { %v977_v38 = vadd.f32 %v2184_v58, %v976_v62  ;;  %v3696_v62 = vmov 0  }
 0xc2f   :  { %v61_v4 = vsel %vm53_vm14, 7, %v3696_v62 }
 0xc30   :  { %v981_v44 = vsel %vm980_vm2, %v2184_v58, %v977_v38  ;;  %v3154_v58 = vld [vmem:[%s3682_s9 + $0x10] sm:$0xff]  ;;  %v3191_v38 = vld [vmem:[%s3682_s9 + $0x68] sm:$0xff]  ;;  %vm72_vm4 = vcmp.lt.s32.totalorder %v61_v4, %v2755_v27  ;;  %vm91_vm8 = vcmp.lt.s32.totalorder %v61_v4, %v2759_v28 }
 0xc31   :  { %v986_v16 = vsel %vm983_vm6, %v985_v45, %v981_v44  ;;  %1188 = vmatpush.msrb.mxu0 %v3154_v58  ;;  %1520 = vmatpush.msrb.mxu2 %v3154_v58  ;;  %v3201_v45 = vld [vmem:[%s3682_s9 + $0x58] sm:$0xff]  ;;  %vm3209_vm10 = vmand %vm62_vm7, %vm72_vm4  ;;  %v3228_v44 = vld [vmem:[%s3682_s9 + $0x48] sm:$0xff] }
 0xc32   :  { %v990_v10 = vmul.f32 %v989_v12, %v986_v16  ;;  %1203 = vmatpush.msrb.mxu1 %v3191_v38  ;;  %vm3217_vm11 = vmand %vm81_vm9, %vm91_vm8 }
 0xc33   :  { %1189 = vmatpush.msrb.mxu0 %v3167_v15  ;;  %1521 = vmatpush.msrb.mxu2 %v3167_v15  ;;  %vm107_vm7 = vmor %vm3209_vm10, %vm3217_vm11 }
 0xc34   :  { %v991_v3 = vadd.f32 %v990_v10, %v2731_v20  ;;  %v1028_v20 = vld [vmem:[%s3680_s7 + $0x68] sm:$0xff]  ;;  %2078 = vmatmul.msk.f32.vlgmr.msrb.gmra.mxu0 %vm342_vm5, %v3161_v60  ;;  %1204 = vmatpush.msrb.mxu1 %v3201_v45 }
 0xc35   :  { %1111 = vmatpush.msrb.mxu3 %v1028_v20  ;;  %1680 = vmatpush.msra.mxu2 %v3095_v25 }
 0xc36   :  { %2185 = vtanh.f32 %v991_v3  ;;  %1265 = vmatpush.msra.mxu0 %v3095_v25  ;;  %1205 = vmatpush.msrb.mxu1 %v3228_v44  ;;  %v3252_v3 = vsel %vm107_vm7, 1.0, %v2255_v42 }
 0xc37   :  { %1112 = vmatpush.msrb.mxu3 %v1026_v7  ;;  %1681 = vmatpush.msra.mxu2 %v3112_v34 }
 0xc38   :  { %1266 = vmatpush.msra.mxu0 %v3112_v34  ;;  %1206 = vmatpush.msrb.mxu1 %v3238_v24 }
 0xc39   :  { %1113 = vmatpush.msrb.mxu3 %v1024_v30  ;;  %1682 = vmatpush.msra.mxu2 %v3122_v22 }
 0xc3a   :  { %1267 = vmatpush.msra.mxu0 %v3122_v22 }
 0xc3b   :  { %1114 = vmatpush.msrb.mxu3 %v1022_v35  ;;  %1683 = vmatpush.msra.mxu2 %v3132_v39 }
 0xc3c   :  { %v3074_v8 = vpop.eup %2185  ;;  %1268 = vmatpush.msra.mxu0 %v3132_v39 }
 0xc3d   :  { %v993_v17 = vsub.f32 %v3054_v55, %v3074_v8  ;;  %1115 = vmatpush.msrb.mxu3 %v1020_v63  ;;  %1684 = vmatpush.msra.mxu2 %v3138_v48 }
 0xc3e   :  { %1269 = vmatpush.msra.mxu0 %v3138_v48 }
 0xc3f   :  { %995 = vrot.lane.b32.xlu2 %v993_v17, %s2253_s6  ;;  %1116 = vmatpush.msrb.mxu3 %v1018_v18  ;;  %v3257_v17 = vld [vmem:[%s3682_s9 + $0x18] sm:$0xff] }
 0xc40   :  { %1270 = vmatpush.msra.mxu0 %v3144_v26  ;;  %1685 = vmatpush.msra.mxu2 %v3144_v26 }
 0xc41   :  { %1117 = vmatpush.msrb.mxu3 %v1016_v5 }
 0xc42   :  { %1271 = vmatpush.msra.mxu0 %v3154_v58  ;;  %1686 = vmatpush.msra.mxu2 %v3154_v58 }
 0xc43   :  { %1534 = vmatpush.msra.mxu3 %v3186_v21 }
 0xc44   :  { %1272 = vmatpush.msra.mxu0 %v3167_v15  ;;  %1687 = vmatpush.msra.mxu2 %v3167_v15 }
 0xc45   :  { %1535 = vmatpush.msra.mxu3 %v3191_v38 }
 0xc46   :  { %1348 = vmatpush.msrb.mxu0 %v3095_v25 }
 0xc47   :  { %1536 = vmatpush.msra.mxu3 %v3201_v45 }
 0xc48   :  { %1349 = vmatpush.msrb.mxu0 %v3112_v34 }
 0xc49   :  { %1537 = vmatpush.msra.mxu3 %v3228_v44 }
 0xc4a   :  { %1350 = vmatpush.msrb.mxu0 %v3122_v22 }
 0xc4b   :  { %1538 = vmatpush.msra.mxu3 %v3238_v24 }
 0xc4c   :  { %1351 = vmatpush.msrb.mxu0 %v3132_v39 }
 0xc4e   :  { %1352 = vmatpush.msrb.mxu0 %v3138_v48 }
 0xc50   :  { %1353 = vmatpush.msrb.mxu0 %v3144_v26 }
 0xc52   :  { %1354 = vmatpush.msrb.mxu0 %v3154_v58 }
 0xc54   :  { %1355 = vmatpush.msrb.mxu0 %v3167_v15 }
 0xc99   :  { %v996_v41 = vpop.permute.xlu2 %995 }
 0xc9a   :  { %v998_v46 = vmul.f32 %v996_v41, %v986_v16  ;;  %v3244_v16 = vld [vmem:[%s3682_s9 + $0x28] sm:$0xff] }
 0xc9b   :  { %1207 = vmatpush.msrb.mxu1 %v3244_v16  ;;  %1539 = vmatpush.msra.mxu3 %v3244_v16 }
 0xc9c   :  { %1000 = vrot.lane.b32.xlu0 %v998_v46, %s2253_s6 }
 0xc9d   :  { %1208 = vmatpush.msrb.mxu1 %v3257_v17  ;;  %1540 = vmatpush.msra.mxu3 %v3257_v17 }
 0xc9f   :  { %1209 = vmatpush.msrb.mxu1 %v3279_v31  ;;  %1541 = vmatpush.msra.mxu3 %v3279_v31 }
 0xcb1   :  { %v1191_v18 = vpop.f32.mrf.mxu0 }
 0xd0e   :  { %v1001_v12 = vpop.permute.xlu0 %1000 }
 0xd0f   :  { %v1003_v10 = vadd.f32 %v3074_v8, %v1001_v12 }
 0xd11   :  { %v3262_v52 = vmul.f32 %v3252_v3, %v1003_v10 }
 0xd13   :  { %v1007_v42 = vsel %vm338_vm3, %v2774_v49, %v3262_v52  ;;  %v1014_v8 = vsel %vm338_vm3, %v3262_v52, %v2774_v49  ;;  %v1008_v49 = vsel %vm338_vm3, %v2822_v19, %v3051_v13  ;;  %v1009_v19 = vsel %vm338_vm3, %v2867_v11, %v3008_v37 }
 0xd14   :  { %2062 = vmatmul.msk.f32.vlgmr.msra.gmra.mxu1 %vm342_vm5, %v1007_v42  ;;  %2069 = vmatmul.msk.f32.gmra.mxu2 %vm342_vm5, %v1014_v8  ;;  %v1010_v11 = vsel %vm338_vm3, %v2912_v59, %v2949_v47  ;;  %v1090_v59 = vpop.f32.mrf.mxu2 }
 0xd15   :  { %2070 = vmatmul.msk.f32.vlgmr.msrb.gmra.mxu3 %vm342_vm5, %v1007_v42  ;;  %1285 = vmatpush.msra.mxu1 %v3186_v21 }
 0xd16   :  { %1700 = vmatpush.msrb.mxu3 %v3186_v21 }
 0xd17   :  { %1286 = vmatpush.msra.mxu1 %v3191_v38 }
 0xd18   :  { %1701 = vmatpush.msrb.mxu3 %v3191_v38 }
 0xd19   :  { %1287 = vmatpush.msra.mxu1 %v3201_v45 }
 0xd1a   :  { %1702 = vmatpush.msrb.mxu3 %v3201_v45 }
 0xd1b   :  { %1288 = vmatpush.msra.mxu1 %v3228_v44 }
 0xd1c   :  { %2063 = vmatmul.msk.f32.gmra.mxu1 %vm342_vm5, %v1008_v49  ;;  %1703 = vmatpush.msrb.mxu3 %v3228_v44  ;;  %v1093_v47 = vpop.f32.mrf.mxu2 }
 0xd1d   :  { %2071 = vmatmul.msk.f32.gmra.mxu3 %vm342_vm5, %v1008_v49  ;;  %1289 = vmatpush.msra.mxu1 %v3238_v24 }
 0xd1e   :  { %1704 = vmatpush.msrb.mxu3 %v3238_v24 }
 0xd1f   :  { %1290 = vmatpush.msra.mxu1 %v3244_v16 }
 0xd20   :  { %1705 = vmatpush.msrb.mxu3 %v3244_v16 }
 0xd21   :  { %1291 = vmatpush.msra.mxu1 %v3257_v17 }
 0xd22   :  { %1706 = vmatpush.msrb.mxu3 %v3257_v17 }
 0xd23   :  { %1292 = vmatpush.msra.mxu1 %v3279_v31 }
 0xd24   :  { %2064 = vmatmul.msk.f32.gmra.mxu1 %vm342_vm5, %v1009_v19  ;;  %1707 = vmatpush.msrb.mxu3 %v3279_v31  ;;  %v1096_v37 = vpop.f32.mrf.mxu2 }
 0xd25   :  { %2072 = vmatmul.msk.f32.gmra.mxu3 %vm342_vm5, %v1009_v19 }
 0xd2c   :  { %2065 = vmatmul.msk.f32.gmra.mxu1 %vm342_vm5, %v1010_v11 }
 0xd2d   :  { %2073 = vmatmul.msk.f32.gmra.mxu3 %vm342_vm5, %v1010_v11 }
 0xd34   :  { %2079 = vmatmul.msk.f32.vlgmr.msrb.gmra.mxu1 %vm342_vm5, %v3161_v60 }
 0xd35   :  { %2074 = vmatmul.msk.f32.gmra.mxu3 %vm342_vm5, %v3016_v51  ;;  %1368 = vmatpush.msrb.mxu1 %v3186_v21 }
 0xd37   :  { %1369 = vmatpush.msrb.mxu1 %v3191_v38 }
 0xd39   :  { %1370 = vmatpush.msrb.mxu1 %v3201_v45 }
 0xd3b   :  { %1371 = vmatpush.msrb.mxu1 %v3228_v44 }
 0xd3d   :  { %2075 = vmatmul.msk.f32.gmra.mxu3 %vm342_vm5, %v3023_v53  ;;  %1372 = vmatpush.msrb.mxu1 %v3238_v24  ;;  %v1031_v53 = vld [vmem:[%s3681_s8] sm:$0x3] }
 0xd3e   :  { %v1033_v13 = vperm.slane %v1031_v53, 0  ;;  %v1034_v61 = vperm.slane %v1031_v53, 1 }
 0xd3f   :  { %1373 = vmatpush.msrb.mxu1 %v3244_v16 }
 0xd40   :  { %v3345_v46 = vadd.f32 %v1096_v37, %v1033_v13  ;;  %v3361_v28 = vadd.f32 %v1093_v47, %v1033_v13  ;;  %v3369_v11 = vadd.f32 %v1090_v59, %v1033_v13 }
 0xd41   :  { %1374 = vmatpush.msrb.mxu1 %v3257_v17 }
 0xd43   :  { %1375 = vmatpush.msrb.mxu1 %v3279_v31 }
 0xd45   :  { %2076 = vmatmul.msk.f32.gmra.mxu3 %vm342_vm5, %v3059_v57 }
 0xd4d   :  { %2077 = vmatmul.msk.f32.gmra.mxu3 %vm342_vm5, %v1014_v8 }
 0xd91   :  { %v1078_v51 = vpop.f32.mrf.mxu1 }
 0xd92   :  { %v3341_v7 = vadd.f32 %v1078_v51, %v1033_v13 }
 0xd97   :  { %v1099_v20 = vpop.f32.mrf.mxu2 }
 0xd98   :  { %v3343_v30 = vadd.f32 %v1099_v20, %v1033_v13  ;;  %v1119_v35 = vpop.f32.mrf.mxu3 }
 0xd99   :  { %v1081_v41 = vpop.f32.mrf.mxu1  ;;  %v1120_v42 = vadd.f32 %v1119_v35, %v1034_v61 }
 0xd9a   :  { %v3347_v57 = vadd.f32 %v1081_v41, %v1033_v13  ;;  %v1214_v5 = vsel %vm2667_vm15, %v3341_v7, %v3343_v30 }
 0xd9b   :  { %v1215_v56 = vadd.f32 %v1214_v5, %v1191_v18 }
 0xd9d   :  { %v2080_v12 = vmul.f32 -1.442695, %v1215_v56 }
 0xd9f   :  { %2187 = vpow2.f32 %v2080_v12 }
 0xda0   :  { %v1122_v62 = vpop.f32.mrf.mxu3 }
 0xda1   :  { %v1123_v4 = vadd.f32 %v1122_v62, %v1034_v61  ;;  %v1084_v27 = vpop.f32.mrf.mxu1 }
 0xda2   :  { %v3363_v10 = vadd.f32 %v1084_v27, %v1033_v13 }
 0xda5   :  { %v2188_v51 = vpop.eup %2187 }
 0xda6   :  { %v1219_v20 = vadd.f32 1.0, %v2188_v51 }
 0xda8   :  { %v1125_v8 = vpop.f32.mrf.mxu3  ;;  %2189 = vrcp.f32 %v1219_v20  ;;  %v1231_v54 = vand.u32 2147483648, %v1219_v20  ;;  %vm1225_vm12 = vweird.f32 %v1219_v20 }
 0xda9   :  { %v1126_v49 = vadd.f32 %v1125_v8, %v1034_v61  ;;  %v1087_v19 = vpop.f32.mrf.mxu1 }
 0xdaa   :  { %v3371_v37 = vadd.f32 %v1087_v19, %v1033_v13 }
 0xdac   :  { %v1463_v47 = vsel %vm2667_vm15, %v3371_v37, %v3369_v11 }
 0xdae   :  { %v2190_v59 = vpop.eup %2189 }
 0xdaf   :  { %v1221_v27 = vmul.f32 %v2190_v59, %v1219_v20  ;;  %vm1226_vm9 = vweird.f32 %v2190_v59 }
 0xdb0   :  { %v1128_v41 = vpop.f32.mrf.mxu3  ;;  %vm1227_vm13 = vmor %vm1225_vm12, %vm1226_vm9 }
 0xdb1   :  { %v1129_v18 = vadd.f32 %v1128_v41, %v1034_v61  ;;  %v1222_v12 = vsub.f32 1.0, %v1221_v27 }
 0xdb8   :  { %v1131_v5 = vpop.f32.mrf.mxu3 }
 0xdb9   :  { %v1132_v56 = vadd.f32 %v1131_v5, %v1034_v61  ;;  %v1223_v5 = vmul.f32 %v2190_v59, %v1222_v12 }
 0xdbb   :  { %v3383_v13 = vsel %vm53_vm14, %v1129_v18, %v1132_v56  ;;  %v3387_v62 = vsel %vm53_vm14, %v1132_v56, %v1129_v18  ;;  %v1224_v63 = vadd.f32 %v2190_v59, %v1223_v5  ;;  %v1229_v18 = vand.u32 2147483647, %v1219_v20 }
 0xdbd   :  { %v1228_v12 = vsel %vm1227_vm13, %v2190_v59, %v1224_v63  ;;  %vm1230_vm0 = vcmp.eq.f32.partialorder %v1229_v18, 8.507059e+37 }
 0xdc0   :  { %v1134_v8 = vpop.f32.mrf.mxu3 }
 0xdc1   :  { %v1135_v19 = vadd.f32 %v1134_v8, %v1034_v61  ;;  %v1211_v8 = vpop.f32.mrf.mxu1 }
 0xdc3   :  { %v3391_v51 = vsel %vm53_vm14, %v1126_v49, %v1135_v19  ;;  %v3395_v41 = vsel %vm53_vm14, %v1135_v19, %v1126_v49  ;;  %v3408_v49 = vld [vmem:[%s3683_s10] ss:$0 sm:$0xff]  ;;  %v1232_v19 = vor.u32 1.1754944e-38, %v1231_v54 }
 0xdc4   :  { %v1236_v20 = vadd.f32 %v3408_v49, %v1211_v8 }
 0xdc8   :  { %v1137_v6 = vpop.f32.mrf.mxu3 }
 0xdc9   :  { %v1138_v23 = vadd.f32 %v1137_v6, %v1034_v61  ;;  %v1233_v6 = vsel %vm1230_vm0, %v1232_v19, %v1228_v12  ;;  %v3701_v12 = vsub.f32 1.0, %v2770_v36 }
 0xdca   :  { %v1237_v53 = vmul.f32 %v1236_v20, %v1233_v6 }
 0xdcb   :  { %v3399_v56 = vsel %vm53_vm14, %v1123_v4, %v1138_v23  ;;  %v3403_v27 = vsel %vm53_vm14, %v1138_v23, %v1123_v4  ;;  %v1252_v8 = vmul.f32 %v3161_v60, %v3701_v12 }
 0xdd0   :  { %v1140_v5 = vpop.f32.mrf.mxu3 }
 0xdd1   :  { %v1141_v9 = vadd.f32 %v1140_v5, %v1034_v61 }
 0xdd3   :  { %v1235_v23 = vsel %vm53_vm14, %v1120_v42, %v1141_v9  ;;  %v3415_v4 = vsel %vm53_vm14, %v1141_v9, %v1120_v42  ;;  %v1297_v9 = vsel %vm2667_vm15, %v3347_v57, %v3345_v46 }
 0xdd4   :  { %v1238_v50 = vadd.f32 %v1237_v53, %v1235_v23 }
 0xdd6   :  { %2191 = vtanh.f32 %v1238_v50 }
 0xddc   :  { %v2192_v63 = vpop.eup %2191 }
 0xddd   :  { %v1240_v54 = vsub.f32 %v3161_v60, %v2192_v63 }
 0xddf   :  { %1242 = vrot.lane.b32.xlu2 %v1240_v54, %s2253_s6 }
 0xe39   :  { %v1243_v59 = vpop.permute.xlu2 %1242 }
 0xe3a   :  { %v1245_v18 = vmul.f32 %v1243_v59, %v1233_v6 }
 0xe3c   :  { %1247 = vrot.lane.b32.xlu0 %v1245_v18, %s2253_s6 }
 0xeae   :  { %v1248_v35 = vpop.permute.xlu0 %1247 }
 0xeaf   :  { %v1250_v61 = vadd.f32 %v2192_v63, %v1248_v35 }
 0xeb1   :  { %v3424_v43 = vmul.f32 %v2770_v36, %v1250_v61 }
 0xeb3   :  { %v1253_v50 = vadd.f32 %v1252_v8, %v3424_v43 }
 0xeb5   :  { %2081 = vmatmul.msk.f32.vlgmr.msra.gmra.mxu0 %vm342_vm5, %v1253_v50  ;;  %2082 = vmatmul.msk.f32.vlgmr.msra.gmra.mxu1 %vm342_vm5, %v1253_v50 }
 0xeb6   :  { %1431 = vmatpush.msra.mxu0 %v3095_v25  ;;  %1451 = vmatpush.msra.mxu1 %v3186_v21 }
 0xeb8   :  { %1432 = vmatpush.msra.mxu0 %v3112_v34  ;;  %1452 = vmatpush.msra.mxu1 %v3191_v38 }
 0xeba   :  { %1433 = vmatpush.msra.mxu0 %v3122_v22  ;;  %1453 = vmatpush.msra.mxu1 %v3201_v45 }
 0xebc   :  { %1434 = vmatpush.msra.mxu0 %v3132_v39  ;;  %1454 = vmatpush.msra.mxu1 %v3228_v44 }
 0xebe   :  { %1435 = vmatpush.msra.mxu0 %v3138_v48  ;;  %1455 = vmatpush.msra.mxu1 %v3238_v24 }
 0xec0   :  { %1436 = vmatpush.msra.mxu0 %v3144_v26  ;;  %1456 = vmatpush.msra.mxu1 %v3244_v16 }
 0xec2   :  { %1437 = vmatpush.msra.mxu0 %v3154_v58  ;;  %1457 = vmatpush.msra.mxu1 %v3257_v17 }
 0xec4   :  { %1438 = vmatpush.msra.mxu0 %v3167_v15  ;;  %1458 = vmatpush.msra.mxu1 %v3279_v31 }
 0xf32   :  { %v1274_v36 = vpop.f32.mrf.mxu0  ;;  %v1294_v59 = vpop.f32.mrf.mxu1 }
 0xf33   :  { %v1298_v60 = vadd.f32 %v1297_v9, %v1274_v36  ;;  %v1319_v12 = vadd.f32 %v3408_v49, %v1294_v59 }
 0xf35   :  { %v2083_v42 = vmul.f32 -1.442695, %v1298_v60 }
 0xf37   :  { %2193 = vpow2.f32 %v2083_v42 }
 0xf3d   :  { %v2194_v53 = vpop.eup %2193 }
 0xf3e   :  { %v1302_v19 = vadd.f32 1.0, %v2194_v53 }
 0xf40   :  { %2195 = vrcp.f32 %v1302_v19  ;;  %v1314_v23 = vand.u32 2147483648, %v1302_v19  ;;  %v1312_v54 = vand.u32 2147483647, %v1302_v19  ;;  %vm1308_vm1 = vweird.f32 %v1302_v19 }
 0xf42   :  { %v1315_v35 = vor.u32 1.1754944e-38, %v1314_v23  ;;  %vm1313_vm6 = vcmp.eq.f32.partialorder %v1312_v54, 8.507059e+37 }
 0xf46   :  { %v2196_v6 = vpop.eup %2195 }
 0xf47   :  { %v1304_v20 = vmul.f32 %v2196_v6, %v1302_v19  ;;  %vm1309_vm14 = vweird.f32 %v2196_v6 }
 0xf48   :  { %vm1310_vm2 = vmor %vm1308_vm1, %vm1309_vm14 }
 0xf49   :  { %v1305_v5 = vsub.f32 1.0, %v1304_v20 }
 0xf4b   :  { %v1306_v63 = vmul.f32 %v2196_v6, %v1305_v5 }
 0xf4d   :  { %v1307_v18 = vadd.f32 %v2196_v6, %v1306_v63 }
 0xf4f   :  { %v1311_v61 = vsel %vm1310_vm2, %v2196_v6, %v1307_v18  ;;  %v3702_v6 = vsub.f32 1.0, %v2816_v0 }
 0xf50   :  { %v1316_v8 = vsel %vm1313_vm6, %v1315_v35, %v1311_v61 }
 0xf51   :  { %v1320_v36 = vmul.f32 %v1319_v12, %v1316_v8  ;;  %v1335_v23 = vmul.f32 %v1253_v50, %v3702_v6 }
 0xf53   :  { %v1321_v9 = vadd.f32 %v1320_v36, %v3399_v56  ;;  %v1380_v56 = vsel %vm2667_vm15, %v3363_v10, %v3361_v28 }
 0xf55   :  { %2197 = vtanh.f32 %v1321_v9 }
 0xf5b   :  { %v2198_v60 = vpop.eup %2197 }
 0xf5c   :  { %v1323_v42 = vsub.f32 %v1253_v50, %v2198_v60 }
 0xf5e   :  { %1325 = vrot.lane.b32.xlu1 %v1323_v42, %s2253_s6 }
 0xfd0   :  { %v1326_v53 = vpop.permute.xlu1 %1325 }
 0xfd1   :  { %v1328_v20 = vmul.f32 %v1326_v53, %v1316_v8 }
 0xfd3   :  { %1330 = vrot.lane.b32.xlu2 %v1328_v20, %s2253_s6 }
0x102d   :  { %v1331_v19 = vpop.permute.xlu2 %1330 }
0x102e   :  { %v1333_v5 = vadd.f32 %v2198_v60, %v1331_v19 }
0x1030   :  { %v3456_v63 = vmul.f32 %v2816_v0, %v1333_v5 }
0x1032   :  { %v1336_v54 = vadd.f32 %v1335_v23, %v3456_v63 }
0x1034   :  { %2084 = vmatmul.msk.f32.vlgmr.msrb.gmra.mxu0 %vm342_vm5, %v1336_v54  ;;  %2085 = vmatmul.msk.f32.vlgmr.msrb.gmra.mxu1 %vm342_vm5, %v1336_v54 }
0x1035   :  { %1597 = vmatpush.msrb.mxu0 %v3095_v25  ;;  %1617 = vmatpush.msrb.mxu1 %v3186_v21 }
0x1037   :  { %1598 = vmatpush.msrb.mxu0 %v3112_v34  ;;  %1618 = vmatpush.msrb.mxu1 %v3191_v38 }
0x1039   :  { %1599 = vmatpush.msrb.mxu0 %v3122_v22  ;;  %1619 = vmatpush.msrb.mxu1 %v3201_v45 }
0x103b   :  { %1600 = vmatpush.msrb.mxu0 %v3132_v39  ;;  %1620 = vmatpush.msrb.mxu1 %v3228_v44 }
0x103d   :  { %1601 = vmatpush.msrb.mxu0 %v3138_v48  ;;  %1621 = vmatpush.msrb.mxu1 %v3238_v24 }
0x103f   :  { %1602 = vmatpush.msrb.mxu0 %v3144_v26  ;;  %1622 = vmatpush.msrb.mxu1 %v3244_v16 }
0x1041   :  { %1603 = vmatpush.msrb.mxu0 %v3154_v58  ;;  %1623 = vmatpush.msrb.mxu1 %v3257_v17 }
0x1043   :  { %1604 = vmatpush.msrb.mxu0 %v3167_v15  ;;  %1624 = vmatpush.msrb.mxu1 %v3279_v31 }
0x10b1   :  { %v1357_v0 = vpop.f32.mrf.mxu0  ;;  %v1377_v42 = vpop.f32.mrf.mxu1 }
0x10b2   :  { %v1381_v50 = vadd.f32 %v1380_v56, %v1357_v0  ;;  %v1402_v5 = vadd.f32 %v3408_v49, %v1377_v42 }
0x10b4   :  { %v2086_v59 = vmul.f32 -1.442695, %v1381_v50 }
0x10b6   :  { %2199 = vpow2.f32 %v2086_v59 }
0x10bc   :  { %v2200_v18 = vpop.eup %2199 }
0x10bd   :  { %v1385_v35 = vadd.f32 1.0, %v2200_v18 }
0x10bf   :  { %2201 = vrcp.f32 %v1385_v35  ;;  %v1397_v36 = vand.u32 2147483648, %v1385_v35  ;;  %v1395_v60 = vand.u32 2147483647, %v1385_v35  ;;  %vm1391_vm8 = vweird.f32 %v1385_v35 }
0x10c1   :  { %v1398_v20 = vor.u32 1.1754944e-38, %v1397_v36  ;;  %vm1396_vm11 = vcmp.eq.f32.partialorder %v1395_v60, 8.507059e+37 }
0x10c5   :  { %v2202_v61 = vpop.eup %2201 }
0x10c6   :  { %v1387_v12 = vmul.f32 %v2202_v61, %v1385_v35  ;;  %vm1392_vm4 = vweird.f32 %v2202_v61 }
0x10c7   :  { %vm1393_vm10 = vmor %vm1391_vm8, %vm1392_vm4 }
0x10c8   :  { %v1388_v8 = vsub.f32 1.0, %v1387_v12 }
0x10ca   :  { %v1389_v9 = vmul.f32 %v2202_v61, %v1388_v8 }
0x10cc   :  { %v1390_v53 = vadd.f32 %v2202_v61, %v1389_v9 }
0x10ce   :  { %v1394_v19 = vsel %vm1393_vm10, %v2202_v61, %v1390_v53  ;;  %v1418_v61 = vmul.f32 %v1336_v54, %v126_v2 }
0x10cf   :  { %v1399_v6 = vsel %vm1396_vm11, %v1398_v20, %v1394_v19  ;;  %v3703_v20 = vsub.f32 1.0, %v2906_v32 }
0x10d0   :  { %v1403_v23 = vmul.f32 %v1402_v5, %v1399_v6 }
0x10d2   :  { %v1404_v0 = vadd.f32 %v1403_v23, %v3391_v51  ;;  %v3704_v23 = vsel %vm2667_vm15, %v3369_v11, %v3371_v37 }
0x10d4   :  { %2203 = vtanh.f32 %v1404_v0 }
0x10da   :  { %v2204_v56 = vpop.eup %2203 }
0x10db   :  { %v1406_v50 = vsub.f32 %v1336_v54, %v2204_v56 }
0x10dd   :  { %1408 = vrot.lane.b32.xlu0 %v1406_v50, %s2253_s6 }
0x114f   :  { %v1409_v59 = vpop.permute.xlu0 %1408 }
0x1150   :  { %v1411_v18 = vmul.f32 %v1409_v59, %v1399_v6 }
0x1152   :  { %1413 = vrot.lane.b32.xlu1 %v1411_v18, %s2253_s6 }
0x11c4   :  { %v1414_v35 = vpop.permute.xlu1 %1413 }
0x11c5   :  { %v1416_v12 = vadd.f32 %v2204_v56, %v1414_v35 }
0x11c7   :  { %v3488_v8 = vmul.f32 %v2861_v40, %v1416_v12 }
0x11c9   :  { %v1419_v36 = vadd.f32 %v1418_v61, %v3488_v8 }
0x11cb   :  { %2087 = vmatmul.msk.f32.vlgmr.msra.gmra.mxu0 %vm342_vm5, %v1419_v36  ;;  %2088 = vmatmul.msk.f32.vlgmr.msra.gmra.mxu1 %vm342_vm5, %v1419_v36  ;;  %v1501_v19 = vmul.f32 %v1419_v36, %v3703_v20 }
0x11cc   :  { %1763 = vmatpush.msra.mxu0 %v3095_v25  ;;  %1783 = vmatpush.msra.mxu1 %v3186_v21 }
0x11ce   :  { %1764 = vmatpush.msra.mxu0 %v3112_v34  ;;  %1784 = vmatpush.msra.mxu1 %v3191_v38 }
0x11d0   :  { %1765 = vmatpush.msra.mxu0 %v3122_v22  ;;  %1785 = vmatpush.msra.mxu1 %v3201_v45 }
0x11d2   :  { %1766 = vmatpush.msra.mxu0 %v3132_v39  ;;  %1786 = vmatpush.msra.mxu1 %v3228_v44 }
0x11d4   :  { %1767 = vmatpush.msra.mxu0 %v3138_v48  ;;  %1787 = vmatpush.msra.mxu1 %v3238_v24 }
0x11d6   :  { %1768 = vmatpush.msra.mxu0 %v3144_v26  ;;  %1788 = vmatpush.msra.mxu1 %v3244_v16 }
0x11d8   :  { %1769 = vmatpush.msra.mxu0 %v3154_v58  ;;  %1789 = vmatpush.msra.mxu1 %v3257_v17 }
0x11da   :  { %1770 = vmatpush.msra.mxu0 %v3167_v15  ;;  %1790 = vmatpush.msra.mxu1 %v3279_v31 }
0x1248   :  { %v1440_v40 = vpop.f32.mrf.mxu0  ;;  %v1460_v38 = vpop.f32.mrf.mxu1 }
0x1249   :  { %v1464_v2 = vadd.f32 %v1463_v47, %v1440_v40  ;;  %v1485_v16 = vadd.f32 %v3408_v49, %v1460_v38 }
0x124b   :  { %v2089_v25 = vmul.f32 -1.442695, %v1464_v2 }
0x124d   :  { %2205 = vpow2.f32 %v2089_v25 }
0x1253   :  { %v2206_v34 = vpop.eup %2205 }
0x1254   :  { %v1468_v22 = vadd.f32 1.0, %v2206_v34 }
0x1256   :  { %2207 = vrcp.f32 %v1468_v22  ;;  %v1480_v58 = vand.u32 2147483648, %v1468_v22  ;;  %v1478_v15 = vand.u32 2147483647, %v1468_v22  ;;  %vm1474_vm9 = vweird.f32 %v1468_v22 }
0x1258   :  { %v1481_v44 = vor.u32 1.1754944e-38, %v1480_v58  ;;  %vm1479_vm13 = vcmp.eq.f32.partialorder %v1478_v15, 8.507059e+37 }
0x125c   :  { %v2208_v39 = vpop.eup %2207 }
0x125d   :  { %v1470_v48 = vmul.f32 %v2208_v39, %v1468_v22  ;;  %vm1475_vm7 = vweird.f32 %v2208_v39 }
0x125e   :  { %vm1476_vm12 = vmor %vm1474_vm9, %vm1475_vm7 }
0x125f   :  { %v1471_v26 = vsub.f32 1.0, %v1470_v48 }
0x1261   :  { %v1472_v21 = vmul.f32 %v2208_v39, %v1471_v26 }
0x1263   :  { %v1473_v45 = vadd.f32 %v2208_v39, %v1472_v21 }
0x1265   :  { %v1477_v24 = vsel %vm1476_vm12, %v2208_v39, %v1473_v45  ;;  %v3705_v45 = vsub.f32 1.0, %v2943_v33 }
0x1266   :  { %v1482_v17 = vsel %vm1479_vm13, %v1481_v44, %v1477_v24 }
0x1267   :  { %v1486_v31 = vmul.f32 %v1485_v16, %v1482_v17 }
0x1269   :  { %v1487_v47 = vadd.f32 %v1486_v31, %v3383_v13 }
0x126b   :  { %2209 = vtanh.f32 %v1487_v47 }
0x1271   :  { %v2210_v51 = vpop.eup %2209 }
0x1272   :  { %v1489_v54 = vsub.f32 %v1419_v36, %v2210_v51 }
0x1274   :  { %1491 = vrot.lane.b32.xlu2 %v1489_v54, %s2253_s6 }
0x12ce   :  { %v1492_v9 = vpop.permute.xlu2 %1491 }
0x12cf   :  { %v1494_v60 = vmul.f32 %v1492_v9, %v1482_v17  ;;  %v3706_v17 = vsel %vm2667_vm15, %v3361_v28, %v3363_v10 }
0x12d1   :  { %1496 = vrot.lane.b32.xlu0 %v1494_v60, %s2253_s6 }
0x1343   :  { %v1497_v42 = vpop.permute.xlu0 %1496 }
0x1344   :  { %v1499_v53 = vadd.f32 %v2210_v51, %v1497_v42 }
0x1346   :  { %v3521_v5 = vmul.f32 %v2906_v32, %v1499_v53 }
0x1348   :  { %v1502_v6 = vadd.f32 %v1501_v19, %v3521_v5 }
0x134a   :  { %2090 = vmatmul.msk.f32.vlgmr.msrb.gmra.mxu2 %vm342_vm5, %v1502_v6  ;;  %2091 = vmatmul.msk.f32.vlgmr.msra.gmra.mxu3 %vm342_vm5, %v1502_v6  ;;  %v1584_v44 = vmul.f32 %v1502_v6, %v3705_v45 }
0x13cd   :  { %v1523_v13 = vpop.f32.mrf.mxu2  ;;  %v1543_v40 = vpop.f32.mrf.mxu3 }
0x13ce   :  { %v1547_v0 = vadd.f32 %v3704_v23, %v1523_v13  ;;  %v1568_v11 = vadd.f32 %v3408_v49, %v1543_v40  ;;  %v1845_v40 = vld [vmem:[%s3684_s11 + $0x10] sm:$0xff] }
0x13d0   :  { %v2092_v56 = vmul.f32 -1.442695, %v1547_v0 }
0x13d2   :  { %2211 = vpow2.f32 %v2092_v56 }
0x13d8   :  { %v2212_v50 = vpop.eup %2211 }
0x13d9   :  { %v1551_v59 = vadd.f32 1.0, %v2212_v50 }
0x13db   :  { %2213 = vrcp.f32 %v1551_v59  ;;  %v1563_v12 = vand.u32 2147483648, %v1551_v59  ;;  %v1561_v36 = vand.u32 2147483647, %v1551_v59  ;;  %vm1557_vm14 = vweird.f32 %v1551_v59 }
0x13dd   :  { %v1564_v25 = vor.u32 1.1754944e-38, %v1563_v12  ;;  %vm1562_vm2 = vcmp.eq.f32.partialorder %v1561_v36, 8.507059e+37  ;;  %v1848_v12 = vld [vmem:[%s3684_s11 + $0x28] sm:$0xff]  ;;  %v1846_v36 = vld [vmem:[%s3684_s11 + $0x18] sm:$0xff] }
0x13e1   :  { %v2214_v32 = vpop.eup %2213 }
0x13e2   :  { %v1553_v18 = vmul.f32 %v2214_v32, %v1551_v59  ;;  %vm1558_vm0 = vweird.f32 %v2214_v32 }
0x13e3   :  { %vm1559_vm1 = vmor %vm1557_vm14, %vm1558_vm0 }
0x13e4   :  { %v1554_v35 = vsub.f32 1.0, %v1553_v18 }
0x13e6   :  { %v1555_v61 = vmul.f32 %v2214_v32, %v1554_v35 }
0x13e8   :  { %v1556_v2 = vadd.f32 %v2214_v32, %v1555_v61  ;;  %v1847_v61 = vld [vmem:[%s3684_s11 + $0x20] sm:$0xff] }
0x13ea   :  { %v1560_v34 = vsel %vm1559_vm1, %v2214_v32, %v1556_v2  ;;  %v1850_v32 = vld [vmem:[%s3684_s11 + $0x38] sm:$0xff]  ;;  %v1844_v2 = vld [vmem:[%s3684_s11 + $0x8] sm:$0xff]  ;;  %vm1942_vm1 = vcmask 785408  }
0x13eb   :  { %v1565_v37 = vsel %vm1562_vm2, %v1564_v25, %v1560_v34  ;;  %1960 = vmatpush.msra.mxu3 %v1850_v32  ;;  %1883 = vmatpush.msrb.mxu2 %v1850_v32  ;;  %v1843_v25 = vld [vmem:[%s3684_s11] sm:$0xff] }
0x13ec   :  { %v1569_v22 = vmul.f32 %v1568_v11, %v1565_v37 }
0x13ee   :  { %v1570_v39 = vadd.f32 %v1569_v22, %v3387_v62 }
0x13f0   :  { %2215 = vtanh.f32 %v1570_v39 }
0x13f6   :  { %v2216_v48 = vpop.eup %2215 }
0x13f7   :  { %v1572_v26 = vsub.f32 %v1502_v6, %v2216_v48 }
0x13f9   :  { %1574 = vrot.lane.b32.xlu1 %v1572_v26, %s2253_s6  ;;  %v131_v26 = vsub.f32 1.0, %v3252_v3 }
0x146b   :  { %v1575_v58 = vpop.permute.xlu1 %1574 }
0x146c   :  { %v1577_v21 = vmul.f32 %v1575_v58, %v1565_v37  ;;  %v3707_v37 = vsub.f32 1.0, %v3001_v14  ;;  %v1005_v58 = vmul.f32 %v3054_v55, %v131_v26 }
0x146e   :  { %1579 = vrot.lane.b32.xlu2 %v1577_v21, %s2253_s6  ;;  %v1006_v21 = vadd.f32 %v1005_v58, %v3262_v52 }
0x14c8   :  { %v1580_v15 = vpop.permute.xlu2 %1579 }
0x14c9   :  { %v1582_v38 = vadd.f32 %v2216_v48, %v1580_v15 }
0x14cb   :  { %v3538_v24 = vmul.f32 %v2943_v33, %v1582_v38 }
0x14cd   :  { %v3541_v16 = vadd.f32 %v1584_v44, %v3538_v24 }
0x14cf   :  { %2093 = vmatmul.msk.f32.vlgmr.msrb.gmra.mxu0 %vm342_vm5, %v3541_v16  ;;  %2094 = vmatmul.msk.f32.vlgmr.msrb.gmra.mxu1 %vm342_vm5, %v3541_v16  ;;  %v1667_v22 = vmul.f32 %v3541_v16, %v3707_v37 }
0x14d0   :  { %1983 = vmatpush.msrb.mxu0 %v1850_v32 }
0x154c   :  { %v1606_v62 = vpop.f32.mrf.mxu0  ;;  %v1626_v19 = vpop.f32.mrf.mxu1 }
0x154d   :  { %v1630_v31 = vadd.f32 %v3706_v17, %v1606_v62  ;;  %v1651_v28 = vadd.f32 %v3408_v49, %v1626_v19 }
0x154f   :  { %v2095_v47 = vmul.f32 -1.442695, %v1630_v31 }
0x1551   :  { %2217 = vpow2.f32 %v2095_v47 }
0x1557   :  { %v2218_v33 = vpop.eup %2217 }
0x1558   :  { %v1634_v51 = vadd.f32 1.0, %v2218_v33 }
0x155a   :  { %2219 = vrcp.f32 %v1634_v51  ;;  %v1646_v42 = vand.u32 2147483648, %v1634_v51  ;;  %v1644_v20 = vand.u32 2147483647, %v1634_v51  ;;  %vm1640_vm4 = vweird.f32 %v1634_v51 }
0x155c   :  { %v1647_v13 = vor.u32 1.1754944e-38, %v1646_v42  ;;  %vm1645_vm10 = vcmp.eq.f32.partialorder %v1644_v20, 8.507059e+37 }
0x1560   :  { %v2220_v54 = vpop.eup %2219 }
0x1561   :  { %v1636_v9 = vmul.f32 %v2220_v54, %v1634_v51  ;;  %vm1641_vm6 = vweird.f32 %v2220_v54 }
0x1562   :  { %vm1642_vm8 = vmor %vm1640_vm4, %vm1641_vm6 }
0x1563   :  { %v1637_v60 = vsub.f32 1.0, %v1636_v9 }
0x1565   :  { %v1638_v53 = vmul.f32 %v2220_v54, %v1637_v60 }
0x1567   :  { %v1639_v6 = vadd.f32 %v2220_v54, %v1638_v53 }
0x1569   :  { %v1643_v23 = vsel %vm1642_vm8, %v2220_v54, %v1639_v6 }
0x156a   :  { %v1648_v10 = vsel %vm1645_vm10, %v1647_v13, %v1643_v23 }
0x156b   :  { %v1652_v0 = vmul.f32 %v1651_v28, %v1648_v10 }
0x156d   :  { %v1653_v56 = vadd.f32 %v1652_v0, %v3395_v41  ;;  %v1849_v41 = vld [vmem:[%s3684_s11 + $0x30] sm:$0xff] }
0x156e   :  { %1961 = vmatpush.msra.mxu3 %v1849_v41  ;;  %1884 = vmatpush.msrb.mxu2 %v1849_v41 }
0x156f   :  { %2221 = vtanh.f32 %v1653_v56  ;;  %1984 = vmatpush.msrb.mxu0 %v1849_v41 }
0x1570   :  { %1962 = vmatpush.msra.mxu3 %v1848_v12  ;;  %1885 = vmatpush.msrb.mxu2 %v1848_v12 }
0x1571   :  { %1985 = vmatpush.msrb.mxu0 %v1848_v12 }
0x1572   :  { %1963 = vmatpush.msra.mxu3 %v1847_v61  ;;  %1886 = vmatpush.msrb.mxu2 %v1847_v61 }
0x1573   :  { %1986 = vmatpush.msrb.mxu0 %v1847_v61 }
0x1574   :  { %1964 = vmatpush.msra.mxu3 %v1846_v36  ;;  %1887 = vmatpush.msrb.mxu2 %v1846_v36 }
0x1575   :  { %v2222_v50 = vpop.eup %2221  ;;  %1987 = vmatpush.msrb.mxu0 %v1846_v36 }
0x1576   :  { %v1655_v59 = vsub.f32 %v3541_v16, %v2222_v50  ;;  %1965 = vmatpush.msra.mxu3 %v1845_v40  ;;  %1888 = vmatpush.msrb.mxu2 %v1845_v40 }
0x1577   :  { %1988 = vmatpush.msrb.mxu0 %v1845_v40 }
0x1578   :  { %1657 = vrot.lane.b32.xlu0 %v1655_v59, %s2253_s6  ;;  %1966 = vmatpush.msra.mxu3 %v1844_v2  ;;  %v3710_v59 = vsel %vm2667_vm15, %v3343_v30, %v3341_v7 }
0x1579   :  { %1889 = vmatpush.msrb.mxu2 %v1844_v2  ;;  %1989 = vmatpush.msrb.mxu0 %v1844_v2 }
0x157a   :  { %1967 = vmatpush.msra.mxu3 %v1843_v25 }
0x157b   :  { %1890 = vmatpush.msrb.mxu2 %v1843_v25  ;;  %1990 = vmatpush.msrb.mxu0 %v1843_v25 }
0x15ea   :  { %v1658_v18 = vpop.permute.xlu0 %1657 }
0x15eb   :  { %v1660_v35 = vmul.f32 %v1658_v18, %v1648_v10  ;;  %v3709_v10 = vsub.f32 1.0, %v3045_v1 }
0x15ed   :  { %1662 = vrot.lane.b32.xlu1 %v1660_v35, %s2253_s6 }
0x165f   :  { %v1663_v34 = vpop.permute.xlu1 %1662 }
0x1660   :  { %v1665_v11 = vadd.f32 %v2222_v50, %v1663_v34 }
0x1662   :  { %v3585_v39 = vmul.f32 %v3001_v14, %v1665_v11  ;;  %v3708_v14 = vsel %vm2667_vm15, %v3345_v46, %v3347_v57 }
0x1664   :  { %v1668_v48 = vadd.f32 %v1667_v22, %v3585_v39 }
0x1666   :  { %2096 = vmatmul.msk.f32.vlgmr.msra.gmra.mxu2 %vm342_vm5, %v1668_v48  ;;  %2097 = vmatmul.msk.f32.vlgmr.msrb.gmra.mxu3 %vm342_vm5, %v1668_v48  ;;  %v1750_v0 = vmul.f32 %v1668_v48, %v3709_v10 }
0x166e   :  { %2110 = vmatmul.msk.f32.vlgmr.msra.gmra.mxu3 %vm342_vm5, %v1006_v21 }
0x16e9   :  { %v1689_v15 = vpop.f32.mrf.mxu2  ;;  %v1709_v38 = vpop.f32.mrf.mxu3 }
0x16ea   :  { %v1713_v45 = vadd.f32 %v3708_v14, %v1689_v15  ;;  %v1734_v9 = vadd.f32 %v3408_v49, %v1709_v38 }
0x16ec   :  { %v2098_v44 = vmul.f32 -1.442695, %v1713_v45 }
0x16ee   :  { %2223 = vpow2.f32 %v2098_v44 }
0x16f1   :  { %v1969_v16 = vpop.f32.mrf.mxu3 }
0x16f2   :  { %1995 = vst.msk [vmem:[%s3686_s13] sm:$0xff] %vm338_vm3, %v1969_v16 }
0x16f4   :  { %v2224_v55 = vpop.eup %2223 }
0x16f5   :  { %v1717_v52 = vadd.f32 1.0, %v2224_v55  ;;  %v1837_v55 = vsel %vm338_vm3, %v3488_v8, %v3585_v39 }
0x16f7   :  { %2225 = vrcp.f32 %v1717_v52  ;;  %v1729_v47 = vand.u32 2147483648, %v1717_v52  ;;  %v1727_v51 = vand.u32 2147483647, %v1717_v52  ;;  %vm1723_vm7 = vweird.f32 %v1717_v52 }
0x16f9   :  { %v1730_v57 = vor.u32 1.1754944e-38, %v1729_v47  ;;  %vm1728_vm12 = vcmp.eq.f32.partialorder %v1727_v51, 8.507059e+37 }
0x16fd   :  { %v2226_v62 = vpop.eup %2225 }
0x16fe   :  { %v1719_v17 = vmul.f32 %v2226_v62, %v1717_v52  ;;  %vm1724_vm11 = vweird.f32 %v2226_v62  ;;  %v1840_v52 = vsel %vm338_vm3, %v3585_v39, %v3488_v8 }
0x16ff   :  { %vm1725_vm9 = vmor %vm1723_vm7, %vm1724_vm11 }
0x1700   :  { %v1720_v31 = vsub.f32 1.0, %v1719_v17 }
0x1702   :  { %v1721_v33 = vmul.f32 %v2226_v62, %v1720_v31 }
0x1704   :  { %v1722_v46 = vadd.f32 %v2226_v62, %v1721_v33 }
0x1706   :  { %v1726_v54 = vsel %vm1725_vm9, %v2226_v62, %v1722_v46 }
0x1707   :  { %v1731_v60 = vsel %vm1728_vm12, %v1730_v57, %v1726_v54 }
0x1708   :  { %v1735_v42 = vmul.f32 %v1734_v9, %v1731_v60 }
0x170a   :  { %v1736_v53 = vadd.f32 %v1735_v42, %v3403_v27 }
0x170c   :  { %2227 = vtanh.f32 %v1736_v53 }
0x1712   :  { %v2228_v20 = vpop.eup %2227 }
0x1713   :  { %v1738_v19 = vsub.f32 %v1668_v48, %v2228_v20 }
0x1715   :  { %1740 = vrot.lane.b32.xlu2 %v1738_v19, %s2253_s6 }
0x176f   :  { %v1741_v6 = vpop.permute.xlu2 %1740 }
0x1770   :  { %v1743_v13 = vmul.f32 %v1741_v6, %v1731_v60 }
0x1772   :  { %1745 = vrot.lane.b32.xlu0 %v1743_v13, %s2253_s6 }
0x17e4   :  { %v1746_v23 = vpop.permute.xlu0 %1745 }
0x17e5   :  { %v1748_v28 = vadd.f32 %v2228_v20, %v1746_v23 }
0x17e7   :  { %v1749_v56 = vmul.f32 %v3045_v1, %v1748_v28 }
0x17e9   :  { %v1751_v50 = vadd.f32 %v1750_v0, %v1749_v56  ;;  %v1836_v16 = vsel %vm338_vm3, %v3456_v63, %v1749_v56  ;;  %v1841_v62 = vsel %vm338_vm3, %v1749_v56, %v3456_v63 }
0x17eb   :  { %2099 = vmatmul.msk.f32.vlgmr.msra.gmra.mxu0 %vm342_vm5, %v1751_v50  ;;  %2100 = vmatmul.msk.f32.vlgmr.msra.gmra.mxu1 %vm342_vm5, %v1751_v50  ;;  %v1833_v45 = vmul.f32 %v1751_v50, %v131_v26  ;;  %v1839_v26 = vsel %vm338_vm3, %v3538_v24, %v3521_v5 }
0x1868   :  { %v1772_v27 = vpop.f32.mrf.mxu0  ;;  %v1792_v25 = vpop.f32.mrf.mxu1 }
0x1869   :  { %v1796_v32 = vadd.f32 %v3710_v59, %v1772_v27  ;;  %v1817_v7 = vadd.f32 %v3408_v49, %v1792_v25 }
0x186b   :  { %v2101_v18 = vmul.f32 -1.442695, %v1796_v32 }
0x186d   :  { %2229 = vpow2.f32 %v2101_v18 }
0x1873   :  { %v2230_v35 = vpop.eup %2229 }
0x1874   :  { %v1800_v41 = vadd.f32 1.0, %v2230_v35 }
0x1876   :  { %2231 = vrcp.f32 %v1800_v41  ;;  %v1812_v36 = vand.u32 2147483648, %v1800_v41  ;;  %v1810_v2 = vand.u32 2147483647, %v1800_v41  ;;  %vm1806_vm0 = vweird.f32 %v1800_v41 }
0x1878   :  { %v1813_v29 = vor.u32 1.1754944e-38, %v1812_v36  ;;  %vm1811_vm15 = vcmp.eq.f32.partialorder %v1810_v2, 8.507059e+37 }
0x187c   :  { %v2232_v12 = vpop.eup %2231 }
0x187d   :  { %v1802_v61 = vmul.f32 %v2232_v12, %v1800_v41  ;;  %vm1807_vm13 = vweird.f32 %v2232_v12 }
0x187e   :  { %vm1808_vm14 = vmor %vm1806_vm0, %vm1807_vm13 }
0x187f   :  { %v1803_v1 = vsub.f32 1.0, %v1802_v61 }
0x1881   :  { %v1804_v40 = vmul.f32 %v2232_v12, %v1803_v1 }
0x1883   :  { %v1805_v34 = vadd.f32 %v2232_v12, %v1804_v40 }
0x1885   :  { %v1809_v11 = vsel %vm1808_vm14, %v2232_v12, %v1805_v34 }
0x1886   :  { %v1814_v30 = vsel %vm1811_vm15, %v1813_v29, %v1809_v11 }
0x1887   :  { %v1818_v37 = vmul.f32 %v1817_v7, %v1814_v30 }
0x1889   :  { %v1819_v22 = vadd.f32 %v1818_v37, %v3415_v4 }
0x188b   :  { %2233 = vtanh.f32 %v1819_v22 }
0x1891   :  { %v2234_v48 = vpop.eup %2233 }
0x1892   :  { %v1821_v58 = vsub.f32 %v1751_v50, %v2234_v48 }
0x1894   :  { %1823 = vrot.lane.b32.xlu1 %v1821_v58, %s2253_s6 }
0x1906   :  { %v1824_v21 = vpop.permute.xlu1 %1823 }
0x1907   :  { %v1826_v15 = vmul.f32 %v1824_v21, %v1814_v30 }
0x1909   :  { %1828 = vrot.lane.b32.xlu2 %v1826_v15, %s2253_s6 }
0x1963   :  { %v1829_v38 = vpop.permute.xlu2 %1828 }
0x1964   :  { %v1831_v14 = vadd.f32 %v2234_v48, %v1829_v38 }
0x1966   :  { %v1832_v49 = vmul.f32 %v3252_v3, %v1831_v14  ;;  %v1838_v3 = vsel %vm338_vm3, %v3521_v5, %v3538_v24 }
0x1968   :  { %v1834_v44 = vadd.f32 %v1833_v45, %v1832_v49  ;;  %v1835_v4 = vsel %vm338_vm3, %v3424_v43, %v1832_v49  ;;  %v1842_v17 = vsel %vm338_vm3, %v1832_v49, %v3424_v43 }
0x1969   :  { %2102 = vmatmul.msk.f32.vlgmr.msrb.gmra.mxu2 %vm342_vm5, %v1835_v4 }
0x196a   :  { %2111 = vmatmul.msk.f32.vlgmr.msrb.gmra.mxu0 %vm342_vm5, %v1834_v44 }
0x1971   :  { %2103 = vmatmul.msk.f32.gmra.mxu2 %vm342_vm5, %v1836_v16 }
0x1979   :  { %2104 = vmatmul.msk.f32.gmra.mxu2 %vm342_vm5, %v1837_v55 }
0x1981   :  { %2105 = vmatmul.msk.f32.gmra.mxu2 %vm342_vm5, %v1838_v3 }
0x1989   :  { %2106 = vmatmul.msk.f32.gmra.mxu2 %vm342_vm5, %v1839_v26 }
0x1991   :  { %2107 = vmatmul.msk.f32.gmra.mxu2 %vm342_vm5, %v1840_v52 }
0x1999   :  { %2108 = vmatmul.msk.f32.gmra.mxu2 %vm342_vm5, %v1841_v62 }
0x19a1   :  { %2109 = vmatmul.msk.f32.gmra.mxu2 %vm342_vm5, %v1842_v17 }
0x19e7   :  { %v1992_v31 = vpop.f32.mrf.mxu0 }
0x19e8   :  { %1996 = vst.msk [vmem:[%s3686_s13 + $0x8] sm:$0xff] %vm338_vm3, %v1992_v31 }
0x19ec   :  { %v1892_v5 = vpop.f32.mrf.mxu2 }
0x19f4   :  { %v1895_v8 = vpop.f32.mrf.mxu2 }
0x19f5   :  { %1917 = vrot.lane.b32.xlu0 %v1895_v8, %s2251_s25 }
0x19fc   :  { %v1898_v24 = vpop.f32.mrf.mxu2 }
0x19fd   :  { %1921 = vrot.lane.b32.xlu2 %v1898_v24, %s2253_s6 }
0x1a04   :  { %v1901_v63 = vpop.f32.mrf.mxu2 }
0x1a0c   :  { %v1904_v39 = vpop.f32.mrf.mxu2 }
0x1a14   :  { %v1907_v47 = vpop.f32.mrf.mxu2 }
0x1a15   :  { %1929 = vrot.lane.b32.xlu1 %v1907_v47, %s2251_s25 }
0x1a1c   :  { %v1910_v43 = vpop.f32.mrf.mxu2 }
0x1a1d   :  { %1925 = vrot.lane.b32.xlu1 %v1901_v63, %s2262_s21  ;;  %1933 = vrot.lane.b32.xlu0 %v1910_v43, %s2253_s6 }
0x1a24   :  { %v1913_v33 = vpop.f32.mrf.mxu2 }
0x1a25   :  { %1937 = vrot.lane.b32.xlu2 %v1913_v33, %s2262_s21 }
0x1a57   :  { %v1922_v57 = vpop.permute.xlu2 %1921 }
0x1a67   :  { %v1918_v51 = vpop.permute.xlu0 %1917 }
0x1a68   :  { %v1940_v54 = vsel %vm338_vm3, %v1892_v5, %v1918_v51 }
0x1a69   :  { %v1941_v60 = vsel %vm342_vm5, %v1940_v54, %v1922_v57 }
0x1a7f   :  { %v1938_v20 = vpop.permute.xlu2 %1937 }
0x1a87   :  { %v1930_v46 = vpop.permute.xlu1 %1929 }
0x1a88   :  { %v1944_v9 = vsel %vm338_vm3, %v1904_v39, %v1930_v46 }
0x1a8f   :  { %v1926_v42 = vpop.permute.xlu1 %1925  ;;  %v1934_v53 = vpop.permute.xlu0 %1933 }
0x1a90   :  { %v1943_v19 = vsel %vm1942_vm1, %v1941_v60, %v1926_v42  ;;  %v1945_v6 = vsel %vm342_vm5, %v1944_v9, %v1934_v53 }
0x1a91   :  { %1947 = vst [vmem:[%s3685_s12] sm:$0xff] %v1943_v19  ;;  %v1946_v13 = vsel %vm1942_vm1, %v1945_v6, %v1938_v20 }
0x1a92   :  { %1948 = vst [vmem:[%s3685_s12 + $0x8] sm:$0xff] %v1946_v13 }

</bundles_post_ra>
